<compile_context>
chip_gen: v6e
topology: v6e:2x2x1
jax: 0.10.0
libtpu: 0.0.40
codegen_flags: <defaults>
</compile_context>

<pallas_src>
import math
import functools

import jax
import jax.numpy as jnp
from jax import lax
from jax.experimental import pallas as pl
from jax.experimental.pallas import tpu as pltpu

LANE = 128            # TPU lane width; every feature dim is padded to this
NEG_INF = 1e20        # magnitude of the masked_fill value in the reference


def _pad_up(n, m):
    return ((n + m - 1) // m) * m


# ----------------------------- Pallas kernel -----------------------------

def _decoder_stack_kernel(
        x0_ref, enc_ref, tbias_ref, sbias_ref,
        qkv1_ref, fc1_ref, qkv2_ref, fc2_ref, nrm_ref,
        ffw1_ref, ffb1_ref, ffw2_ref, ffb2_ref,
        fcw_ref, fcb_ref,
        out_ref,
        x_scr, ctx_scr,
        *, heads, E, eps):
    """One (batch element, layer) grid step of the fused decoder stack.

    Block views:
      x0_ref (L, Ep)        enc_ref (Ls, Ep)
      tbias_ref (L, L)      sbias_ref (L, Ls)          (additive, pre-scaled)
      qkv*_ref (3, Ep, Wd)  fc*_ref (Wd, Ep)           Wd = heads*LANE
      nrm_ref (8, Ep)       rows: [g0,b0,g1,b1,g2,b2,·,·], pads are zero
      ffw1 (Ep, Fp) ffb1 (1, Fp) ffw2 (Fp, Ep) ffb2 (1, Ep)
      fcw (Ep, Vp)  fcb (1, Vp)
      out_ref (L, Vp)
      x_scr (L, Ep)  ctx_scr (L, Wd)   VMEM scratch (persist across layers)
    """
    l = pl.program_id(1)
    n_layers = pl.num_programs(1)

    # Load the residual stream at layer 0 of each batch element; it then stays
    # resident in VMEM scratch for the whole layer sweep.
    @pl.when(l == 0)
    def _():
        x_scr[...] = x0_ref[...]

    x = x_scr[...]                                   # (L, Ep); padded lanes are 0
    nrm = nrm_ref[...]                               # (8, Ep)

    def layer_norm(y, g, b):
        # Padded lanes of y are exactly 0, so full-lane sums divided by the true
        # E give the correct moments; gamma/beta pads are 0 so padded lanes of
        # the result stay 0 (keeps the zero-pad invariant through the stack).
        mu = jnp.sum(y, axis=-1, keepdims=True) * (1.0 / E)
        ms = jnp.sum(y * y, axis=-1, keepdims=True) * (1.0 / E)
        var = ms - mu * mu
        return (y - mu) * lax.rsqrt(var + eps) * g + b

    def mha(xq, xkv, bias, qkv_ref, fc_ref):
        # Lane-dense "wide" projections: head h occupies the 128-lane aligned
        # window [h*LANE, h*LANE + D) of the Wd = heads*128 output lanes, so the
        # per-head loop below only touches full-vreg aligned slices.
        qw = jnp.dot(xq, qkv_ref[0], preferred_element_type=jnp.float32)   # (Lq, Wd)
        kw = jnp.dot(xkv, qkv_ref[1], preferred_element_type=jnp.float32)  # (Lk, Wd)
        vw = jnp.dot(xkv, qkv_ref[2], preferred_element_type=jnp.float32)  # (Lk, Wd)
        for h in range(heads):                       # static unroll; heads is small
            sl = slice(h * LANE, (h + 1) * LANE)
            # scores: contract lane dim of q and k directly (no materialized K^T).
            energy = lax.dot_general(qw[:, sl], kw[:, sl],
                                     (((1,), (1,)), ((), ())),
                                     preferred_element_type=jnp.float32)   # (Lq, Lk)
            energy = energy + bias                   # additive mask; scale in Wq
            m = jnp.max(energy, axis=-1, keepdims=True)
            p = jnp.exp(energy - m)
            attn = p * pl.reciprocal(jnp.sum(p, axis=-1, keepdims=True),
                                     approx=True)
            ctx_scr[:, sl] = jnp.dot(attn, vw[:, sl],
                                     preferred_element_type=jnp.float32)
        # Head merge + output projection (bias-free fc) as one lane-dense matmul.
        return jnp.dot(ctx_scr[...], fc_ref[...],
                       preferred_element_type=jnp.float32)                  # (Lq, Ep)

    # --- self attention (q = k = v = x, target mask) + residual + LayerNorm
    a = mha(x, x, tbias_ref[...], qkv1_ref, fc1_ref)
    x = layer_norm(a + x, nrm[0:1], nrm[1:2])

    # --- cross attention (k = v = encoder output, source mask) + residual + LayerNorm
    enc = enc_ref[...]
    a = mha(x, enc, sbias_ref[...], qkv2_ref, fc2_ref)
    x = layer_norm(a + x, nrm[2:3], nrm[3:4])

    # --- feed forward (Linear -> ReLU -> Linear) + residual + LayerNorm
    h1 = jnp.dot(x, ffw1_ref[...], preferred_element_type=jnp.float32) + ffb1_ref[...]
    h1 = jnp.maximum(h1, 0.0)
    f = jnp.dot(h1, ffw2_ref[...], preferred_element_type=jnp.float32) + ffb2_ref[...]
    x = layer_norm(f + x, nrm[4:5], nrm[5:6])

    x_scr[...] = x

    # --- fused fc_out: only the logits ever go back to HBM.
    @pl.when(l == n_layers - 1)
    def _():
        out_ref[...] = (jnp.dot(x, fcw_ref[...],
                                preferred_element_type=jnp.float32) + fcb_ref[...])


# ----------------------------- Pallas wrapper -----------------------------

def decoder_stack(x, enc, tbias, sbias, params, embed_size, heads, eps=1e-5):
    N, L, Ep = x.shape
    L_src = enc.shape[1]
    Ln = params["qkv1"].shape[0]
    Wd = params["qkv1"].shape[-1]
    Fp = params["ffw1"].shape[-1]
    Vp = params["fcw"].shape[-1]

    kernel = functools.partial(_decoder_stack_kernel, heads=heads, E=embed_size,
                               eps=eps)
    return pl.pallas_call(
        kernel,
        out_shape=jax.ShapeDtypeStruct((N, L, Vp), jnp.float32),
        grid=(N, Ln),
        in_specs=[
            pl.BlockSpec((None, L, Ep), lambda n, l: (n, 0, 0)),         # x0
            pl.BlockSpec((None, L_src, Ep), lambda n, l: (n, 0, 0)),     # encoder out
            pl.BlockSpec((None, L, L), lambda n, l: (n, 0, 0)),          # target bias
            pl.BlockSpec((None, L, L_src), lambda n, l: (n, 0, 0)),      # source bias
            pl.BlockSpec((None, 3, Ep, Wd), lambda n, l: (l, 0, 0, 0)),  # self qkv
            pl.BlockSpec((None, Wd, Ep), lambda n, l: (l, 0, 0)),        # self fc
            pl.BlockSpec((None, 3, Ep, Wd), lambda n, l: (l, 0, 0, 0)),  # cross qkv
            pl.BlockSpec((None, Wd, Ep), lambda n, l: (l, 0, 0)),        # cross fc
            pl.BlockSpec((None, 8, Ep), lambda n, l: (l, 0, 0)),         # norms
            pl.BlockSpec((None, Ep, Fp), lambda n, l: (l, 0, 0)),        # ffn w1
            pl.BlockSpec((None, 1, Fp), lambda n, l: (l, 0, 0)),         # ffn b1
            pl.BlockSpec((None, Fp, Ep), lambda n, l: (l, 0, 0)),        # ffn w2
            pl.BlockSpec((None, 1, Ep), lambda n, l: (l, 0, 0)),         # ffn b2
            pl.BlockSpec((Ep, Vp), lambda n, l: (0, 0)),                 # fc_out w
            pl.BlockSpec((1, Vp), lambda n, l: (0, 0)),                  # fc_out b
        ],
        out_specs=pl.BlockSpec((None, L, Vp), lambda n, l: (n, 0, 0)),
        scratch_shapes=[
            pltpu.VMEM((L, Ep), jnp.float32),    # residual stream across layers
            pltpu.VMEM((L, Wd), jnp.float32),    # per-head context assembly
        ],
        compiler_params=pltpu.CompilerParams(
            dimension_semantics=("parallel", "arbitrary")),
    )(x, enc, tbias, sbias,
      params["qkv1"], params["fc1"], params["qkv2"], params["fc2"], params["nrm"],
      params["ffw1"], params["ffb1"], params["ffw2"], params["ffb2"],
      params["fcw"], params["fcb"])


# ----------------------------- model forward -----------------------------

def decoder_forward(tokens, enc_out, source_mask, target_mask, params,
                    embed_size, heads):
    N, L = tokens.shape
    E = embed_size
    Ep = params["fcw"].shape[0]
    vocab = params["word_emb"].shape[0]
    scale = 1.0 / math.sqrt(E)

    # Embedding gather + positional add: plain-JAX glue (dropout = identity).
    positions = jnp.arange(L, dtype=jnp.int32)
    x = params["word_emb"][tokens] + params["pos_emb"][positions][None, :, :]
    x = jnp.pad(x, ((0, 0), (0, 0), (0, Ep - E)))
    enc = jnp.pad(enc_out, ((0, 0), (0, 0), (0, Ep - E)))

    # Additive mask bias (0 where mask==1, -1e20*scale where mask==0).  It is
    # pre-scaled because 1/sqrt(embed_size) is folded into Wq at init.
    tbias = (target_mask.astype(jnp.float32) - 1.0) * (NEG_INF * scale)
    sbias = (source_mask.astype(jnp.float32) - 1.0) * (NEG_INF * scale)

    logits = decoder_stack(x, enc, tbias, sbias, params, E, heads)
    return logits[:, :, :vocab]


# ----------------------------- parameter init -----------------------------

def _pad_2d(w, rows, cols):
    out = jnp.zeros((rows, cols), jnp.float32)
    return out.at[:w.shape[0], :w.shape[1]].set(w)


def _expand_head_proj(w_small, heads, E, Ep):
    # Shared per-head (D, D) Linear -> (Ep, heads*LANE) lane-dense projection:
    # head h reads input lanes [h*D, (h+1)*D) and writes the 128-lane aligned
    # output window [h*LANE, h*LANE + D); everything else is zero.
    D = E // heads
    w = jnp.zeros((Ep, heads * LANE), jnp.float32)
    for h in range(heads):
        w = w.at[h * D:(h + 1) * D, h * LANE:h * LANE + D].set(w_small)
    return w


def _expand_head_merge(w_fc, heads, E, Ep):
    # (E, E) fc weight -> (heads*LANE, Ep): rows [h*LANE, h*LANE + D) carry the
    # head-h rows of fc; padded rows/cols are zero.
    D = E // heads
    w = jnp.zeros((heads * LANE, Ep), jnp.float32)
    for h in range(heads):
        w = w.at[h * LANE:h * LANE + D, :E].set(w_fc[h * D:(h + 1) * D, :])
    return w


def init_params(key, vocab, E, num_layers, heads, forward_expansion, max_length):
    D = E // heads
    F = forward_expansion * E
    Ep = _pad_up(E, LANE)
    Fp = _pad_up(F, LANE)
    Vp = _pad_up(vocab, LANE)
    scale = 1.0 / math.sqrt(E)

    keys = iter(jax.random.split(key, num_layers * 10 + 4))

    def w(shape, fan_in):
        return jax.random.normal(next(keys), shape, jnp.float32) / math.sqrt(fan_in)

    def attn_pack(fold_scale):
        # Per-head (D,D) Linear weights shared across heads (as in the reference);
        # the 1/sqrt(embed_size) scale is folded into Wq.
        wq = w((D, D), D) * (scale if fold_scale else 1.0)
        wk = w((D, D), D)
        wv = w((D, D), D)
        wfc = w((E, E), E)                      # fc is bias=False in the reference
        qkv = jnp.stack([_expand_head_proj(wq, heads, E, Ep),
                         _expand_head_proj(wk, heads, E, Ep),
                         _expand_head_proj(wv, heads, E, Ep)])
        return qkv, _expand_head_merge(wfc, heads, E, Ep)

    gamma = jnp.zeros((Ep,), jnp.float32).at[:E].set(1.0)
    beta = jnp.zeros((Ep,), jnp.float32)
    nrm_layer = jnp.stack([gamma, beta, gamma, beta, gamma, beta, beta, beta])  # (8, Ep)

    qkv1, fc1, qkv2, fc2 = [], [], [], []
    nrm, ffw1, ffb1, ffw2, ffb2 = [], [], [], [], []
    for _ in range(num_layers):
        q1, f1 = attn_pack(True)
        q2, f2 = attn_pack(True)
        qkv1.append(q1); fc1.append(f1)
        qkv2.append(q2); fc2.append(f2)
        nrm.append(nrm_layer)
        ffw1.append(_pad_2d(w((E, F), E), Ep, Fp))
        ffb1.append(jnp.zeros((1, Fp), jnp.float32))
        ffw2.append(_pad_2d(w((F, E), F), Fp, Ep))
        ffb2.append(jnp.zeros((1, Ep), jnp.float32))

    params = {
        "word_emb": jax.random.normal(next(keys), (vocab, E), jnp.float32) * 0.02,
        "pos_emb": jax.random.normal(next(keys), (max_length, E), jnp.float32) * 0.02,
        "qkv1": jnp.stack(qkv1), "fc1": jnp.stack(fc1),
        "qkv2": jnp.stack(qkv2), "fc2": jnp.stack(fc2),
        "nrm": jnp.stack(nrm),
        "ffw1": jnp.stack(ffw1), "ffb1": jnp.stack(ffb1),
        "ffw2": jnp.stack(ffw2), "ffb2": jnp.stack(ffb2),
        "fcw": _pad_2d(w((E, vocab), E), Ep, Vp),
        "fcb": jnp.zeros((1, Vp), jnp.float32),
    }
    return params


# ----------------------------- main -----------------------------

if __name__ == "__main__":
    # Small, deterministic config.
    N, L, L_src = 2, 8, 8
    vocab, E, num_layers, heads, fwd_exp, max_len = 50, 32, 2, 4, 2, 16

    key = jax.random.PRNGKey(0)
    pkey, tkey, ekey = jax.random.split(key, 3)

    params = init_params(pkey, vocab, E, num_layers, heads, fwd_exp, max_len)

    tokens = jax.random.randint(tkey, (N, L), 0, vocab, dtype=jnp.int32)      # x: (N, L)
    encoder_output = jax.random.normal(ekey, (N, L_src, E), jnp.float32)      # (N, L_src, E)

    # Masks (0/1): causal lower-triangular target mask; all-ones source mask.
    target_mask = jnp.broadcast_to(jnp.tril(jnp.ones((L, L), jnp.float32)), (N, L, L))
    source_mask = jnp.ones((N, L, L_src), jnp.float32)

    out = decoder_forward(tokens, encoder_output, source_mask, target_mask,
                          params, E, heads)
    out = jax.block_until_ready(out)
    assert out.shape == (N, L, vocab)
    assert bool(jnp.all(jnp.isfinite(out)))
    print("KERNEL_OK")
</pallas_src>

<mosaic_0001>
module attributes {stable_mosaic.version = 11 : i64} {
  func.func @_decoder_stack_kernel(%arg0: i32, %arg1: i32, %arg2: memref<1x8x128xf32, #tpu.memory_space<vmem>>, %arg3: memref<1x8x128xf32, #tpu.memory_space<vmem>>, %arg4: memref<1x8x8xf32, #tpu.memory_space<vmem>>, %arg5: memref<1x8x8xf32, #tpu.memory_space<vmem>>, %arg6: memref<1x3x128x512xf32, #tpu.memory_space<vmem>>, %arg7: memref<1x512x128xf32, #tpu.memory_space<vmem>>, %arg8: memref<1x3x128x512xf32, #tpu.memory_space<vmem>>, %arg9: memref<1x512x128xf32, #tpu.memory_space<vmem>>, %arg10: memref<1x8x128xf32, #tpu.memory_space<vmem>>, %arg11: memref<1x128x128xf32, #tpu.memory_space<vmem>>, %arg12: memref<1x1x128xf32, #tpu.memory_space<vmem>>, %arg13: memref<1x128x128xf32, #tpu.memory_space<vmem>>, %arg14: memref<1x1x128xf32, #tpu.memory_space<vmem>>, %arg15: memref<128x128xf32, #tpu.memory_space<vmem>>, %arg16: memref<1x128xf32, #tpu.memory_space<vmem>>, %arg17: memref<1x8x128xf32, #tpu.memory_space<vmem>>, %arg18: memref<8x128xf32, #tpu.memory_space<vmem>>, %arg19: memref<8x512xf32, #tpu.memory_space<vmem>>) attributes {dimension_semantics = [#tpu.dimension_semantics<parallel>, #tpu.dimension_semantics<arbitrary>], iteration_bounds = array<i64: 2, 2>, scalar_prefetch = 0 : i64, scratch_operands = 2 : i64, tpu.core_type = #tpu.core_type<tc>, window_params = [{transform_indices = @transform_0, window_bounds = array<i64: 1, 8, 128>}, {transform_indices = @transform_1, window_bounds = array<i64: 1, 8, 128>}, {transform_indices = @transform_2, window_bounds = array<i64: 1, 8, 8>}, {transform_indices = @transform_3, window_bounds = array<i64: 1, 8, 8>}, {transform_indices = @transform_4, window_bounds = array<i64: 1, 3, 128, 512>}, {transform_indices = @transform_5, window_bounds = array<i64: 1, 512, 128>}, {transform_indices = @transform_6, window_bounds = array<i64: 1, 3, 128, 512>}, {transform_indices = @transform_7, window_bounds = array<i64: 1, 512, 128>}, {transform_indices = @transform_8, window_bounds = array<i64: 1, 8, 128>}, {transform_indices = @transform_9, window_bounds = array<i64: 1, 128, 128>}, {transform_indices = @transform_10, window_bounds = array<i64: 1, 1, 128>}, {transform_indices = @transform_11, window_bounds = array<i64: 1, 128, 128>}, {transform_indices = @transform_12, window_bounds = array<i64: 1, 1, 128>}, {pipeline_mode = #tpu.pipeline_mode<synchronous>, transform_indices = @transform_13, window_bounds = array<i64: 128, 128>}, {pipeline_mode = #tpu.pipeline_mode<synchronous>, transform_indices = @transform_14, window_bounds = array<i64: 1, 128>}, {transform_indices = @transform_15, window_bounds = array<i64: 1, 8, 128>}]} {
    %c0_i32 = arith.constant 0 : i32
    %0 = arith.cmpi eq, %arg1, %c0_i32 : i32
    %1 = arith.extui %0 : i1 to i32
    %c0_i32_0 = arith.constant 0 : i32
    %2 = arith.cmpi ne, %1, %c0_i32_0 : i32
    scf.if %2 {
      %c0_131 = arith.constant 0 : index
      %c0_132 = arith.constant 0 : index
      %c0_133 = arith.constant 0 : index
      %269 = vector.load %arg2[%c0_131, %c0_132, %c0_133] : memref<1x8x128xf32, #tpu.memory_space<vmem>>, vector<1x8x128xf32>
      %270 = vector.shape_cast %269 : vector<1x8x128xf32> to vector<8x128xf32>
      %c0_134 = arith.constant 0 : index
      %c0_135 = arith.constant 0 : index
      %271 = vector.load %arg18[%c0_134, %c0_135] : memref<8x128xf32, #tpu.memory_space<vmem>>, vector<8x128xf32>
      tpu.vector_store %arg18[%c0_134, %c0_135], %270 {strides = array<i32>} : memref<8x128xf32, #tpu.memory_space<vmem>>, vector<8x128xf32>,
    } else {
    }
    %c0 = arith.constant 0 : index
    %c0_1 = arith.constant 0 : index
    %3 = vector.load %arg18[%c0, %c0_1] : memref<8x128xf32, #tpu.memory_space<vmem>>, vector<8x128xf32>
    %c0_2 = arith.constant 0 : index
    %c0_3 = arith.constant 0 : index
    %c0_4 = arith.constant 0 : index
    %4 = vector.load %arg10[%c0_2, %c0_3, %c0_4] : memref<1x8x128xf32, #tpu.memory_space<vmem>>, vector<1x8x128xf32>
    %5 = vector.shape_cast %4 : vector<1x8x128xf32> to vector<8x128xf32>
    %c0_5 = arith.constant 0 : index
    %c0_6 = arith.constant 0 : index
    %c0_7 = arith.constant 0 : index
    %6 = vector.load %arg4[%c0_5, %c0_6, %c0_7] : memref<1x8x8xf32, #tpu.memory_space<vmem>>, vector<1x8x8xf32>
    %7 = vector.shape_cast %6 : vector<1x8x8xf32> to vector<8x8xf32>
    %c0_8 = arith.constant 0 : index
    %c0_9 = arith.constant 0 : index
    %c0_10 = arith.constant 0 : index
    %c0_11 = arith.constant 0 : index
    %8 = vector.load %arg6[%c0_8, %c0_9, %c0_10, %c0_11] : memref<1x3x128x512xf32, #tpu.memory_space<vmem>>, vector<1x1x128x512xf32>
    %9 = vector.shape_cast %8 : vector<1x1x128x512xf32> to vector<128x512xf32>
    %cst = arith.constant dense<0.000000e+00> : vector<8x512xf32>
    %10 = tpu.matmul %3, %9, %cst {dimension_numbers = #tpu.dot_dimension_numbers<[1], [0], [0], [1], [0, 0, 1, 1], [], []>} : vector<8x128xf32>, vector<128x512xf32>, vector<8x512xf32> -> vector<8x512xf32>
    %c0_12 = arith.constant 0 : index
    %c1 = arith.constant 1 : index
    %c0_13 = arith.constant 0 : index
    %c0_14 = arith.constant 0 : index
    %11 = vector.load %arg6[%c0_12, %c1, %c0_13, %c0_14] : memref<1x3x128x512xf32, #tpu.memory_space<vmem>>, vector<1x1x128x512xf32>
    %12 = vector.shape_cast %11 : vector<1x1x128x512xf32> to vector<128x512xf32>
    %cst_15 = arith.constant dense<0.000000e+00> : vector<8x512xf32>
    %13 = tpu.matmul %3, %12, %cst_15 {dimension_numbers = #tpu.dot_dimension_numbers<[1], [0], [0], [1], [0, 0, 1, 1], [], []>} : vector<8x128xf32>, vector<128x512xf32>, vector<8x512xf32> -> vector<8x512xf32>
    %c0_16 = arith.constant 0 : index
    %c2 = arith.constant 2 : index
    %c0_17 = arith.constant 0 : index
    %c0_18 = arith.constant 0 : index
    %14 = vector.load %arg6[%c0_16, %c2, %c0_17, %c0_18] : memref<1x3x128x512xf32, #tpu.memory_space<vmem>>, vector<1x1x128x512xf32>
    %15 = vector.shape_cast %14 : vector<1x1x128x512xf32> to vector<128x512xf32>
    %cst_19 = arith.constant dense<0.000000e+00> : vector<8x512xf32>
    %16 = tpu.matmul %3, %15, %cst_19 {dimension_numbers = #tpu.dot_dimension_numbers<[1], [0], [0], [1], [0, 0, 1, 1], [], []>} : vector<8x128xf32>, vector<128x512xf32>, vector<8x512xf32> -> vector<8x512xf32>
    %17 = vector.extract_strided_slice %10 {offsets = [0, 0], sizes = [8, 128], strides = [1, 1]} : vector<8x512xf32> to vector<8x128xf32>
    %18 = vector.extract_strided_slice %13 {offsets = [0, 0], sizes = [8, 128], strides = [1, 1]} : vector<8x512xf32> to vector<8x128xf32>
    %cst_20 = arith.constant dense<0.000000e+00> : vector<8x8xf32>
    %19 = tpu.matmul %17, %18, %cst_20 {dimension_numbers = #tpu.dot_dimension_numbers<[1], [1], [0], [0], [0, 0, 1, 0], [], []>} : vector<8x128xf32>, vector<8x128xf32>, vector<8x8xf32> -> vector<8x8xf32>
    %20 = arith.addf %19, %7 : vector<8x8xf32>
    %cst_21 = arith.constant dense<0xFF800000> : vector<8xf32>
    %21 = vector.multi_reduction <maximumf>, %20, %cst_21 [1] : vector<8x8xf32> to vector<8xf32>
    %22 = vector.shape_cast %21 : vector<8xf32> to vector<8x1xf32>
    %23 = vector.broadcast %22 : vector<8x1xf32> to vector<8x8xf32>
    %24 = arith.subf %20, %23 : vector<8x8xf32>
    %25 = math.exp %24 : vector<8x8xf32>
    %cst_22 = arith.constant dense<0.000000e+00> : vector<8xf32>
    %26 = vector.multi_reduction <add>, %25, %cst_22 [1] : vector<8x8xf32> to vector<8xf32>
    %27 = vector.shape_cast %26 : vector<8xf32> to vector<8x1xf32>
    %28 = tpu.reciprocal %27 {approx = true} : vector<8x1xf32> -> vector<8x1xf32>
    %29 = vector.broadcast %28 : vector<8x1xf32> to vector<8x8xf32>
    %30 = arith.mulf %25, %29 : vector<8x8xf32>
    %31 = vector.extract_strided_slice %16 {offsets = [0, 0], sizes = [8, 128], strides = [1, 1]} : vector<8x512xf32> to vector<8x128xf32>
    %cst_23 = arith.constant dense<0.000000e+00> : vector<8x128xf32>
    %32 = tpu.matmul %30, %31, %cst_23 {dimension_numbers = #tpu.dot_dimension_numbers<[1], [0], [0], [1], [0, 0, 1, 1], [], []>} : vector<8x8xf32>, vector<8x128xf32>, vector<8x128xf32> -> vector<8x128xf32>
    %c0_24 = arith.constant 0 : index
    %c0_25 = arith.constant 0 : index
    %33 = vector.load %arg19[%c0_24, %c0_25] : memref<8x512xf32, #tpu.memory_space<vmem>>, vector<8x128xf32>
    tpu.vector_store %arg19[%c0_24, %c0_25], %32 {strides = array<i32>} : memref<8x512xf32, #tpu.memory_space<vmem>>, vector<8x128xf32>,
    %34 = vector.extract_strided_slice %10 {offsets = [0, 128], sizes = [8, 128], strides = [1, 1]} : vector<8x512xf32> to vector<8x128xf32>
    %35 = vector.extract_strided_slice %13 {offsets = [0, 128], sizes = [8, 128], strides = [1, 1]} : vector<8x512xf32> to vector<8x128xf32>
    %cst_26 = arith.constant dense<0.000000e+00> : vector<8x8xf32>
    %36 = tpu.matmul %34, %35, %cst_26 {dimension_numbers = #tpu.dot_dimension_numbers<[1], [1], [0], [0], [0, 0, 1, 0], [], []>} : vector<8x128xf32>, vector<8x128xf32>, vector<8x8xf32> -> vector<8x8xf32>
    %37 = arith.addf %36, %7 : vector<8x8xf32>
    %cst_27 = arith.constant dense<0xFF800000> : vector<8xf32>
    %38 = vector.multi_reduction <maximumf>, %37, %cst_27 [1] : vector<8x8xf32> to vector<8xf32>
    %39 = vector.shape_cast %38 : vector<8xf32> to vector<8x1xf32>
    %40 = vector.broadcast %39 : vector<8x1xf32> to vector<8x8xf32>
    %41 = arith.subf %37, %40 : vector<8x8xf32>
    %42 = math.exp %41 : vector<8x8xf32>
    %cst_28 = arith.constant dense<0.000000e+00> : vector<8xf32>
    %43 = vector.multi_reduction <add>, %42, %cst_28 [1] : vector<8x8xf32> to vector<8xf32>
    %44 = vector.shape_cast %43 : vector<8xf32> to vector<8x1xf32>
    %45 = tpu.reciprocal %44 {approx = true} : vector<8x1xf32> -> vector<8x1xf32>
    %46 = vector.broadcast %45 : vector<8x1xf32> to vector<8x8xf32>
    %47 = arith.mulf %42, %46 : vector<8x8xf32>
    %48 = vector.extract_strided_slice %16 {offsets = [0, 128], sizes = [8, 128], strides = [1, 1]} : vector<8x512xf32> to vector<8x128xf32>
    %cst_29 = arith.constant dense<0.000000e+00> : vector<8x128xf32>
    %49 = tpu.matmul %47, %48, %cst_29 {dimension_numbers = #tpu.dot_dimension_numbers<[1], [0], [0], [1], [0, 0, 1, 1], [], []>} : vector<8x8xf32>, vector<8x128xf32>, vector<8x128xf32> -> vector<8x128xf32>
    %c0_30 = arith.constant 0 : index
    %c128 = arith.constant 128 : index
    %50 = vector.load %arg19[%c0_30, %c128] : memref<8x512xf32, #tpu.memory_space<vmem>>, vector<8x128xf32>
    tpu.vector_store %arg19[%c0_30, %c128], %49 {strides = array<i32>} : memref<8x512xf32, #tpu.memory_space<vmem>>, vector<8x128xf32>,
    %51 = vector.extract_strided_slice %10 {offsets = [0, 256], sizes = [8, 128], strides = [1, 1]} : vector<8x512xf32> to vector<8x128xf32>
    %52 = vector.extract_strided_slice %13 {offsets = [0, 256], sizes = [8, 128], strides = [1, 1]} : vector<8x512xf32> to vector<8x128xf32>
    %cst_31 = arith.constant dense<0.000000e+00> : vector<8x8xf32>
    %53 = tpu.matmul %51, %52, %cst_31 {dimension_numbers = #tpu.dot_dimension_numbers<[1], [1], [0], [0], [0, 0, 1, 0], [], []>} : vector<8x128xf32>, vector<8x128xf32>, vector<8x8xf32> -> vector<8x8xf32>
    %54 = arith.addf %53, %7 : vector<8x8xf32>
    %cst_32 = arith.constant dense<0xFF800000> : vector<8xf32>
    %55 = vector.multi_reduction <maximumf>, %54, %cst_32 [1] : vector<8x8xf32> to vector<8xf32>
    %56 = vector.shape_cast %55 : vector<8xf32> to vector<8x1xf32>
    %57 = vector.broadcast %56 : vector<8x1xf32> to vector<8x8xf32>
    %58 = arith.subf %54, %57 : vector<8x8xf32>
    %59 = math.exp %58 : vector<8x8xf32>
    %cst_33 = arith.constant dense<0.000000e+00> : vector<8xf32>
    %60 = vector.multi_reduction <add>, %59, %cst_33 [1] : vector<8x8xf32> to vector<8xf32>
    %61 = vector.shape_cast %60 : vector<8xf32> to vector<8x1xf32>
    %62 = tpu.reciprocal %61 {approx = true} : vector<8x1xf32> -> vector<8x1xf32>
    %63 = vector.broadcast %62 : vector<8x1xf32> to vector<8x8xf32>
    %64 = arith.mulf %59, %63 : vector<8x8xf32>
    %65 = vector.extract_strided_slice %16 {offsets = [0, 256], sizes = [8, 128], strides = [1, 1]} : vector<8x512xf32> to vector<8x128xf32>
    %cst_34 = arith.constant dense<0.000000e+00> : vector<8x128xf32>
    %66 = tpu.matmul %64, %65, %cst_34 {dimension_numbers = #tpu.dot_dimension_numbers<[1], [0], [0], [1], [0, 0, 1, 1], [], []>} : vector<8x8xf32>, vector<8x128xf32>, vector<8x128xf32> -> vector<8x128xf32>
    %c0_35 = arith.constant 0 : index
    %c256 = arith.constant 256 : index
    %67 = vector.load %arg19[%c0_35, %c256] : memref<8x512xf32, #tpu.memory_space<vmem>>, vector<8x128xf32>
    tpu.vector_store %arg19[%c0_35, %c256], %66 {strides = array<i32>} : memref<8x512xf32, #tpu.memory_space<vmem>>, vector<8x128xf32>,
    %68 = vector.extract_strided_slice %10 {offsets = [0, 384], sizes = [8, 128], strides = [1, 1]} : vector<8x512xf32> to vector<8x128xf32>
    %69 = vector.extract_strided_slice %13 {offsets = [0, 384], sizes = [8, 128], strides = [1, 1]} : vector<8x512xf32> to vector<8x128xf32>
    %cst_36 = arith.constant dense<0.000000e+00> : vector<8x8xf32>
    %70 = tpu.matmul %68, %69, %cst_36 {dimension_numbers = #tpu.dot_dimension_numbers<[1], [1], [0], [0], [0, 0, 1, 0], [], []>} : vector<8x128xf32>, vector<8x128xf32>, vector<8x8xf32> -> vector<8x8xf32>
    %71 = arith.addf %70, %7 : vector<8x8xf32>
    %cst_37 = arith.constant dense<0xFF800000> : vector<8xf32>
    %72 = vector.multi_reduction <maximumf>, %71, %cst_37 [1] : vector<8x8xf32> to vector<8xf32>
    %73 = vector.shape_cast %72 : vector<8xf32> to vector<8x1xf32>
    %74 = vector.broadcast %73 : vector<8x1xf32> to vector<8x8xf32>
    %75 = arith.subf %71, %74 : vector<8x8xf32>
    %76 = math.exp %75 : vector<8x8xf32>
    %cst_38 = arith.constant dense<0.000000e+00> : vector<8xf32>
    %77 = vector.multi_reduction <add>, %76, %cst_38 [1] : vector<8x8xf32> to vector<8xf32>
    %78 = vector.shape_cast %77 : vector<8xf32> to vector<8x1xf32>
    %79 = tpu.reciprocal %78 {approx = true} : vector<8x1xf32> -> vector<8x1xf32>
    %80 = vector.broadcast %79 : vector<8x1xf32> to vector<8x8xf32>
    %81 = arith.mulf %76, %80 : vector<8x8xf32>
    %82 = vector.extract_strided_slice %16 {offsets = [0, 384], sizes = [8, 128], strides = [1, 1]} : vector<8x512xf32> to vector<8x128xf32>
    %cst_39 = arith.constant dense<0.000000e+00> : vector<8x128xf32>
    %83 = tpu.matmul %81, %82, %cst_39 {dimension_numbers = #tpu.dot_dimension_numbers<[1], [0], [0], [1], [0, 0, 1, 1], [], []>} : vector<8x8xf32>, vector<8x128xf32>, vector<8x128xf32> -> vector<8x128xf32>
    %c0_40 = arith.constant 0 : index
    %c384 = arith.constant 384 : index
    %84 = vector.load %arg19[%c0_40, %c384] : memref<8x512xf32, #tpu.memory_space<vmem>>, vector<8x128xf32>
    tpu.vector_store %arg19[%c0_40, %c384], %83 {strides = array<i32>} : memref<8x512xf32, #tpu.memory_space<vmem>>, vector<8x128xf32>,
    %c0_41 = arith.constant 0 : index
    %c0_42 = arith.constant 0 : index
    %85 = vector.load %arg19[%c0_41, %c0_42] : memref<8x512xf32, #tpu.memory_space<vmem>>, vector<8x512xf32>
    %c0_43 = arith.constant 0 : index
    %c0_44 = arith.constant 0 : index
    %c0_45 = arith.constant 0 : index
    %86 = vector.load %arg7[%c0_43, %c0_44, %c0_45] : memref<1x512x128xf32, #tpu.memory_space<vmem>>, vector<1x512x128xf32>
    %87 = vector.shape_cast %86 : vector<1x512x128xf32> to vector<512x128xf32>
    %cst_46 = arith.constant dense<0.000000e+00> : vector<8x128xf32>
    %88 = tpu.matmul %85, %87, %cst_46 {dimension_numbers = #tpu.dot_dimension_numbers<[1], [0], [0], [1], [0, 0, 1, 1], [], []>} : vector<8x512xf32>, vector<512x128xf32>, vector<8x128xf32> -> vector<8x128xf32>
    %89 = arith.addf %88, %3 : vector<8x128xf32>
    %90 = vector.extract_strided_slice %5 {offsets = [0, 0], sizes = [1, 128], strides = [1, 1]} : vector<8x128xf32> to vector<1x128xf32>
    %91 = vector.extract_strided_slice %5 {offsets = [1, 0], sizes = [1, 128], strides = [1, 1]} : vector<8x128xf32> to vector<1x128xf32>
    %cst_47 = arith.constant dense<0.000000e+00> : vector<8xf32>
    %92 = vector.multi_reduction <add>, %89, %cst_47 [1] : vector<8x128xf32> to vector<8xf32>
    %93 = vector.shape_cast %92 : vector<8xf32> to vector<8x1xf32>
    %cst_48 = arith.constant 3.125000e-02 : f32
    %94 = vector.broadcast %cst_48 : f32 to vector<8x1xf32>
    %95 = arith.mulf %93, %94 : vector<8x1xf32>
    %96 = arith.mulf %89, %89 : vector<8x128xf32>
    %cst_49 = arith.constant dense<0.000000e+00> : vector<8xf32>
    %97 = vector.multi_reduction <add>, %96, %cst_49 [1] : vector<8x128xf32> to vector<8xf32>
    %98 = vector.shape_cast %97 : vector<8xf32> to vector<8x1xf32>
    %cst_50 = arith.constant 3.125000e-02 : f32
    %99 = vector.broadcast %cst_50 : f32 to vector<8x1xf32>
    %100 = arith.mulf %98, %99 : vector<8x1xf32>
    %101 = arith.mulf %95, %95 : vector<8x1xf32>
    %102 = arith.subf %100, %101 : vector<8x1xf32>
    %103 = vector.broadcast %95 : vector<8x1xf32> to vector<8x128xf32>
    %104 = arith.subf %89, %103 : vector<8x128xf32>
    %cst_51 = arith.constant 9.99999974E-6 : f32
    %105 = vector.broadcast %cst_51 : f32 to vector<8x1xf32>
    %106 = arith.addf %102, %105 : vector<8x1xf32>
    %107 = math.rsqrt %106 : vector<8x1xf32>
    %108 = vector.broadcast %107 : vector<8x1xf32> to vector<8x128xf32>
    %109 = arith.mulf %104, %108 : vector<8x128xf32>
    %110 = vector.broadcast %90 : vector<1x128xf32> to vector<8x128xf32>
    %111 = arith.mulf %109, %110 : vector<8x128xf32>
    %112 = vector.broadcast %91 : vector<1x128xf32> to vector<8x128xf32>
    %113 = arith.addf %111, %112 : vector<8x128xf32>
    %c0_52 = arith.constant 0 : index
    %c0_53 = arith.constant 0 : index
    %c0_54 = arith.constant 0 : index
    %114 = vector.load %arg3[%c0_52, %c0_53, %c0_54] : memref<1x8x128xf32, #tpu.memory_space<vmem>>, vector<1x8x128xf32>
    %115 = vector.shape_cast %114 : vector<1x8x128xf32> to vector<8x128xf32>
    %c0_55 = arith.constant 0 : index
    %c0_56 = arith.constant 0 : index
    %c0_57 = arith.constant 0 : index
    %116 = vector.load %arg5[%c0_55, %c0_56, %c0_57] : memref<1x8x8xf32, #tpu.memory_space<vmem>>, vector<1x8x8xf32>
    %117 = vector.shape_cast %116 : vector<1x8x8xf32> to vector<8x8xf32>
    %c0_58 = arith.constant 0 : index
    %c0_59 = arith.constant 0 : index
    %c0_60 = arith.constant 0 : index
    %c0_61 = arith.constant 0 : index
    %118 = vector.load %arg8[%c0_58, %c0_59, %c0_60, %c0_61] : memref<1x3x128x512xf32, #tpu.memory_space<vmem>>, vector<1x1x128x512xf32>
    %119 = vector.shape_cast %118 : vector<1x1x128x512xf32> to vector<128x512xf32>
    %cst_62 = arith.constant dense<0.000000e+00> : vector<8x512xf32>
    %120 = tpu.matmul %113, %119, %cst_62 {dimension_numbers = #tpu.dot_dimension_numbers<[1], [0], [0], [1], [0, 0, 1, 1], [], []>} : vector<8x128xf32>, vector<128x512xf32>, vector<8x512xf32> -> vector<8x512xf32>
    %c0_63 = arith.constant 0 : index
    %c1_64 = arith.constant 1 : index
    %c0_65 = arith.constant 0 : index
    %c0_66 = arith.constant 0 : index
    %121 = vector.load %arg8[%c0_63, %c1_64, %c0_65, %c0_66] : memref<1x3x128x512xf32, #tpu.memory_space<vmem>>, vector<1x1x128x512xf32>
    %122 = vector.shape_cast %121 : vector<1x1x128x512xf32> to vector<128x512xf32>
    %cst_67 = arith.constant dense<0.000000e+00> : vector<8x512xf32>
    %123 = tpu.matmul %115, %122, %cst_67 {dimension_numbers = #tpu.dot_dimension_numbers<[1], [0], [0], [1], [0, 0, 1, 1], [], []>} : vector<8x128xf32>, vector<128x512xf32>, vector<8x512xf32> -> vector<8x512xf32>
    %c0_68 = arith.constant 0 : index
    %c2_69 = arith.constant 2 : index
    %c0_70 = arith.constant 0 : index
    %c0_71 = arith.constant 0 : index
    %124 = vector.load %arg8[%c0_68, %c2_69, %c0_70, %c0_71] : memref<1x3x128x512xf32, #tpu.memory_space<vmem>>, vector<1x1x128x512xf32>
    %125 = vector.shape_cast %124 : vector<1x1x128x512xf32> to vector<128x512xf32>
    %cst_72 = arith.constant dense<0.000000e+00> : vector<8x512xf32>
    %126 = tpu.matmul %115, %125, %cst_72 {dimension_numbers = #tpu.dot_dimension_numbers<[1], [0], [0], [1], [0, 0, 1, 1], [], []>} : vector<8x128xf32>, vector<128x512xf32>, vector<8x512xf32> -> vector<8x512xf32>
    %127 = vector.extract_strided_slice %120 {offsets = [0, 0], sizes = [8, 128], strides = [1, 1]} : vector<8x512xf32> to vector<8x128xf32>
    %128 = vector.extract_strided_slice %123 {offsets = [0, 0], sizes = [8, 128], strides = [1, 1]} : vector<8x512xf32> to vector<8x128xf32>
    %cst_73 = arith.constant dense<0.000000e+00> : vector<8x8xf32>
    %129 = tpu.matmul %127, %128, %cst_73 {dimension_numbers = #tpu.dot_dimension_numbers<[1], [1], [0], [0], [0, 0, 1, 0], [], []>} : vector<8x128xf32>, vector<8x128xf32>, vector<8x8xf32> -> vector<8x8xf32>
    %130 = arith.addf %129, %117 : vector<8x8xf32>
    %cst_74 = arith.constant dense<0xFF800000> : vector<8xf32>
    %131 = vector.multi_reduction <maximumf>, %130, %cst_74 [1] : vector<8x8xf32> to vector<8xf32>
    %132 = vector.shape_cast %131 : vector<8xf32> to vector<8x1xf32>
    %133 = vector.broadcast %132 : vector<8x1xf32> to vector<8x8xf32>
    %134 = arith.subf %130, %133 : vector<8x8xf32>
    %135 = math.exp %134 : vector<8x8xf32>
    %cst_75 = arith.constant dense<0.000000e+00> : vector<8xf32>
    %136 = vector.multi_reduction <add>, %135, %cst_75 [1] : vector<8x8xf32> to vector<8xf32>
    %137 = vector.shape_cast %136 : vector<8xf32> to vector<8x1xf32>
    %138 = tpu.reciprocal %137 {approx = true} : vector<8x1xf32> -> vector<8x1xf32>
    %139 = vector.broadcast %138 : vector<8x1xf32> to vector<8x8xf32>
    %140 = arith.mulf %135, %139 : vector<8x8xf32>
    %141 = vector.extract_strided_slice %126 {offsets = [0, 0], sizes = [8, 128], strides = [1, 1]} : vector<8x512xf32> to vector<8x128xf32>
    %cst_76 = arith.constant dense<0.000000e+00> : vector<8x128xf32>
    %142 = tpu.matmul %140, %141, %cst_76 {dimension_numbers = #tpu.dot_dimension_numbers<[1], [0], [0], [1], [0, 0, 1, 1], [], []>} : vector<8x8xf32>, vector<8x128xf32>, vector<8x128xf32> -> vector<8x128xf32>
    %c0_77 = arith.constant 0 : index
    %c0_78 = arith.constant 0 : index
    %143 = vector.load %arg19[%c0_77, %c0_78] : memref<8x512xf32, #tpu.memory_space<vmem>>, vector<8x128xf32>
    tpu.vector_store %arg19[%c0_77, %c0_78], %142 {strides = array<i32>} : memref<8x512xf32, #tpu.memory_space<vmem>>, vector<8x128xf32>,
    %144 = vector.extract_strided_slice %120 {offsets = [0, 128], sizes = [8, 128], strides = [1, 1]} : vector<8x512xf32> to vector<8x128xf32>
    %145 = vector.extract_strided_slice %123 {offsets = [0, 128], sizes = [8, 128], strides = [1, 1]} : vector<8x512xf32> to vector<8x128xf32>
    %cst_79 = arith.constant dense<0.000000e+00> : vector<8x8xf32>
    %146 = tpu.matmul %144, %145, %cst_79 {dimension_numbers = #tpu.dot_dimension_numbers<[1], [1], [0], [0], [0, 0, 1, 0], [], []>} : vector<8x128xf32>, vector<8x128xf32>, vector<8x8xf32> -> vector<8x8xf32>
    %147 = arith.addf %146, %117 : vector<8x8xf32>
    %cst_80 = arith.constant dense<0xFF800000> : vector<8xf32>
    %148 = vector.multi_reduction <maximumf>, %147, %cst_80 [1] : vector<8x8xf32> to vector<8xf32>
    %149 = vector.shape_cast %148 : vector<8xf32> to vector<8x1xf32>
    %150 = vector.broadcast %149 : vector<8x1xf32> to vector<8x8xf32>
    %151 = arith.subf %147, %150 : vector<8x8xf32>
    %152 = math.exp %151 : vector<8x8xf32>
    %cst_81 = arith.constant dense<0.000000e+00> : vector<8xf32>
    %153 = vector.multi_reduction <add>, %152, %cst_81 [1] : vector<8x8xf32> to vector<8xf32>
    %154 = vector.shape_cast %153 : vector<8xf32> to vector<8x1xf32>
    %155 = tpu.reciprocal %154 {approx = true} : vector<8x1xf32> -> vector<8x1xf32>
    %156 = vector.broadcast %155 : vector<8x1xf32> to vector<8x8xf32>
    %157 = arith.mulf %152, %156 : vector<8x8xf32>
    %158 = vector.extract_strided_slice %126 {offsets = [0, 128], sizes = [8, 128], strides = [1, 1]} : vector<8x512xf32> to vector<8x128xf32>
    %cst_82 = arith.constant dense<0.000000e+00> : vector<8x128xf32>
    %159 = tpu.matmul %157, %158, %cst_82 {dimension_numbers = #tpu.dot_dimension_numbers<[1], [0], [0], [1], [0, 0, 1, 1], [], []>} : vector<8x8xf32>, vector<8x128xf32>, vector<8x128xf32> -> vector<8x128xf32>
    %c0_83 = arith.constant 0 : index
    %c128_84 = arith.constant 128 : index
    %160 = vector.load %arg19[%c0_83, %c128_84] : memref<8x512xf32, #tpu.memory_space<vmem>>, vector<8x128xf32>
    tpu.vector_store %arg19[%c0_83, %c128_84], %159 {strides = array<i32>} : memref<8x512xf32, #tpu.memory_space<vmem>>, vector<8x128xf32>,
    %161 = vector.extract_strided_slice %120 {offsets = [0, 256], sizes = [8, 128], strides = [1, 1]} : vector<8x512xf32> to vector<8x128xf32>
    %162 = vector.extract_strided_slice %123 {offsets = [0, 256], sizes = [8, 128], strides = [1, 1]} : vector<8x512xf32> to vector<8x128xf32>
    %cst_85 = arith.constant dense<0.000000e+00> : vector<8x8xf32>
    %163 = tpu.matmul %161, %162, %cst_85 {dimension_numbers = #tpu.dot_dimension_numbers<[1], [1], [0], [0], [0, 0, 1, 0], [], []>} : vector<8x128xf32>, vector<8x128xf32>, vector<8x8xf32> -> vector<8x8xf32>
    %164 = arith.addf %163, %117 : vector<8x8xf32>
    %cst_86 = arith.constant dense<0xFF800000> : vector<8xf32>
    %165 = vector.multi_reduction <maximumf>, %164, %cst_86 [1] : vector<8x8xf32> to vector<8xf32>
    %166 = vector.shape_cast %165 : vector<8xf32> to vector<8x1xf32>
    %167 = vector.broadcast %166 : vector<8x1xf32> to vector<8x8xf32>
    %168 = arith.subf %164, %167 : vector<8x8xf32>
    %169 = math.exp %168 : vector<8x8xf32>
    %cst_87 = arith.constant dense<0.000000e+00> : vector<8xf32>
    %170 = vector.multi_reduction <add>, %169, %cst_87 [1] : vector<8x8xf32> to vector<8xf32>
    %171 = vector.shape_cast %170 : vector<8xf32> to vector<8x1xf32>
    %172 = tpu.reciprocal %171 {approx = true} : vector<8x1xf32> -> vector<8x1xf32>
    %173 = vector.broadcast %172 : vector<8x1xf32> to vector<8x8xf32>
    %174 = arith.mulf %169, %173 : vector<8x8xf32>
    %175 = vector.extract_strided_slice %126 {offsets = [0, 256], sizes = [8, 128], strides = [1, 1]} : vector<8x512xf32> to vector<8x128xf32>
    %cst_88 = arith.constant dense<0.000000e+00> : vector<8x128xf32>
    %176 = tpu.matmul %174, %175, %cst_88 {dimension_numbers = #tpu.dot_dimension_numbers<[1], [0], [0], [1], [0, 0, 1, 1], [], []>} : vector<8x8xf32>, vector<8x128xf32>, vector<8x128xf32> -> vector<8x128xf32>
    %c0_89 = arith.constant 0 : index
    %c256_90 = arith.constant 256 : index
    %177 = vector.load %arg19[%c0_89, %c256_90] : memref<8x512xf32, #tpu.memory_space<vmem>>, vector<8x128xf32>
    tpu.vector_store %arg19[%c0_89, %c256_90], %176 {strides = array<i32>} : memref<8x512xf32, #tpu.memory_space<vmem>>, vector<8x128xf32>,
    %178 = vector.extract_strided_slice %120 {offsets = [0, 384], sizes = [8, 128], strides = [1, 1]} : vector<8x512xf32> to vector<8x128xf32>
    %179 = vector.extract_strided_slice %123 {offsets = [0, 384], sizes = [8, 128], strides = [1, 1]} : vector<8x512xf32> to vector<8x128xf32>
    %cst_91 = arith.constant dense<0.000000e+00> : vector<8x8xf32>
    %180 = tpu.matmul %178, %179, %cst_91 {dimension_numbers = #tpu.dot_dimension_numbers<[1], [1], [0], [0], [0, 0, 1, 0], [], []>} : vector<8x128xf32>, vector<8x128xf32>, vector<8x8xf32> -> vector<8x8xf32>
    %181 = arith.addf %180, %117 : vector<8x8xf32>
    %cst_92 = arith.constant dense<0xFF800000> : vector<8xf32>
    %182 = vector.multi_reduction <maximumf>, %181, %cst_92 [1] : vector<8x8xf32> to vector<8xf32>
    %183 = vector.shape_cast %182 : vector<8xf32> to vector<8x1xf32>
    %184 = vector.broadcast %183 : vector<8x1xf32> to vector<8x8xf32>
    %185 = arith.subf %181, %184 : vector<8x8xf32>
    %186 = math.exp %185 : vector<8x8xf32>
    %cst_93 = arith.constant dense<0.000000e+00> : vector<8xf32>
    %187 = vector.multi_reduction <add>, %186, %cst_93 [1] : vector<8x8xf32> to vector<8xf32>
    %188 = vector.shape_cast %187 : vector<8xf32> to vector<8x1xf32>
    %189 = tpu.reciprocal %188 {approx = true} : vector<8x1xf32> -> vector<8x1xf32>
    %190 = vector.broadcast %189 : vector<8x1xf32> to vector<8x8xf32>
    %191 = arith.mulf %186, %190 : vector<8x8xf32>
    %192 = vector.extract_strided_slice %126 {offsets = [0, 384], sizes = [8, 128], strides = [1, 1]} : vector<8x512xf32> to vector<8x128xf32>
    %cst_94 = arith.constant dense<0.000000e+00> : vector<8x128xf32>
    %193 = tpu.matmul %191, %192, %cst_94 {dimension_numbers = #tpu.dot_dimension_numbers<[1], [0], [0], [1], [0, 0, 1, 1], [], []>} : vector<8x8xf32>, vector<8x128xf32>, vector<8x128xf32> -> vector<8x128xf32>
    %c0_95 = arith.constant 0 : index
    %c384_96 = arith.constant 384 : index
    %194 = vector.load %arg19[%c0_95, %c384_96] : memref<8x512xf32, #tpu.memory_space<vmem>>, vector<8x128xf32>
    tpu.vector_store %arg19[%c0_95, %c384_96], %193 {strides = array<i32>} : memref<8x512xf32, #tpu.memory_space<vmem>>, vector<8x128xf32>,
    %c0_97 = arith.constant 0 : index
    %c0_98 = arith.constant 0 : index
    %195 = vector.load %arg19[%c0_97, %c0_98] : memref<8x512xf32, #tpu.memory_space<vmem>>, vector<8x512xf32>
    %c0_99 = arith.constant 0 : index
    %c0_100 = arith.constant 0 : index
    %c0_101 = arith.constant 0 : index
    %196 = vector.load %arg9[%c0_99, %c0_100, %c0_101] : memref<1x512x128xf32, #tpu.memory_space<vmem>>, vector<1x512x128xf32>
    %197 = vector.shape_cast %196 : vector<1x512x128xf32> to vector<512x128xf32>
    %cst_102 = arith.constant dense<0.000000e+00> : vector<8x128xf32>
    %198 = tpu.matmul %195, %197, %cst_102 {dimension_numbers = #tpu.dot_dimension_numbers<[1], [0], [0], [1], [0, 0, 1, 1], [], []>} : vector<8x512xf32>, vector<512x128xf32>, vector<8x128xf32> -> vector<8x128xf32>
    %199 = arith.addf %198, %113 : vector<8x128xf32>
    %200 = vector.extract_strided_slice %5 {offsets = [2, 0], sizes = [1, 128], strides = [1, 1]} : vector<8x128xf32> to vector<1x128xf32>
    %201 = vector.extract_strided_slice %5 {offsets = [3, 0], sizes = [1, 128], strides = [1, 1]} : vector<8x128xf32> to vector<1x128xf32>
    %cst_103 = arith.constant dense<0.000000e+00> : vector<8xf32>
    %202 = vector.multi_reduction <add>, %199, %cst_103 [1] : vector<8x128xf32> to vector<8xf32>
    %203 = vector.shape_cast %202 : vector<8xf32> to vector<8x1xf32>
    %cst_104 = arith.constant 3.125000e-02 : f32
    %204 = vector.broadcast %cst_104 : f32 to vector<8x1xf32>
    %205 = arith.mulf %203, %204 : vector<8x1xf32>
    %206 = arith.mulf %199, %199 : vector<8x128xf32>
    %cst_105 = arith.constant dense<0.000000e+00> : vector<8xf32>
    %207 = vector.multi_reduction <add>, %206, %cst_105 [1] : vector<8x128xf32> to vector<8xf32>
    %208 = vector.shape_cast %207 : vector<8xf32> to vector<8x1xf32>
    %cst_106 = arith.constant 3.125000e-02 : f32
    %209 = vector.broadcast %cst_106 : f32 to vector<8x1xf32>
    %210 = arith.mulf %208, %209 : vector<8x1xf32>
    %211 = arith.mulf %205, %205 : vector<8x1xf32>
    %212 = arith.subf %210, %211 : vector<8x1xf32>
    %213 = vector.broadcast %205 : vector<8x1xf32> to vector<8x128xf32>
    %214 = arith.subf %199, %213 : vector<8x128xf32>
    %cst_107 = arith.constant 9.99999974E-6 : f32
    %215 = vector.broadcast %cst_107 : f32 to vector<8x1xf32>
    %216 = arith.addf %212, %215 : vector<8x1xf32>
    %217 = math.rsqrt %216 : vector<8x1xf32>
    %218 = vector.broadcast %217 : vector<8x1xf32> to vector<8x128xf32>
    %219 = arith.mulf %214, %218 : vector<8x128xf32>
    %220 = vector.broadcast %200 : vector<1x128xf32> to vector<8x128xf32>
    %221 = arith.mulf %219, %220 : vector<8x128xf32>
    %222 = vector.broadcast %201 : vector<1x128xf32> to vector<8x128xf32>
    %223 = arith.addf %221, %222 : vector<8x128xf32>
    %c0_108 = arith.constant 0 : index
    %c0_109 = arith.constant 0 : index
    %c0_110 = arith.constant 0 : index
    %224 = vector.load %arg11[%c0_108, %c0_109, %c0_110] : memref<1x128x128xf32, #tpu.memory_space<vmem>>, vector<1x128x128xf32>
    %225 = vector.shape_cast %224 : vector<1x128x128xf32> to vector<128x128xf32>
    %cst_111 = arith.constant dense<0.000000e+00> : vector<8x128xf32>
    %226 = tpu.matmul %223, %225, %cst_111 {dimension_numbers = #tpu.dot_dimension_numbers<[1], [0], [0], [1], [0, 0, 1, 1], [], []>} : vector<8x128xf32>, vector<128x128xf32>, vector<8x128xf32> -> vector<8x128xf32>
    %c0_112 = arith.constant 0 : index
    %c0_113 = arith.constant 0 : index
    %c0_114 = arith.constant 0 : index
    %227 = vector.load %arg12[%c0_112, %c0_113, %c0_114] : memref<1x1x128xf32, #tpu.memory_space<vmem>>, vector<1x1x128xf32>
    %228 = vector.shape_cast %227 : vector<1x1x128xf32> to vector<1x128xf32>
    %229 = vector.broadcast %228 : vector<1x128xf32> to vector<8x128xf32>
    %230 = arith.addf %226, %229 : vector<8x128xf32>
    %cst_115 = arith.constant 0.000000e+00 : f32
    %231 = vector.broadcast %cst_115 : f32 to vector<8x128xf32>
    %232 = arith.maximumf %230, %231 : vector<8x128xf32>
    %c0_116 = arith.constant 0 : index
    %c0_117 = arith.constant 0 : index
    %c0_118 = arith.constant 0 : index
    %233 = vector.load %arg13[%c0_116, %c0_117, %c0_118] : memref<1x128x128xf32, #tpu.memory_space<vmem>>, vector<1x128x128xf32>
    %234 = vector.shape_cast %233 : vector<1x128x128xf32> to vector<128x128xf32>
    %cst_119 = arith.constant dense<0.000000e+00> : vector<8x128xf32>
    %235 = tpu.matmul %232, %234, %cst_119 {dimension_numbers = #tpu.dot_dimension_numbers<[1], [0], [0], [1], [0, 0, 1, 1], [], []>} : vector<8x128xf32>, vector<128x128xf32>, vector<8x128xf32> -> vector<8x128xf32>
    %c0_120 = arith.constant 0 : index
    %c0_121 = arith.constant 0 : index
    %c0_122 = arith.constant 0 : index
    %236 = vector.load %arg14[%c0_120, %c0_121, %c0_122] : memref<1x1x128xf32, #tpu.memory_space<vmem>>, vector<1x1x128xf32>
    %237 = vector.shape_cast %236 : vector<1x1x128xf32> to vector<1x128xf32>
    %238 = vector.broadcast %237 : vector<1x128xf32> to vector<8x128xf32>
    %239 = arith.addf %235, %238 : vector<8x128xf32>
    %240 = arith.addf %239, %223 : vector<8x128xf32>
    %241 = vector.extract_strided_slice %5 {offsets = [4, 0], sizes = [1, 128], strides = [1, 1]} : vector<8x128xf32> to vector<1x128xf32>
    %242 = vector.extract_strided_slice %5 {offsets = [5, 0], sizes = [1, 128], strides = [1, 1]} : vector<8x128xf32> to vector<1x128xf32>
    %cst_123 = arith.constant dense<0.000000e+00> : vector<8xf32>
    %243 = vector.multi_reduction <add>, %240, %cst_123 [1] : vector<8x128xf32> to vector<8xf32>
    %244 = vector.shape_cast %243 : vector<8xf32> to vector<8x1xf32>
    %cst_124 = arith.constant 3.125000e-02 : f32
    %245 = vector.broadcast %cst_124 : f32 to vector<8x1xf32>
    %246 = arith.mulf %244, %245 : vector<8x1xf32>
    %247 = arith.mulf %240, %240 : vector<8x128xf32>
    %cst_125 = arith.constant dense<0.000000e+00> : vector<8xf32>
    %248 = vector.multi_reduction <add>, %247, %cst_125 [1] : vector<8x128xf32> to vector<8xf32>
    %249 = vector.shape_cast %248 : vector<8xf32> to vector<8x1xf32>
    %cst_126 = arith.constant 3.125000e-02 : f32
    %250 = vector.broadcast %cst_126 : f32 to vector<8x1xf32>
    %251 = arith.mulf %249, %250 : vector<8x1xf32>
    %252 = arith.mulf %246, %246 : vector<8x1xf32>
    %253 = arith.subf %251, %252 : vector<8x1xf32>
    %254 = vector.broadcast %246 : vector<8x1xf32> to vector<8x128xf32>
    %255 = arith.subf %240, %254 : vector<8x128xf32>
    %cst_127 = arith.constant 9.99999974E-6 : f32
    %256 = vector.broadcast %cst_127 : f32 to vector<8x1xf32>
    %257 = arith.addf %253, %256 : vector<8x1xf32>
    %258 = math.rsqrt %257 : vector<8x1xf32>
    %259 = vector.broadcast %258 : vector<8x1xf32> to vector<8x128xf32>
    %260 = arith.mulf %255, %259 : vector<8x128xf32>
    %261 = vector.broadcast %241 : vector<1x128xf32> to vector<8x128xf32>
    %262 = arith.mulf %260, %261 : vector<8x128xf32>
    %263 = vector.broadcast %242 : vector<1x128xf32> to vector<8x128xf32>
    %264 = arith.addf %262, %263 : vector<8x128xf32>
    %c0_128 = arith.constant 0 : index
    %c0_129 = arith.constant 0 : index
    %265 = vector.load %arg18[%c0_128, %c0_129] : memref<8x128xf32, #tpu.memory_space<vmem>>, vector<8x128xf32>
    tpu.vector_store %arg18[%c0_128, %c0_129], %264 {strides = array<i32>} : memref<8x128xf32, #tpu.memory_space<vmem>>, vector<8x128xf32>,
    %c1_i32 = arith.constant 1 : i32
    %266 = arith.cmpi eq, %arg1, %c1_i32 : i32
    %267 = arith.extui %266 : i1 to i32
    %c0_i32_130 = arith.constant 0 : i32
    %268 = arith.cmpi ne, %267, %c0_i32_130 : i32
    scf.if %268 {
      %c0_131 = arith.constant 0 : index
      %c0_132 = arith.constant 0 : index
      %269 = vector.load %arg15[%c0_131, %c0_132] : memref<128x128xf32, #tpu.memory_space<vmem>>, vector<128x128xf32>
      %cst_133 = arith.constant dense<0.000000e+00> : vector<8x128xf32>
      %270 = tpu.matmul %264, %269, %cst_133 {dimension_numbers = #tpu.dot_dimension_numbers<[1], [0], [0], [1], [0, 0, 1, 1], [], []>} : vector<8x128xf32>, vector<128x128xf32>, vector<8x128xf32> -> vector<8x128xf32>
      %c0_134 = arith.constant 0 : index
      %c0_135 = arith.constant 0 : index
      %271 = vector.load %arg16[%c0_134, %c0_135] : memref<1x128xf32, #tpu.memory_space<vmem>>, vector<1x128xf32>
      %272 = vector.broadcast %271 : vector<1x128xf32> to vector<8x128xf32>
      %273 = arith.addf %270, %272 : vector<8x128xf32>
      %c0_136 = arith.constant 0 : index
      %c0_137 = arith.constant 0 : index
      %c0_138 = arith.constant 0 : index
      %274 = vector.load %arg17[%c0_136, %c0_137, %c0_138] : memref<1x8x128xf32, #tpu.memory_space<vmem>>, vector<1x8x128xf32>
      %275 = vector.shape_cast %274 : vector<1x8x128xf32> to vector<8x128xf32>
      %276 = vector.shape_cast %273 : vector<8x128xf32> to vector<1x8x128xf32>
      tpu.vector_store %arg17[%c0_136, %c0_137, %c0_138], %276 {strides = array<i32>} : memref<1x8x128xf32, #tpu.memory_space<vmem>>, vector<1x8x128xf32>,
    } else {
    }
    return
  }
  func.func @transform_0(%arg0: i32, %arg1: i32) -> (i32, i32, i32) {
    %c0_i32 = arith.constant 0 : i32
    %c0_i32_0 = arith.constant 0 : i32
    %c0_i32_1 = arith.constant 0 : i32
    return %arg0, %c0_i32, %c0_i32_0 : i32, i32, i32
  }
  func.func @transform_1(%arg0: i32, %arg1: i32) -> (i32, i32, i32) {
    %c0_i32 = arith.constant 0 : i32
    %c0_i32_0 = arith.constant 0 : i32
    %c0_i32_1 = arith.constant 0 : i32
    return %arg0, %c0_i32, %c0_i32_0 : i32, i32, i32
  }
  func.func @transform_2(%arg0: i32, %arg1: i32) -> (i32, i32, i32) {
    %c0_i32 = arith.constant 0 : i32
    %c0_i32_0 = arith.constant 0 : i32
    %c0_i32_1 = arith.constant 0 : i32
    return %arg0, %c0_i32, %c0_i32_0 : i32, i32, i32
  }
  func.func @transform_3(%arg0: i32, %arg1: i32) -> (i32, i32, i32) {
    %c0_i32 = arith.constant 0 : i32
    %c0_i32_0 = arith.constant 0 : i32
    %c0_i32_1 = arith.constant 0 : i32
    return %arg0, %c0_i32, %c0_i32_0 : i32, i32, i32
  }
  func.func @transform_4(%arg0: i32, %arg1: i32) -> (i32, i32, i32, i32) {
    %c0_i32 = arith.constant 0 : i32
    %c0_i32_0 = arith.constant 0 : i32
    %c0_i32_1 = arith.constant 0 : i32
    %c0_i32_2 = arith.constant 0 : i32
    return %arg1, %c0_i32, %c0_i32_0, %c0_i32_1 : i32, i32, i32, i32
  }
  func.func @transform_5(%arg0: i32, %arg1: i32) -> (i32, i32, i32) {
    %c0_i32 = arith.constant 0 : i32
    %c0_i32_0 = arith.constant 0 : i32
    %c0_i32_1 = arith.constant 0 : i32
    return %arg1, %c0_i32, %c0_i32_0 : i32, i32, i32
  }
  func.func @transform_6(%arg0: i32, %arg1: i32) -> (i32, i32, i32, i32) {
    %c0_i32 = arith.constant 0 : i32
    %c0_i32_0 = arith.constant 0 : i32
    %c0_i32_1 = arith.constant 0 : i32
    %c0_i32_2 = arith.constant 0 : i32
    return %arg1, %c0_i32, %c0_i32_0, %c0_i32_1 : i32, i32, i32, i32
  }
  func.func @transform_7(%arg0: i32, %arg1: i32) -> (i32, i32, i32) {
    %c0_i32 = arith.constant 0 : i32
    %c0_i32_0 = arith.constant 0 : i32
    %c0_i32_1 = arith.constant 0 : i32
    return %arg1, %c0_i32, %c0_i32_0 : i32, i32, i32
  }
  func.func @transform_8(%arg0: i32, %arg1: i32) -> (i32, i32, i32) {
    %c0_i32 = arith.constant 0 : i32
    %c0_i32_0 = arith.constant 0 : i32
    %c0_i32_1 = arith.constant 0 : i32
    return %arg1, %c0_i32, %c0_i32_0 : i32, i32, i32
  }
  func.func @transform_9(%arg0: i32, %arg1: i32) -> (i32, i32, i32) {
    %c0_i32 = arith.constant 0 : i32
    %c0_i32_0 = arith.constant 0 : i32
    %c0_i32_1 = arith.constant 0 : i32
    return %arg1, %c0_i32, %c0_i32_0 : i32, i32, i32
  }
  func.func @transform_10(%arg0: i32, %arg1: i32) -> (i32, i32, i32) {
    %c0_i32 = arith.constant 0 : i32
    %c0_i32_0 = arith.constant 0 : i32
    %c0_i32_1 = arith.constant 0 : i32
    return %arg1, %c0_i32, %c0_i32_0 : i32, i32, i32
  }
  func.func @transform_11(%arg0: i32, %arg1: i32) -> (i32, i32, i32) {
    %c0_i32 = arith.constant 0 : i32
    %c0_i32_0 = arith.constant 0 : i32
    %c0_i32_1 = arith.constant 0 : i32
    return %arg1, %c0_i32, %c0_i32_0 : i32, i32, i32
  }
  func.func @transform_12(%arg0: i32, %arg1: i32) -> (i32, i32, i32) {
    %c0_i32 = arith.constant 0 : i32
    %c0_i32_0 = arith.constant 0 : i32
    %c0_i32_1 = arith.constant 0 : i32
    return %arg1, %c0_i32, %c0_i32_0 : i32, i32, i32
  }
  func.func @transform_13(%arg0: i32, %arg1: i32) -> (i32, i32) {
    %c0_i32 = arith.constant 0 : i32
    %c0_i32_0 = arith.constant 0 : i32
    %c0_i32_1 = arith.constant 0 : i32
    return %c0_i32, %c0_i32_0 : i32, i32
  }
  func.func @transform_14(%arg0: i32, %arg1: i32) -> (i32, i32) {
    %c0_i32 = arith.constant 0 : i32
    %c0_i32_0 = arith.constant 0 : i32
    %c0_i32_1 = arith.constant 0 : i32
    return %c0_i32, %c0_i32_0 : i32, i32
  }
  func.func @transform_15(%arg0: i32, %arg1: i32) -> (i32, i32, i32) {
    %c0_i32 = arith.constant 0 : i32
    %c0_i32_0 = arith.constant 0 : i32
    %c0_i32_1 = arith.constant 0 : i32
    return %arg0, %c0_i32, %c0_i32_0 : i32, i32, i32
  }
}

</mosaic_0001>

<bundles_post_ra>
// kernel: tpu_custom_call.1
= control target key start
LH: loop header
LB: loop body
LE: loop exit
PB: predicated region body
PF: predicated region fallthrough
CT: control target
= control target key end

     0   :  { %s7438_s0 = inlined_call_operand.hbm [shape: f32[2,8,128], index: 0, kind: input, shape index: {}]   ;;  %s7439_s1 = inlined_call_operand.hbm [shape: f32[2,8,128], index: 1, kind: input, shape index: {}]   ;;  %s7440_s2 = inlined_call_operand.hbm [shape: f32[2,8,8], index: 2, kind: input, shape index: {}]   ;;  %s7441_s3 = inlined_call_operand.hbm [shape: f32[2,8,8], index: 3, kind: input, shape index: {}]   ;;  %s7442_s4 = inlined_call_operand.hbm [shape: f32[2,3,128,512], index: 4, kind: input, shape index: {}]   ;;  %s7443_s5 = inlined_call_operand.hbm [shape: f32[2,512,128], index: 5, kind: input, shape index: {}]   ;;  %s7444_s6 = inlined_call_operand.hbm [shape: f32[2,3,128,512], index: 6, kind: input, shape index: {}]   ;;  %s7445_s7 = inlined_call_operand.hbm [shape: f32[2,512,128], index: 7, kind: input, shape index: {}]   ;;  %s7446_s8 = inlined_call_operand.hbm [shape: f32[2,8,128], index: 8, kind: input, shape index: {}]   ;;  %s7447_s9 = inlined_call_operand.hbm [shape: f32[2,128,128], index: 9, kind: input, shape index: {}]   ;;  %s7448_s10 = inlined_call_operand.hbm [shape: f32[2,1,128], index: 10, kind: input, shape index: {}]   ;;  %s7449_s11 = inlined_call_operand.hbm [shape: f32[2,128,128], index: 11, kind: input, shape index: {}]   ;;  %s7450_s12 = inlined_call_operand.hbm [shape: f32[2,1,128], index: 12, kind: input, shape index: {}]   ;;  %s7451_s13 = inlined_call_operand.hbm [shape: f32[128,128], index: 13, kind: input, shape index: {}]   ;;  %s7452_s14 = inlined_call_operand.hbm [shape: f32[1,128], index: 14, kind: input, shape index: {}]   ;;  %s7453_s15 = inlined_call_operand.hbm [shape: f32[2,8,128], index: 15, kind: output, shape index: {}]  }
   0x1   :  { %7485 = sst [smem:[#allocation55_spill]] %s7439_s1 }
   0x2   :  { %7486 = sst [smem:[#allocation56_spill]] %s7440_s2 }
   0x3   :  { %7487 = sst [smem:[#allocation57_spill]] %s7441_s3 }
   0x4   :  { %7488 = sst [smem:[#allocation58_spill]] %s7442_s4 }
   0x5   :  { %7489 = sst [smem:[#allocation59_spill]] %s7443_s5 }
   0x6   :  { %7490 = sst [smem:[#allocation60_spill]] %s7444_s6 }
   0x7   :  { %7491 = sst [smem:[#allocation61_spill]] %s7445_s7 }
   0x8   :  { %7492 = sst [smem:[#allocation62_spill]] %s7446_s8 }
   0x9   :  { %7493 = sst [smem:[#allocation63_spill]] %s7448_s10 }
   0xa   :  { %7494 = sst [smem:[#allocation64_spill]] %s7450_s12 }
   0xb   :  { %7495 = sst [smem:[#allocation65_spill]] %s7451_s13 }
   0xc   :  { %7496 = sst [smem:[#allocation66_spill]] %s7452_s14 }
   0xd   :  { %7497 = sst [smem:[#allocation67_spill]] %s7453_s15 }
   0xe   :  { %20 = vsyncpa [#allocation5], 0 }
   0xf   :  { %22 = vsyncpa [#allocation5 + $0x1], 0 }
  0x10   :  { %23 = vsyncpa [#allocation8], 0 }
  0x11   :  { %25 = vsyncpa [#allocation8 + $0x1], 0 }
  0x12   :  { %26 = vsyncpa [#allocation11], 0 }
  0x13   :  { %28 = vsyncpa [#allocation11 + $0x1], 0 }
  0x14   :  { %29 = vsyncpa [#allocation14], 0 }
  0x15   :  { %31 = vsyncpa [#allocation14 + $0x1], 0 }
  0x16   :  { %32 = vsyncpa [#allocation17], 0 }
  0x17   :  { %34 = vsyncpa [#allocation17 + $0x1], 0 }
  0x18   :  { %35 = vsyncpa [#allocation20], 0 }
  0x19   :  { %37 = vsyncpa [#allocation20 + $0x1], 0 }
  0x1a   :  { %38 = vsyncpa [#allocation23], 0 }
  0x1b   :  { %40 = vsyncpa [#allocation23 + $0x1], 0 }
  0x1c   :  { %41 = vsyncpa [#allocation26], 0 }
  0x1d   :  { %42 = vsyncpa [#allocation6], 0 }
  0x1e   :  { %44 = vsyncpa [#allocation6 + $0x1], 0  ;;  %s6194_s18 = smov 0   ;;  %s6196_s19 = smov 0  }
  0x1f   :  { %s6198_s20 = smov 0   ;;  %s6200_s21 = smov 0  }
  0x20   :  { %s6202_s22 = smov 0   ;;  %s6204_s23 = smov 0  }
  0x21   :  { %s6206_s24 = smov 0   ;;  %s6208_s25 = smov 0  }
  0x22   :  { %s6210_s26 = smov 0   ;;  %s6212_s27 = smov 0  }
  0x23   :  { %s6214_s28 = smov 0  }
  0x24 LB: > { %7498 = sst [smem:[#allocation39_spill]] %s6050_s19  ;;  %s6250_s29 = sadd.s32 4294967295, %s6086_s28   ;;  %s6086_s28 = sphi %s6214_s28, %s50_s28   ;;  %s6082_s27 = sphi %s6212_s27, %s7567_s27   ;;  %s6078_s26 = sphi %s6210_s26, %s7572_s26   ;;  %s6074_s25 = sphi %s6208_s25, %s7565_s25   ;;  %s6070_s24 = sphi %s6206_s24, %s7571_s24   ;;  %s6066_s23 = sphi %s6204_s23, %s7570_s23   ;;  %s6062_s22 = sphi %s6202_s22, %s7569_s22   ;;  %s6058_s21 = sphi %s6200_s21, %s7568_s21   ;;  %s6054_s20 = sphi %s6198_s20, %s7563_s20   ;;  %s6050_s19 = sphi %s6196_s19, %s7562_s19   ;;  %s6046_s18 = sphi %s6194_s18, %s7561_s18  }
  0x25   : > { %7499 = sst [smem:[#allocation40_spill]] %s6054_s20  ;;  %s4618_s30 = sadd.s32 4294967294, %s6086_s28  }
  0x26   : > { %7500 = sst [smem:[#allocation41_spill]] %s6058_s21  ;;  %s59_s16 = sadd.s32 1, %s6078_s26 }
  0x27   : > { %7501 = sst [smem:[#allocation42_spill]] %s6070_s24  ;;  %s62_s17 = sadd.s32 1, %s6082_s27 }
  0x28   : > { %7502 = sst [smem:[#allocation43_spill]] %s6074_s25  ;;  %p60_p0 = scmp.ge.s32.totalorder %s59_s16, 2 }
  0x29   : > { %7503 = sst [smem:[#allocation44_spill]] %s6082_s27  ;;  %s69_s15 = sadd.s32 1, %s6066_s23 }
  0x2a   : > { %7504 = sst [smem:[#allocation45_spill]] %s6086_s28  ;;  %p7458_p1 = scmp.ne.s32.totalorder %s6066_s23, %s6062_s22 }
  0x2b   : > { %7505 = sst [smem:[#allocation46_spill]] %s6250_s29  ;;  %p77_p2 = scmp.eq.s32.totalorder %s6086_s28, 0 }
  0x2c   : > { %s7574_s16 = smov (%p60_p0, %s59_s16), 0  ;;  %s7576_s17 = smov (!%p60_p0, %s62_s17), %s6082_s27 }
  0x2d   : > { %7506 = sst [smem:[#allocation47_spill]] %s7574_s16  ;;  %p6267_p3 = por %p77_p2, %p7458_p1 }
  0x2e   : > { %p7457_p4 = scmp.ne.s32.totalorder %s6062_s22, %s6058_s21  ;;  %p64_p5 = scmp.ge.s32.totalorder %s7576_s17, 2 }
  0x2f   : > { %s7507_s25 = scalar_select %p6267_p3, 1, 0 }
  0x30   : > { %p7466_p6 = scmp.eq.s32.totalorder %s6250_s29, 0  ;;  %s170_s24 = ssub.s32 %s6078_s26, %s7574_s16 }
  0x31   : > { %s173_s12 = sadd.s32 1, %s6054_s20  ;;  %s7578_s17 = smov (%p64_p5, %s7576_s17), 0 }
  0x32   : > { %7508 = sst [smem:[#allocation48_spill]] %s7578_s17  ;;  %p6284_p7 = por %p7466_p6, %p7457_p4 }
  0x33   : > { %p171_p8 = scmp.eq.s32.totalorder %s170_s24, 0  ;;  %s66_s8 = ssub.s32 %s6082_s27, %s7578_s17 }
  0x34   : > { %s7509_s10 = scalar_select %p6284_p7, 1, 0 }
  0x35   : > { %p180_p9 = scmp.ne.s32.totalorder %s6054_s20, %s6050_s19  ;;  %p67_p10 = scmp.eq.s32.totalorder %s66_s8, 0 }
  0x36   : > { %7510 = sst [smem:[#allocation49_spill]] %s7509_s10  ;;  %p186_p11 = scmp.ne.s32.totalorder %s6050_s19, %s6046_s18 }
  0x37   : > { %s6295_s16 = scalar_select %p171_p8, %s6054_s20, %s173_s12  }
  0x38   : > { %s6298_s6 = scalar_select %p67_p10, %s6066_s23, %s69_s15  }
  0x39   : > { %7511 = sst [smem:[#allocation50_spill]] %s6295_s16  ;;  %p6302_p12 = por %p180_p9, %p77_p2 }
  0x3a   : > { %7512 = sst [smem:[#allocation51_spill]] %s6298_s6  ;;  %p6308_p13 = por %p186_p11, %p7466_p6 }
  0x3b   : > { %p460_p0 = scmp.eq.s32.totalorder %s6250_s29, 3  ;;  %p466_p5 = scmp.eq.s32.totalorder %s4618_s30, 3 }
  0x3c   : > { %s7514_s2 = scalar_select %p6308_p13, 1, 0 }
  0x3d   : > { %p4619_p4 = scmp.ge.s32.totalorder %s6086_s28, 1  ;;  %p473_p1 = scmp.lt.s32.totalorder %s6086_s28, 5 }
  0x3e   : > { %7515 = sst [smem:[#allocation52_spill]] %s7514_s2  ;;  %p7516_p7 = scmp.ne.s32.totalorder %s6066_s23, %s6062_s22 }
  0x3f   : > { %p7519_p8 = scmp.ne.s32.totalorder %s6062_s22, %s6058_s21  ;;  %p6329_p2 = pnand %p4619_p4, %p473_p1 }
  0x40   : > { %p6318_p3 = por %p460_p0, %p7516_p7  ;;  %s6088_s18 = smov [#allocation25]  }
  0x41   : > { %p6325_p10 = por %p466_p5, %p7519_p8  ;;  %p5388_p9 = pneg %p6329_p2 }
  0x42   : > { %s7517_s8 = scalar_select %p6318_p3, 1, 0 }
  0x43   : > { %s7520_s12 = scalar_select %p6325_p10, 1, 0 }
  0x44   : > { %7518 = sst [smem:[#allocation53_spill]] %s7517_s8  ;;  %s485_s24 = sshll.u32 %s6088_s18, 4  ;;  %s486_s24 = int_to_ptr.vmem [resolvable:$true] %s485_s24 }
  0x45   : > { %7521 = sst [smem:[#allocation54_spill]] %s7520_s12  ;;  %p6337_p7 = pnand %p5388_p9, %p7466_p6 }
  0x46   : > { %s6089_s17 = smov [#allocation27]   ;;  %s5555_s16 = scalar_lea.vmem %s486_s24, 2048 }
  0x47   : > { %s499_s6 = sshll.u32 %s6089_s17, 4  ;;  %p5546_p1 = pneg %p6337_p7  ;;  %s500_s6 = int_to_ptr.vmem [resolvable:$true] %s499_s6 }
  0x48   : > { %p5556_p4 = scmp.ne.s32.totalorder %s486_s24, %s5555_s16  ;;  %p5563_p5 = scmp.lt.s32.totalorder %s486_s24, %s486_s24 }
  0x49   : > { %p5564_p8 = scmp.lt.s32.totalorder %s5555_s16, %s5555_s16 }
  0x4a   : > { %p5558_p11 = pnand %p5556_p4, %p5546_p1 }
  0x4b   : > { %p5565_p10 = por %p5564_p8, %p5563_p5 }
  0x4c   : > { %p5559_p0 = pneg %p5558_p11 }
  0x4e   : > { %p5566_p9 = pnand %p5565_p10, %p5559_p0 }
  0x50   : > { %5569 = shalt.err (!%p5566_p9)
}
  0x51   : > { %s6090_s18 = smov 128   ;;  %s6091_s12 = smov 8  }
  0x52   : > { %s7524_s13 = sld [smem:[#allocation65_spill]]  ;;  %s5581_s8 = scalar_lea.vmem %s500_s6, 16 }
  0x53   : > { %p5582_p6 = scmp.ne.s32.totalorder %s500_s6, %s5581_s8  ;;  %s5588_s2 = scalar_lea.vmem %s500_s6, 32 }
  0x54   : > { %p5589_p3 = scmp.lt.s32.totalorder %s500_s6, %s500_s6  ;;  %p5590_p5 = scmp.lt.s32.totalorder %s5588_s2, %s5581_s8 }
  0x55   : > { %p5584_p4 = pnand %p5582_p6, %p5546_p1 }
  0x56   : > { %p5591_p10 = por %p5590_p5, %p5589_p3 }
  0x57   : > { %p5585_p11 = pneg %p5584_p4 }
  0x58   : > { %5391 = dma.hbm_to_vmem [thread:$0]  (!%p6337_p7), %s7524_s13, 2048, %s486_s24, [#allocation26], %s6090_s18, %s6090_s18, %s6091_s12  }
  0x59   : > { %p5592_p0 = pnand %p5591_p10, %p5585_p11 }
  0x5b   : > { %5595 = shalt.err (!%p5592_p0)
}
  0x5c   : > { %s7525_s14 = sld [smem:[#allocation66_spill]]  ;;  %p4622_p8 = scmp.ge.s32.totalorder %s6086_s28, 4 }
  0x5d   : > { %s7471_s21 = sand.u32 (!%p4622_p8), 1, %s6066_s23   ;;  %s6362_s12 = sshll.u32 (!%p4622_p8), %s6082_s27, 7 }
  0x5e   : > { %506 = sbr.rel (%p4622_p8) target bundleno = 281 (0x119), region = 24  ;;  %s6366_s2 = sshll.u32 (!%p4622_p8), %s7471_s21, 3 }
  0x5f   : > { %s6369_s8 = sand.u32 (!%p4622_p8), 1, %s6086_s28   ;;  %s7526_s1 = sld [smem:[#allocation55_spill]] (!%p4622_p8) }
  0x60   : > { %s532_s30 = scalar_lea.vmem (!%p4622_p8), [#allocation7], %s6366_s2  ;;  %s7477_s17 = scalar_lea.sflag (!%p4622_p8), [#allocation8], %s6369_s8 }
  0x61   : > { %s539_s18 = sshll.u32 (!%p4622_p8), %s532_s30, 4  ;;  %p7527_p6 = scmp.ne.s32.totalorder (!%p4622_p8), %s7507_s25, 0  ;;  %s540_s18 = int_to_ptr.vmem [resolvable:$true] %s539_s18 }
  0x62   : > { %5394 = dma.hbm_to_vmem [thread:$0]  (!%p6337_p7), %s7525_s14, 16, %s500_s6, [#allocation26]  }
  0x63   : > { %s5608_s16 = scalar_lea.vmem %s540_s18, 128  ;;  %s6092_s13 = smov [#allocation7]  }
  0x64   : > { %p5609_p3 = scmp.ne.s32.totalorder %s540_s18, %s5608_s16  ;;  %s5612_s21 = sshll.u32 %s6092_s13, 4  ;;  %s5613_s21 = int_to_ptr.vmem [resolvable:$false] %s5612_s21 }
  0x65   : > { %s537_s24 = scalar_lea.hbm %s7526_s1, %s6362_s12  ;;  %s5614_s14 = scalar_lea.vmem %s5613_s21, 256 }
  0x66   : > { %p5610_p7 = pnand %p5609_p3, %p7527_p6  ;;  %p5615_p9 = scmp.lt.s32.totalorder %s540_s18, %s5613_s21 }
  0x67   : > { %p5616_p4 = scmp.lt.s32.totalorder %s5614_s14, %s5608_s16 }
  0x68   : > { %p5611_p1 = pneg %p5610_p7 }
  0x69   : > { %p5617_p11 = por %p5616_p4, %p5615_p9 }
  0x6b   : > { %p5618_p5 = pnand %p5617_p11, %p5611_p1 }
  0x6d   : > { %5621 = shalt.err (!%p5618_p5)
}
  0x6e   : > { %5357 = dma.hbm_to_vmem [thread:$0]  (%p7527_p6), %s537_s24, 128, %s540_s18, %s7477_s17  }
  0x6f   : > { %s7528_s3 = sld [smem:[#allocation57_spill]]  ;;  %s568_s30 = scalar_lea.vmem [#allocation10], %s6366_s2 }
  0x70   : > { %s575_s21 = sshll.u32 %s568_s30, 4  ;;  %s6389_s14 = sand.u32 1, %s6054_s20   ;;  %s576_s21 = int_to_ptr.vmem [resolvable:$true] %s575_s21 }
  0x71   : > { %s7479_s16 = scalar_lea.sflag [#allocation11], %s6369_s8  ;;  %s5634_s1 = scalar_lea.vmem %s576_s21, 128 }
  0x72   : > { %p5635_p10 = scmp.ne.s32.totalorder %s576_s21, %s5634_s1  ;;  %s6093_s27 = smov [#allocation10]  }
  0x73   : > { %s5638_s28 = sshll.u32 %s6093_s27, 4  ;;  %s5639_s28 = int_to_ptr.vmem [resolvable:$false] %s5638_s28 }
  0x74   : > { %p5636_p0 = pnand %p5635_p10, %p7527_p6  ;;  %s5640_s29 = scalar_lea.vmem %s5639_s28, 256 }
  0x75   : > { %s573_s13 = scalar_lea.hbm %s7528_s3, %s6362_s12  ;;  %p5641_p3 = scmp.lt.s32.totalorder %s576_s21, %s5639_s28 }
  0x76   : > { %p5637_p8 = pneg %p5636_p0  ;;  %p5642_p7 = scmp.lt.s32.totalorder %s5640_s29, %s5634_s1 }
  0x78   : > { %p5643_p1 = por %p5642_p7, %p5641_p3 }
  0x7a   : > { %p5644_p9 = pnand %p5643_p1, %p5637_p8 }
  0x7c   : > { %5647 = shalt.err (!%p5644_p9)
}
  0x7d   : > { %5359 = dma.hbm_to_vmem [thread:$0]  (%p7527_p6), %s573_s13, 128, %s576_s21, %s7479_s16  }
  0x7e   : > { %s4632_s24 = sshll.u32 %s6389_s14, 9  ;;  %s4935_s18 = sshll.u32 %s6078_s26, 13 }
  0x7f   : > { %s7529_s5 = sld [smem:[#allocation59_spill]]  ;;  %s607_s28 = scalar_lea.vmem [#allocation13], %s4632_s24 }
  0x80   : > { %s614_s1 = sshll.u32 %s607_s28, 4  ;;  %s7482_s29 = scalar_lea.sflag [#allocation14], %s6369_s8  ;;  %s615_s1 = int_to_ptr.vmem [resolvable:$true] %s614_s1 }
  0x81   : > { %s5660_s30 = scalar_lea.vmem %s615_s1, 8192  ;;  %s6094_s17 = smov [#allocation13]  }
  0x82   : > { %p5661_p4 = scmp.ne.s32.totalorder %s615_s1, %s5660_s30  ;;  %s5664_s3 = sshll.u32 %s6094_s17, 4  ;;  %s5665_s3 = int_to_ptr.vmem [resolvable:$false] %s5664_s3 }
  0x83   : > { %s5666_s20 = scalar_lea.vmem %s5665_s3, 16384  ;;  %p5667_p10 = scmp.lt.s32.totalorder %s615_s1, %s5665_s3 }
  0x84   : > { %p5662_p11 = pnand %p5661_p4, %p6302_p12  ;;  %p5668_p0 = scmp.lt.s32.totalorder %s5666_s20, %s5660_s30 }
  0x85   : > { %s613_s6 = scalar_lea.hbm %s7529_s5, %s4935_s18 }
  0x86   : > { %p5663_p5 = pneg %p5662_p11  ;;  %p5669_p8 = por %p5668_p0, %p5667_p10 }
  0x88   : > { %p5670_p3 = pnand %p5669_p8, %p5663_p5 }
  0x8a   : > { %5673 = shalt.err (!%p5670_p3)
}
  0x8b   : > { %s6095_s13 = smov 128   ;;  %s6096_s21 = smov 8  }
  0x8c   : > { %5361 = dma.hbm_to_vmem [thread:$0]  (%p6302_p12), %s613_s6, 8192, %s615_s1, %s7482_s29, %s6095_s13, %s6095_s13, %s6096_s21  }
  0x8d   : > { %s7530_s7 = sld [smem:[#allocation61_spill]]  ;;  %s649_s20 = scalar_lea.vmem [#allocation16], %s4632_s24 }
  0x8e   : > { %s656_s27 = sshll.u32 %s649_s20, 4  ;;  %s7483_s28 = scalar_lea.sflag [#allocation17], %s6369_s8  ;;  %s657_s27 = int_to_ptr.vmem [resolvable:$true] %s656_s27 }
  0x8f   : > { %s5686_s30 = scalar_lea.vmem %s657_s27, 8192  ;;  %s6097_s16 = smov [#allocation16]  }
  0x90   : > { %p5687_p7 = scmp.ne.s32.totalorder %s657_s27, %s5686_s30  ;;  %s5690_s5 = sshll.u32 %s6097_s16, 4  ;;  %s5691_s5 = int_to_ptr.vmem [resolvable:$false] %s5690_s5 }
  0x91   : > { %s5692_s10 = scalar_lea.vmem %s5691_s5, 16384  ;;  %p5693_p4 = scmp.lt.s32.totalorder %s657_s27, %s5691_s5 }
  0x92   : > { %p5688_p1 = pnand %p5687_p7, %p6302_p12  ;;  %p5694_p11 = scmp.lt.s32.totalorder %s5692_s10, %s5686_s30 }
  0x93   : > { %s655_s3 = scalar_lea.hbm %s7530_s7, %s4935_s18 }
  0x94   : > { %p5689_p9 = pneg %p5688_p1  ;;  %p5695_p5 = por %p5694_p11, %p5693_p4 }
  0x96   : > { %p5696_p10 = pnand %p5695_p5, %p5689_p9 }
  0x98   : > { %5699 = shalt.err (!%p5696_p10)
}
  0x99   : > { %5363 = dma.hbm_to_vmem [thread:$0]  (%p6302_p12), %s655_s3, 8192, %s657_s27, %s7483_s28, %s6095_s13, %s6095_s13, %s6096_s21  }
  0x9a   : > { %s4641_s16 = sshll.u32 %s6389_s14, 7  ;;  %s4937_s24 = sshll.u32 %s6078_s26, 11 }
  0x9b   : > { %s694_s10 = scalar_lea.hbm %s7447_s9, %s4937_s24  ;;  %s688_s6 = scalar_lea.vmem [#allocation19], %s4641_s16 }
  0x9c   : > { %s695_s1 = sshll.u32 %s688_s6, 4  ;;  %s7484_s17 = scalar_lea.sflag [#allocation20], %s6369_s8  ;;  %s696_s1 = int_to_ptr.vmem [resolvable:$true] %s695_s1 }
  0x9d   : > { %s5712_s19 = scalar_lea.vmem %s696_s1, 2048  ;;  %s6098_s20 = smov [#allocation19]  }
  0x9e   : > { %p5713_p0 = scmp.ne.s32.totalorder %s696_s1, %s5712_s19  ;;  %s5716_s30 = sshll.u32 %s6098_s20, 4  ;;  %s5717_s30 = int_to_ptr.vmem [resolvable:$false] %s5716_s30 }
  0x9f   : > { %s5718_s29 = scalar_lea.vmem %s5717_s30, 4096  ;;  %p5719_p7 = scmp.lt.s32.totalorder %s696_s1, %s5717_s30 }
  0xa0   : > { %p5714_p8 = pnand %p5713_p0, %p6302_p12  ;;  %p5720_p1 = scmp.lt.s32.totalorder %s5718_s29, %s5712_s19 }
  0xa2   : > { %p5715_p3 = pneg %p5714_p8  ;;  %p5721_p9 = por %p5720_p1, %p5719_p7 }
  0xa4   : > { %p5722_p4 = pnand %p5721_p9, %p5715_p3 }
  0xa6   : > { %5725 = shalt.err (!%p5722_p4)
}
  0xa7   : > { %5365 = dma.hbm_to_vmem [thread:$0]  (%p6302_p12), %s694_s10, 2048, %s696_s1, %s7484_s17, %s6095_s13, %s6095_s13, %s6096_s21  }
  0xa8   : > { %s732_s18 = scalar_lea.hbm %s7449_s11, %s4937_s24  ;;  %s726_s5 = scalar_lea.vmem [#allocation22], %s4641_s16 }
  0xa9   : > { %s733_s6 = sshll.u32 %s726_s5, 4  ;;  %s723_s29 = scalar_lea.sflag [#allocation23], %s6369_s8  ;;  %s734_s6 = int_to_ptr.vmem [resolvable:$true] %s733_s6 }
  0xaa   : > { %s5738_s19 = scalar_lea.vmem %s734_s6, 2048  ;;  %s6099_s20 = smov [#allocation22]  }
  0xab   : > { %p5739_p11 = scmp.ne.s32.totalorder %s734_s6, %s5738_s19  ;;  %s5742_s30 = sshll.u32 %s6099_s20, 4  ;;  %s5743_s30 = int_to_ptr.vmem [resolvable:$false] %s5742_s30 }
  0xac   : > { %s5744_s28 = scalar_lea.vmem %s5743_s30, 4096  ;;  %p5745_p0 = scmp.lt.s32.totalorder %s734_s6, %s5743_s30 }
  0xad   : > { %p5740_p5 = pnand %p5739_p11, %p6302_p12  ;;  %p5746_p8 = scmp.lt.s32.totalorder %s5744_s28, %s5738_s19 }
  0xaf   : > { %p5741_p10 = pneg %p5740_p5  ;;  %p5747_p3 = por %p5746_p8, %p5745_p0 }
  0xb1   : > { %p5748_p7 = pnand %p5747_p3, %p5741_p10 }
  0xb3   : > { %5751 = shalt.err (!%p5748_p7)
}
  0xb4   : > { %5367 = dma.hbm_to_vmem [thread:$0]  (%p6302_p12), %s732_s18, 2048, %s734_s6, %s723_s29, %s6095_s13, %s6095_s13, %s6096_s21  }
  0xb5   : > { %s519_s28 = scalar_lea.hbm %s7438_s0, %s6362_s12  ;;  %s514_s10 = scalar_lea.vmem [#allocation4], %s6366_s2 }
  0xb6   : > { %s521_s1 = sshll.u32 %s514_s10, 4  ;;  %s7531_s5 = sld [smem:[#allocation56_spill]]  ;;  %s522_s1 = int_to_ptr.vmem [resolvable:$true] %s521_s1 }
  0xb7   : > { %s7532_s20 = sand.u32 1, %s6066_s23   ;;  %s5764_s17 = scalar_lea.vmem %s522_s1, 128 }
  0xb8   : > { %s511_s30 = scalar_lea.sflag [#allocation5], %s7532_s20  ;;  %p5765_p1 = scmp.ne.s32.totalorder %s522_s1, %s5764_s17 }
  0xb9   : > { %s6100_s7 = smov [#allocation4]  }
  0xba   : > { %p5766_p9 = pnand %p5765_p1, %p7527_p6  ;;  %s5768_s13 = sshll.u32 %s6100_s7, 4  ;;  %s5769_s13 = int_to_ptr.vmem [resolvable:$false] %s5768_s13 }
  0xbb   : > { %s5770_s21 = scalar_lea.vmem %s5769_s13, 256  ;;  %p5771_p11 = scmp.lt.s32.totalorder %s522_s1, %s5769_s13 }
  0xbc   : > { %s555_s19 = scalar_lea.hbm %s7531_s5, %s6362_s12  ;;  %p5767_p4 = pneg %p5766_p9 }
  0xbd   : > { %p5772_p5 = scmp.lt.s32.totalorder %s5770_s21, %s5764_s17 }
  0xbf   : > { %p5773_p10 = por %p5772_p5, %p5771_p11 }
  0xc1   : > { %p5774_p0 = pnand %p5773_p10, %p5767_p4 }
  0xc3   : > { %5777 = shalt.err (!%p5774_p0)
}
  0xc4   : > { %5356 = dma.hbm_to_vmem [thread:$0]  (%p7527_p6), %s519_s28, 128, %s522_s1, %s511_s30  }
  0xc5   : > { %s550_s18 = scalar_lea.vmem [#allocation9], %s6366_s2  ;;  %s5347_s16 = smul.u32 1536, %s6389_s14 }
  0xc6   : > { %s557_s6 = sshll.u32 %s550_s18, 4  ;;  %s5348_s24 = smul.u32 24576, %s6078_s26  ;;  %s558_s6 = int_to_ptr.vmem [resolvable:$true] %s557_s6 }
  0xc7   : > { %s5790_s7 = scalar_lea.vmem %s558_s6, 128  ;;  %s6101_s17 = smov [#allocation9]  }
  0xc8   : > { %p5791_p8 = scmp.ne.s32.totalorder %s558_s6, %s5790_s7  ;;  %s5794_s10 = sshll.u32 %s6101_s17, 4  ;;  %s5795_s10 = int_to_ptr.vmem [resolvable:$false] %s5794_s10 }
  0xc9   : > { %s5796_s3 = scalar_lea.vmem %s5795_s10, 256  ;;  %p5797_p1 = scmp.lt.s32.totalorder %s558_s6, %s5795_s10 }
  0xca   : > { %p5792_p3 = pnand %p5791_p8, %p7527_p6  ;;  %p5798_p9 = scmp.lt.s32.totalorder %s5796_s3, %s5790_s7 }
  0xcc   : > { %p5793_p7 = pneg %p5792_p3  ;;  %p5799_p4 = por %p5798_p9, %p5797_p1 }
  0xce   : > { %p5800_p11 = pnand %p5799_p4, %p5793_p7 }
  0xd0   : > { %5803 = shalt.err (!%p5800_p11)
}
  0xd1   : > { %s7533_s2 = scalar_lea.sflag [#allocation8], %s6369_s8  ;;  %s7534_s30 = sld [smem:[#allocation58_spill]] }
  0xd2   : > { %5358 = dma.hbm_to_vmem [thread:$0]  (%p7527_p6), %s555_s19, 128, %s558_s6, %s7533_s2  }
  0xd3   : > { %s586_s21 = scalar_lea.vmem [#allocation12], %s5347_s16  ;;  %s6102_s7 = smov [#allocation12]  }
  0xd4   : > { %s593_s18 = sshll.u32 %s586_s21, 4  ;;  %s5820_s12 = sshll.u32 %s6102_s7, 4  ;;  %s594_s18 = int_to_ptr.vmem [resolvable:$true] %s593_s18  ;;  %s5821_s12 = int_to_ptr.vmem [resolvable:$false] %s5820_s12 }
  0xd5   : > { %s5816_s25 = scalar_lea.vmem %s594_s18, 24576  ;;  %s5822_s17 = scalar_lea.vmem %s5821_s12, 49152 }
  0xd6   : > { %p5817_p5 = scmp.ne.s32.totalorder %s594_s18, %s5816_s25  ;;  %p5823_p8 = scmp.lt.s32.totalorder %s594_s18, %s5821_s12 }
  0xd7   : > { %s592_s13 = scalar_lea.hbm %s7534_s30, %s5348_s24  ;;  %p5824_p6 = scmp.lt.s32.totalorder %s5822_s17, %s5816_s25 }
  0xd8   : > { %p5818_p10 = pnand %p5817_p5, %p6302_p12 }
  0xd9   : > { %p5825_p3 = por %p5824_p6, %p5823_p8 }
  0xda   : > { %p5819_p0 = pneg %p5818_p10 }
  0xdc   : > { %p5826_p7 = pnand %p5825_p3, %p5819_p0 }
  0xde   : > { %5829 = shalt.err (!%p5826_p7)
}
  0xdf   : > { %s6103_s19 = smov 512   ;;  %s6104_s6 = smov 32  }
  0xe0   : > { %s7535_s10 = scalar_lea.sflag [#allocation11], %s6369_s8  ;;  %s7536_s28 = sld [smem:[#allocation60_spill]] }
  0xe1   : > { %5360 = dma.hbm_to_vmem [thread:$0]  (%p6302_p12), %s592_s13, 24576, %s594_s18, %s7535_s10, %s6103_s19, %s6103_s19, %s6104_s6  }
  0xe2   : > { %s628_s27 = scalar_lea.vmem [#allocation15], %s5347_s16  ;;  %s4639_s30 = sshll.u32 %s6389_s14, 3 }
  0xe3   : > { %s635_s20 = sshll.u32 %s628_s27, 4  ;;  %s6105_s25 = smov [#allocation15]   ;;  %s636_s20 = int_to_ptr.vmem [resolvable:$true] %s635_s20 }
  0xe4   : > { %s5842_s21 = scalar_lea.vmem %s636_s20, 24576  ;;  %s5846_s7 = sshll.u32 %s6105_s25, 4  ;;  %s5847_s7 = int_to_ptr.vmem [resolvable:$false] %s5846_s7 }
  0xe5   : > { %p5843_p1 = scmp.ne.s32.totalorder %s636_s20, %s5842_s21  ;;  %s5848_s12 = scalar_lea.vmem %s5847_s7, 49152 }
  0xe6   : > { %s634_s1 = scalar_lea.hbm %s7536_s28, %s5348_s24  ;;  %p5849_p11 = scmp.lt.s32.totalorder %s636_s20, %s5847_s7 }
  0xe7   : > { %p5844_p9 = pnand %p5843_p1, %p6302_p12  ;;  %p5850_p5 = scmp.lt.s32.totalorder %s5848_s12, %s5842_s21 }
  0xe9   : > { %p5845_p4 = pneg %p5844_p9  ;;  %p5851_p10 = por %p5850_p5, %p5849_p11 }
  0xeb   : > { %p5852_p0 = pnand %p5851_p10, %p5845_p4 }
  0xed   : > { %5855 = shalt.err (!%p5852_p0)
}
  0xee   : > { %s7537_s16 = scalar_lea.sflag [#allocation14], %s6369_s8  ;;  %s4640_s24 = sshll.u32 %s6078_s26, 7 }
  0xef   : > { %5362 = dma.hbm_to_vmem [thread:$0]  (%p6302_p12), %s634_s1, 24576, %s636_s20, %s7537_s16, %s6103_s19, %s6103_s19, %s6104_s6  }
  0xf0   : > { %s670_s13 = scalar_lea.vmem [#allocation18], %s4639_s30  ;;  %s7538_s3 = sld [smem:[#allocation62_spill]] }
  0xf1   : > { %s677_s18 = sshll.u32 %s670_s13, 4  ;;  %s6106_s27 = smov [#allocation18]   ;;  %s678_s18 = int_to_ptr.vmem [resolvable:$true] %s677_s18 }
  0xf2   : > { %s5868_s28 = scalar_lea.vmem %s678_s18, 128  ;;  %s5872_s21 = sshll.u32 %s6106_s27, 4  ;;  %s5873_s21 = int_to_ptr.vmem [resolvable:$false] %s5872_s21 }
  0xf3   : > { %p5869_p8 = scmp.ne.s32.totalorder %s678_s18, %s5868_s28  ;;  %s5874_s25 = scalar_lea.vmem %s5873_s21, 256 }
  0xf4   : > { %p5875_p7 = scmp.lt.s32.totalorder %s678_s18, %s5873_s21  ;;  %p5876_p1 = scmp.lt.s32.totalorder %s5874_s25, %s5868_s28 }
  0xf5   : > { %p5870_p6 = pnand %p5869_p8, %p6302_p12 }
  0xf6   : > { %s675_s2 = scalar_lea.hbm %s7538_s3, %s4640_s24  ;;  %p5877_p9 = por %p5876_p1, %p5875_p7 }
  0xf7   : > { %p5871_p3 = pneg %p5870_p6 }
  0xf9   : > { %p5878_p4 = pnand %p5877_p9, %p5871_p3 }
  0xfb   : > { %5881 = shalt.err (!%p5878_p4)
}
  0xfc   : > { %s7539_s19 = scalar_lea.sflag [#allocation17], %s6369_s8  ;;  %s4644_s6 = sshll.u32 %s6078_s26, 4 }
  0xfd   : > { %5364 = dma.hbm_to_vmem [thread:$0]  (%p6302_p12), %s675_s2, 128, %s678_s18, %s7539_s19  }
  0xfe   : > { %s7540_s30 = sld [smem:[#allocation63_spill]]  ;;  %s708_s12 = scalar_lea.vmem [#allocation21], %s6389_s14 }
  0xff   : > { %s715_s16 = sshll.u32 %s708_s12, 4  ;;  %s6107_s13 = smov [#allocation21]   ;;  %s716_s16 = int_to_ptr.vmem [resolvable:$true] %s715_s16 }
 0x100   : > { %s5894_s24 = scalar_lea.vmem %s716_s16, 16  ;;  %s5898_s17 = sshll.u32 %s6107_s13, 4  ;;  %s5899_s17 = int_to_ptr.vmem [resolvable:$false] %s5898_s17 }
 0x101   : > { %p5895_p11 = scmp.ne.s32.totalorder %s716_s16, %s5894_s24  ;;  %s5900_s10 = scalar_lea.vmem %s5899_s17, 32 }
 0x102   : > { %p5901_p0 = scmp.lt.s32.totalorder %s716_s16, %s5899_s17  ;;  %p5902_p8 = scmp.lt.s32.totalorder %s5900_s10, %s5894_s24 }
 0x103   : > { %p5896_p5 = pnand %p5895_p11, %p6302_p12 }
 0x104   : > { %s713_s7 = scalar_lea.hbm %s7540_s30, %s4644_s6  ;;  %p5903_p6 = por %p5902_p8, %p5901_p0 }
 0x105   : > { %p5897_p10 = pneg %p5896_p5 }
 0x107   : > { %p5904_p3 = pnand %p5903_p6, %p5897_p10 }
 0x109   : > { %5907 = shalt.err (!%p5904_p3)
}
 0x10a   : > { %s7541_s18 = scalar_lea.sflag [#allocation20], %s6369_s8  ;;  %s7542_s28 = sld [smem:[#allocation64_spill]] }
 0x10b   : > { %5366 = dma.hbm_to_vmem [thread:$0]  (%p6302_p12), %s713_s7, 16, %s716_s16, %s7541_s18  }
 0x10c   : > { %s746_s21 = scalar_lea.vmem [#allocation24], %s6389_s14  ;;  %s6108_s1 = smov [#allocation24]  }
 0x10d   : > { %s753_s25 = sshll.u32 %s746_s21, 4  ;;  %s5924_s20 = sshll.u32 %s6108_s1, 4  ;;  %s754_s25 = int_to_ptr.vmem [resolvable:$true] %s753_s25  ;;  %s5925_s20 = int_to_ptr.vmem [resolvable:$false] %s5924_s20 }
 0x10e   : > { %s5920_s19 = scalar_lea.vmem %s754_s25, 16  ;;  %s5926_s30 = scalar_lea.vmem %s5925_s20, 32 }
 0x10f   : > { %p5921_p7 = scmp.ne.s32.totalorder %s754_s25, %s5920_s19  ;;  %p5927_p4 = scmp.lt.s32.totalorder %s754_s25, %s5925_s20 }
 0x110   : > { %s751_s27 = scalar_lea.hbm %s7542_s28, %s4644_s6  ;;  %p5928_p11 = scmp.lt.s32.totalorder %s5926_s30, %s5920_s19 }
 0x111   : > { %p5922_p1 = pnand %p5921_p7, %p6302_p12 }
 0x112   : > { %p5929_p5 = por %p5928_p11, %p5927_p4 }
 0x113   : > { %p5923_p9 = pneg %p5922_p1 }
 0x115   : > { %p5930_p10 = pnand %p5929_p5, %p5923_p9 }
 0x117   : > { %5933 = shalt.err (!%p5930_p10)
}
 0x118   : > { %5368 = dma.hbm_to_vmem [thread:$0]  (%p6302_p12), %s751_s27, 16, %s754_s25, %s723_s29  }
 0x119 PF: > { %762 = sbr.rel (%p6329_p2) target bundleno = 3806 (0xede), region = 80  ;;  %s7543_s14 = sld [smem:[#allocation49_spill]] (!%p6329_p2) }
 0x11a   : > { %s6544_s6 = sand.u32 (!%p6329_p2), 1, %s6062_s22  }
 0x11b   : > { %s6547_s7 = sshll.u32 (!%p6329_p2), %s6544_s6, 3  ;;  %s765_s12 = scalar_lea.sflag (!%p6329_p2), [#allocation5], %s6544_s6 }
 0x11c   : > { %s768_s16 = scalar_lea.vmem (!%p6329_p2), [#allocation4], %s6547_s7 }
 0x11f   : > { %p7544_p0 = scmp.ne.s32.totalorder %s7543_s14, 0 }
 0x121   : > { %6005 = dma.done.wait (%p7544_p0), %s765_s12, 128  }
 0x122   : > { %6007 = vsyncadd (%p7544_p0), %s765_s12, 4294967168  ;;  %s7545_s4 = sld [smem:[#allocation46_spill]]  ;;  %s777_s29 = scalar_lea.vmem [#allocation7], %s6547_s7 }
 0x128   : > { %s6556_s15 = sand.u32 1, %s7545_s4  }
 0x129   : > { %s774_s8 = scalar_lea.sflag [#allocation8], %s6556_s15 }
 0x12a   : > { %6009 = dma.done.wait (%p7544_p0), %s774_s8, 256  }
 0x12b   : > { %6011 = vsyncadd (%p7544_p0), %s774_s8, 4294967040  ;;  %s786_s24 = scalar_lea.vmem [#allocation9], %s6547_s7  ;;  %s792_s13 = scalar_lea.sflag [#allocation11], %s6556_s15 }
 0x12c   : > { %s795_s17 = scalar_lea.vmem [#allocation10], %s6547_s7 }
 0x12d   : > { %6013 = dma.done.wait (%p7544_p0), %s792_s13, 128  }
 0x12e   : > { %6015 = vsyncadd (%p7544_p0), %s792_s13, 4294967168  ;;  %s7546_s10 = sld [smem:[#allocation39_spill]] }
 0x134   : > { %s6572_s3 = sand.u32 1, %s7546_s10  }
 0x135   : > { %s5351_s2 = smul.u32 1536, %s6572_s3 }
 0x137   : > { %s6575_s28 = scalar_lea.vmem [#allocation12], %s5351_s2 }
 0x138   : > { %6017 = dma.done.wait (%p6308_p13), %s792_s13, 24576  }
 0x139   : > { %6019 = vsyncadd (%p6308_p13), %s792_s13, 4294942720  ;;  %s4654_s27 = sshll.u32 %s6572_s3, 9  ;;  %s810_s21 = scalar_lea.sflag [#allocation14], %s6556_s15 }
 0x13a   : > { %s6583_s25 = scalar_lea.vmem [#allocation13], %s4654_s27 }
 0x13b   : > { %6021 = dma.done.wait (%p6308_p13), %s810_s21, 32768  }
 0x13c   : > { %6023 = vsyncadd (%p6308_p13), %s810_s21, 4294934528  ;;  %s6589_s19 = scalar_lea.vmem [#allocation15], %s5351_s2  ;;  %s828_s1 = scalar_lea.sflag [#allocation17], %s6556_s15 }
 0x13d   : > { %s6592_s20 = scalar_lea.vmem [#allocation16], %s4654_s27 }
 0x13e   : > { %6025 = dma.done.wait (%p6308_p13), %s828_s1, 8320  }
 0x13f   : > { %6027 = vsyncadd (%p6308_p13), %s828_s1, 4294958976  ;;  %s4656_s30 = sshll.u32 %s6572_s3, 3  ;;  %s4657_s14 = sshll.u32 %s6572_s3, 7 }
 0x140   : > { %s6600_s12 = scalar_lea.vmem [#allocation18], %s4656_s30  ;;  %s846_s8 = scalar_lea.sflag [#allocation20], %s6556_s15 }
 0x141   : > { %s6603_s13 = scalar_lea.vmem [#allocation19], %s4657_s14 }
 0x142   : > { %6029 = dma.done.wait (%p6308_p13), %s846_s8, 2064  }
 0x143   : > { %6031 = vsyncadd (%p6308_p13), %s846_s8, 4294965232  ;;  %s857_s10 = scalar_lea.vmem [#allocation21], %s6572_s3  ;;  %s863_s2 = scalar_lea.sflag [#allocation23], %s6556_s15 }
 0x144   : > { %s6611_s27 = scalar_lea.vmem [#allocation22], %s4657_s14 }
 0x145   : > { %6033 = dma.done.wait (%p6308_p13), %s863_s2, 2064  }
 0x146   : > { %6035 = vsyncadd (%p6308_p13), %s863_s2, 4294965232  ;;  %s874_s21 = scalar_lea.vmem [#allocation24], %s6572_s3  ;;  %p7548_p12 = scmp.eq.s32.totalorder %s7545_s4, 0 }
 0x148   : > { %6037 = dma.done.wait (%p7548_p12), [#allocation26], 2064   ;;  %p7549_p2 = pmov %p7548_p12 }
 0x149   : > { %s986_s1 = scalar_lea.vmem [#allocation28], %s6547_s7  ;;  %s7550_s30 = sld [smem:[#allocation42_spill]] }
 0x14a   : > { %6039 = vsyncadd (%p7549_p2), [#allocation26], 4294965232 }
 0x14f   : > { %p4662_p8 = scmp.ne.s32.totalorder %s7550_s30, 0 }
 0x151   : > { %990 = sbr.rel (%p4662_p8) target bundleno = 344 (0x158), region = 144 }
 0x156   : > { %v991_v0 = vld [vmem:[%s768_s16] sm:$0xff] }
 0x157   : > { %992 = vst [vmem:[#allocation2] sm:$0xff] %v991_v0 }
 0x158 PF: > { %v1057_v1 = vld [vmem:[%s6575_s28 + $0x1e8] sm:$0xff]  ;;  %v1056_v2 = vld [vmem:[%s6575_s28 + $0x1e0] sm:$0xff]  ;;  %v6109_v5 = vmov 0.0   ;;  %v1059_v7 = vld [vmem:[%s6575_s28 + $0x1f8] sm:$0xff]  ;;  %vm6110_vm0 = vmmov 0   ;;  %vm1686_vm1 = vcmask 64512  }
 0x159   : > { %v1053_v3 = vld [vmem:[%s6575_s28 + $0x1c8] sm:$0xff]  ;;  %1060 = vmatprep.subr.mxu0 %v1057_v1  ;;  %v1052_v4 = vld [vmem:[%s6575_s28 + $0x1c0] sm:$0xff]  ;;  %1124 = vmatprep.mubr.f32.mxu0 %v6109_v5  ;;  %v1058_v9 = vld [vmem:[%s6575_s28 + $0x1f0] sm:$0xff]  ;;  %s7551_s16 = sld [smem:[#allocation42_spill]] }
 0x15a   : > { %1061 = vmatpush1.msra.mxu0 %v1056_v2  ;;  %v1049_v6 = vld [vmem:[%s6575_s28 + $0x1a8] sm:$0xff]  ;;  %1195 = vmatprep.mubr.f32.mxu1 %v6109_v5  ;;  %v1048_v8 = vld [vmem:[%s6575_s28 + $0x1a0] sm:$0xff]  ;;  %v1055_v10 = vld [vmem:[%s6575_s28 + $0x1d8] sm:$0xff] }
 0x15b   : > { %1062 = vmatprep.subr.mxu0 %v1053_v3  ;;  %1131 = vmatprep.subr.mxu1 %v1059_v7  ;;  %v1045_v11 = vld [vmem:[%s6575_s28 + $0x188] sm:$0xff]  ;;  %v1054_v12 = vld [vmem:[%s6575_s28 + $0x1d0] sm:$0xff]  ;;  %v1044_v13 = vld [vmem:[%s6575_s28 + $0x180] sm:$0xff] }
 0x15c   : > { %1063 = vmatpush1.msra.mxu0 %v1052_v4  ;;  %1132 = vmatpush1.msra.mxu1 %v1058_v9  ;;  %v1051_v14 = vld [vmem:[%s6575_s28 + $0x1b8] sm:$0xff]  ;;  %v1050_v15 = vld [vmem:[%s6575_s28 + $0x1b0] sm:$0xff]  ;;  %v1041_v16 = vld [vmem:[%s6575_s28 + $0x168] sm:$0xff] }
 0x15d   : > { %1064 = vmatprep.subr.mxu0 %v1049_v6  ;;  %1133 = vmatprep.subr.mxu1 %v1055_v10  ;;  %v1047_v17 = vld [vmem:[%s6575_s28 + $0x198] sm:$0xff]  ;;  %v1040_v18 = vld [vmem:[%s6575_s28 + $0x160] sm:$0xff]  ;;  %v1046_v19 = vld [vmem:[%s6575_s28 + $0x190] sm:$0xff] }
 0x15e   : > { %1065 = vmatpush1.msra.mxu0 %v1048_v8  ;;  %1134 = vmatpush1.msra.mxu1 %v1054_v12  ;;  %v1037_v20 = vld [vmem:[%s6575_s28 + $0x148] sm:$0xff]  ;;  %v1043_v21 = vld [vmem:[%s6575_s28 + $0x178] sm:$0xff]  ;;  %v1036_v22 = vld [vmem:[%s6575_s28 + $0x140] sm:$0xff] }
 0x15f   : > { %1066 = vmatprep.subr.mxu0 %v1045_v11  ;;  %1135 = vmatprep.subr.mxu1 %v1051_v14  ;;  %v1042_v23 = vld [vmem:[%s6575_s28 + $0x170] sm:$0xff]  ;;  %v1033_v24 = vld [vmem:[%s6575_s28 + $0x128] sm:$0xff]  ;;  %v1039_v25 = vld [vmem:[%s6575_s28 + $0x158] sm:$0xff]  ;;  %p4929_p13 = scmp.ne.s32.totalorder %s7551_s16, 1 }
 0x160   : > { %1067 = vmatpush1.msra.mxu0 %v1044_v13  ;;  %1136 = vmatpush1.msra.mxu1 %v1050_v15  ;;  %v1032_v26 = vld [vmem:[%s6575_s28 + $0x120] sm:$0xff]  ;;  %v1038_v27 = vld [vmem:[%s6575_s28 + $0x150] sm:$0xff]  ;;  %v1029_v28 = vld [vmem:[%s6575_s28 + $0x108] sm:$0xff] }
 0x161   : > { %1068 = vmatprep.subr.mxu0 %v1041_v16  ;;  %1137 = vmatprep.subr.mxu1 %v1047_v17  ;;  %v1035_v29 = vld [vmem:[%s6575_s28 + $0x138] sm:$0xff]  ;;  %v1028_v30 = vld [vmem:[%s6575_s28 + $0x100] sm:$0xff]  ;;  %v1034_v31 = vld [vmem:[%s6575_s28 + $0x130] sm:$0xff] }
 0x162   : > { %1069 = vmatpush1.msra.mxu0 %v1040_v18  ;;  %1138 = vmatpush1.msra.mxu1 %v1046_v19  ;;  %v1025_v32 = vld [vmem:[%s6575_s28 + $0xe8] sm:$0xff]  ;;  %v1031_v33 = vld [vmem:[%s6575_s28 + $0x118] sm:$0xff]  ;;  %v1024_v34 = vld [vmem:[%s6575_s28 + $0xe0] sm:$0xff] }
 0x163   : > { %1070 = vmatprep.subr.mxu0 %v1037_v20  ;;  %1139 = vmatprep.subr.mxu1 %v1043_v21  ;;  %v1030_v35 = vld [vmem:[%s6575_s28 + $0x110] sm:$0xff]  ;;  %v1021_v36 = vld [vmem:[%s6575_s28 + $0xc8] sm:$0xff]  ;;  %v1027_v37 = vld [vmem:[%s6575_s28 + $0xf8] sm:$0xff] }
 0x164   : > { %1071 = vmatpush1.msra.mxu0 %v1036_v22  ;;  %1140 = vmatpush1.msra.mxu1 %v1042_v23  ;;  %v1020_v38 = vld [vmem:[%s6575_s28 + $0xc0] sm:$0xff]  ;;  %v1026_v39 = vld [vmem:[%s6575_s28 + $0xf0] sm:$0xff]  ;;  %v1017_v40 = vld [vmem:[%s6575_s28 + $0xa8] sm:$0xff] }
 0x165   : > { %1072 = vmatprep.subr.mxu0 %v1033_v24  ;;  %1141 = vmatprep.subr.mxu1 %v1039_v25  ;;  %v1023_v41 = vld [vmem:[%s6575_s28 + $0xd8] sm:$0xff]  ;;  %v1016_v42 = vld [vmem:[%s6575_s28 + $0xa0] sm:$0xff]  ;;  %v1022_v43 = vld [vmem:[%s6575_s28 + $0xd0] sm:$0xff] }
 0x166   : > { %1073 = vmatpush1.msra.mxu0 %v1032_v26  ;;  %1142 = vmatpush1.msra.mxu1 %v1038_v27  ;;  %v1013_v44 = vld [vmem:[%s6575_s28 + $0x88] sm:$0xff]  ;;  %v1019_v45 = vld [vmem:[%s6575_s28 + $0xb8] sm:$0xff]  ;;  %v1012_v46 = vld [vmem:[%s6575_s28 + $0x80] sm:$0xff] }
 0x167   : > { %1074 = vmatprep.subr.mxu0 %v1029_v28  ;;  %1143 = vmatprep.subr.mxu1 %v1035_v29  ;;  %v1018_v47 = vld [vmem:[%s6575_s28 + $0xb0] sm:$0xff]  ;;  %v1009_v48 = vld [vmem:[%s6575_s28 + $0x68] sm:$0xff]  ;;  %v1015_v49 = vld [vmem:[%s6575_s28 + $0x98] sm:$0xff] }
 0x168   : > { %1075 = vmatpush1.msra.mxu0 %v1028_v30  ;;  %1144 = vmatpush1.msra.mxu1 %v1034_v31  ;;  %v1008_v50 = vld [vmem:[%s6575_s28 + $0x60] sm:$0xff]  ;;  %v1014_v51 = vld [vmem:[%s6575_s28 + $0x90] sm:$0xff]  ;;  %v1005_v52 = vld [vmem:[%s6575_s28 + $0x48] sm:$0xff] }
 0x169   : > { %1076 = vmatprep.subr.mxu0 %v1025_v32  ;;  %1145 = vmatprep.subr.mxu1 %v1031_v33  ;;  %v1011_v53 = vld [vmem:[%s6575_s28 + $0x78] sm:$0xff]  ;;  %v1004_v54 = vld [vmem:[%s6575_s28 + $0x40] sm:$0xff]  ;;  %v1010_v55 = vld [vmem:[%s6575_s28 + $0x70] sm:$0xff] }
 0x16a   : > { %1077 = vmatpush1.msra.mxu0 %v1024_v34  ;;  %1146 = vmatpush1.msra.mxu1 %v1030_v35  ;;  %v1001_v56 = vld [vmem:[%s6575_s28 + $0x28] sm:$0xff]  ;;  %v1007_v57 = vld [vmem:[%s6575_s28 + $0x58] sm:$0xff]  ;;  %v1000_v58 = vld [vmem:[%s6575_s28 + $0x20] sm:$0xff] }
 0x16b   : > { %1078 = vmatprep.subr.mxu0 %v1021_v36  ;;  %1147 = vmatprep.subr.mxu1 %v1027_v37  ;;  %v1006_v59 = vld [vmem:[%s6575_s28 + $0x50] sm:$0xff]  ;;  %v997_v60 = vld [vmem:[%s6575_s28 + $0x8] sm:$0xff]  ;;  %v1003_v61 = vld [vmem:[%s6575_s28 + $0x38] sm:$0xff] }
 0x16c   : > { %1079 = vmatpush1.msra.mxu0 %v1020_v38  ;;  %1148 = vmatpush1.msra.mxu1 %v1026_v39  ;;  %v996_v62 = vld [vmem:[%s6575_s28] sm:$0xff]  ;;  %v1002_v63 = vld [vmem:[%s6575_s28 + $0x30] sm:$0xff]  ;;  %v6690_v0 = vld [vmem:[#allocation2] sm:$0xff] }
 0x16d   : > { %1080 = vmatprep.subr.mxu0 %v1017_v40  ;;  %1149 = vmatprep.subr.mxu1 %v1023_v41  ;;  %v4724_v1 = vld [vmem:[%s6575_s28 + $0x3e8] sm:$0xff]  ;;  %v4723_v2 = vld [vmem:[%s6575_s28 + $0x3e0] sm:$0xff]  ;;  %v999_v3 = vld [vmem:[%s6575_s28 + $0x18] sm:$0xff] }
 0x16e   : > { %1081 = vmatpush1.msra.mxu0 %v1016_v42  ;;  %1150 = vmatpush1.msra.mxu1 %v1022_v43  ;;  %v4720_v4 = vld [vmem:[%s6575_s28 + $0x3c8] sm:$0xff]  ;;  %v998_v6 = vld [vmem:[%s6575_s28 + $0x10] sm:$0xff]  ;;  %v4719_v7 = vld [vmem:[%s6575_s28 + $0x3c0] sm:$0xff] }
 0x16f   : > { %1082 = vmatprep.subr.mxu0 %v1013_v44  ;;  %1151 = vmatprep.subr.mxu1 %v1019_v45  ;;  %v4726_v8 = vld [vmem:[%s6575_s28 + $0x3f8] sm:$0xff]  ;;  %v4716_v9 = vld [vmem:[%s6575_s28 + $0x3a8] sm:$0xff]  ;;  %v4715_v10 = vld [vmem:[%s6575_s28 + $0x3a0] sm:$0xff] }
 0x170   : > { %1083 = vmatpush1.msra.mxu0 %v1012_v46  ;;  %1152 = vmatpush1.msra.mxu1 %v1018_v47  ;;  %v4725_v11 = vld [vmem:[%s6575_s28 + $0x3f0] sm:$0xff]  ;;  %v4712_v12 = vld [vmem:[%s6575_s28 + $0x388] sm:$0xff]  ;;  %v4722_v13 = vld [vmem:[%s6575_s28 + $0x3d8] sm:$0xff] }
 0x171   : > { %1084 = vmatprep.subr.mxu0 %v1009_v48  ;;  %1153 = vmatprep.subr.mxu1 %v1015_v49  ;;  %v4711_v14 = vld [vmem:[%s6575_s28 + $0x380] sm:$0xff]  ;;  %v4721_v15 = vld [vmem:[%s6575_s28 + $0x3d0] sm:$0xff]  ;;  %v4708_v16 = vld [vmem:[%s6575_s28 + $0x368] sm:$0xff] }
 0x172   : > { %1085 = vmatpush1.msra.mxu0 %v1008_v50  ;;  %1154 = vmatpush1.msra.mxu1 %v1014_v51  ;;  %v4718_v17 = vld [vmem:[%s6575_s28 + $0x3b8] sm:$0xff]  ;;  %v4707_v18 = vld [vmem:[%s6575_s28 + $0x360] sm:$0xff]  ;;  %v4717_v19 = vld [vmem:[%s6575_s28 + $0x3b0] sm:$0xff] }
 0x173   : > { %1086 = vmatprep.subr.mxu0 %v1005_v52  ;;  %1155 = vmatprep.subr.mxu1 %v1011_v53  ;;  %v4704_v20 = vld [vmem:[%s6575_s28 + $0x348] sm:$0xff]  ;;  %v4714_v21 = vld [vmem:[%s6575_s28 + $0x398] sm:$0xff]  ;;  %v4703_v22 = vld [vmem:[%s6575_s28 + $0x340] sm:$0xff] }
 0x174   : > { %1087 = vmatpush1.msra.mxu0 %v1004_v54  ;;  %1156 = vmatpush1.msra.mxu1 %v1010_v55  ;;  %v4713_v23 = vld [vmem:[%s6575_s28 + $0x390] sm:$0xff]  ;;  %v4700_v24 = vld [vmem:[%s6575_s28 + $0x328] sm:$0xff]  ;;  %v4710_v25 = vld [vmem:[%s6575_s28 + $0x378] sm:$0xff] }
 0x175   : > { %1088 = vmatprep.subr.mxu0 %v1001_v56  ;;  %1157 = vmatprep.subr.mxu1 %v1007_v57  ;;  %v4699_v26 = vld [vmem:[%s6575_s28 + $0x320] sm:$0xff]  ;;  %v4709_v27 = vld [vmem:[%s6575_s28 + $0x370] sm:$0xff]  ;;  %v4696_v28 = vld [vmem:[%s6575_s28 + $0x308] sm:$0xff] }
 0x176   : > { %1089 = vmatpush1.msra.mxu0 %v1000_v58  ;;  %1158 = vmatpush1.msra.mxu1 %v1006_v59  ;;  %v4706_v29 = vld [vmem:[%s6575_s28 + $0x358] sm:$0xff]  ;;  %v4695_v30 = vld [vmem:[%s6575_s28 + $0x300] sm:$0xff]  ;;  %v4705_v31 = vld [vmem:[%s6575_s28 + $0x350] sm:$0xff] }
 0x177   : > { %1090 = vmatprep.subr.mxu0 %v997_v60  ;;  %1159 = vmatprep.subr.mxu1 %v1003_v61  ;;  %v4692_v32 = vld [vmem:[%s6575_s28 + $0x2e8] sm:$0xff]  ;;  %v4702_v33 = vld [vmem:[%s6575_s28 + $0x338] sm:$0xff]  ;;  %v4691_v34 = vld [vmem:[%s6575_s28 + $0x2e0] sm:$0xff] }
 0x178   : > { %1091 = vmatpush1.msra.mxu0 %v996_v62  ;;  %1160 = vmatpush1.msra.mxu1 %v1002_v63  ;;  %v4701_v35 = vld [vmem:[%s6575_s28 + $0x330] sm:$0xff]  ;;  %v4688_v36 = vld [vmem:[%s6575_s28 + $0x2c8] sm:$0xff]  ;;  %v4698_v37 = vld [vmem:[%s6575_s28 + $0x318] sm:$0xff] }
 0x179   : > { %1125 = vmatmul.mubr.f32.vlgmr.msra.gmra.mxu0 %v6690_v0  ;;  %1267 = vmatprep.subr.mxu0 %v4724_v1  ;;  %v4687_v38 = vld [vmem:[%s6575_s28 + $0x2c0] sm:$0xff]  ;;  %v4697_v39 = vld [vmem:[%s6575_s28 + $0x310] sm:$0xff]  ;;  %v4684_v40 = vld [vmem:[%s6575_s28 + $0x2a8] sm:$0xff] }
 0x17a   : > { %1268 = vmatpush1.msra.mxu0 %v4723_v2  ;;  %1161 = vmatprep.subr.mxu1 %v999_v3  ;;  %v4694_v41 = vld [vmem:[%s6575_s28 + $0x2f8] sm:$0xff]  ;;  %v4683_v42 = vld [vmem:[%s6575_s28 + $0x2a0] sm:$0xff]  ;;  %v4693_v43 = vld [vmem:[%s6575_s28 + $0x2f0] sm:$0xff] }
 0x17b   : > { %1269 = vmatprep.subr.mxu0 %v4720_v4  ;;  %1162 = vmatpush1.msra.mxu1 %v998_v6  ;;  %v4680_v44 = vld [vmem:[%s6575_s28 + $0x288] sm:$0xff]  ;;  %v4690_v45 = vld [vmem:[%s6575_s28 + $0x2d8] sm:$0xff]  ;;  %v4679_v46 = vld [vmem:[%s6575_s28 + $0x280] sm:$0xff] }
 0x17c   : > { %1270 = vmatpush1.msra.mxu0 %v4719_v7  ;;  %1338 = vmatprep.subr.mxu1 %v4726_v8  ;;  %v4689_v47 = vld [vmem:[%s6575_s28 + $0x2d0] sm:$0xff]  ;;  %v4676_v48 = vld [vmem:[%s6575_s28 + $0x268] sm:$0xff]  ;;  %v4686_v49 = vld [vmem:[%s6575_s28 + $0x2b8] sm:$0xff] }
 0x17d   : > { %1271 = vmatprep.subr.mxu0 %v4716_v9  ;;  %1196 = vmatmul.mubr.f32.vlgmr.msra.gmra.mxu1 %v6690_v0  ;;  %v4675_v50 = vld [vmem:[%s6575_s28 + $0x260] sm:$0xff]  ;;  %v4685_v51 = vld [vmem:[%s6575_s28 + $0x2b0] sm:$0xff]  ;;  %v4672_v52 = vld [vmem:[%s6575_s28 + $0x248] sm:$0xff] }
 0x17e   : > { %1272 = vmatpush1.msra.mxu0 %v4715_v10  ;;  %1339 = vmatpush1.msra.mxu1 %v4725_v11  ;;  %v4682_v53 = vld [vmem:[%s6575_s28 + $0x298] sm:$0xff]  ;;  %v4671_v54 = vld [vmem:[%s6575_s28 + $0x240] sm:$0xff]  ;;  %v4681_v55 = vld [vmem:[%s6575_s28 + $0x290] sm:$0xff] }
 0x17f   : > { %1273 = vmatprep.subr.mxu0 %v4712_v12  ;;  %1340 = vmatprep.subr.mxu1 %v4722_v13  ;;  %v4668_v56 = vld [vmem:[%s6575_s28 + $0x228] sm:$0xff]  ;;  %v4678_v57 = vld [vmem:[%s6575_s28 + $0x278] sm:$0xff]  ;;  %v4667_v58 = vld [vmem:[%s6575_s28 + $0x220] sm:$0xff] }
 0x180   : > { %1274 = vmatpush1.msra.mxu0 %v4711_v14  ;;  %1341 = vmatpush1.msra.mxu1 %v4721_v15  ;;  %v4664_v59 = vld [vmem:[%s6575_s28 + $0x208] sm:$0xff]  ;;  %v4677_v60 = vld [vmem:[%s6575_s28 + $0x270] sm:$0xff]  ;;  %v4663_v61 = vld [vmem:[%s6575_s28 + $0x200] sm:$0xff] }
 0x181   : > { %1275 = vmatprep.subr.mxu0 %v4708_v16  ;;  %1342 = vmatprep.subr.mxu1 %v4718_v17  ;;  %v4674_v62 = vld [vmem:[%s6575_s28 + $0x258] sm:$0xff]  ;;  %v4673_v63 = vld [vmem:[%s6575_s28 + $0x250] sm:$0xff]  ;;  %v4788_v3 = vld [vmem:[%s6575_s28 + $0x5e8] sm:$0xff] }
 0x182   : > { %1276 = vmatpush1.msra.mxu0 %v4707_v18  ;;  %1343 = vmatpush1.msra.mxu1 %v4717_v19  ;;  %v4670_v1 = vld [vmem:[%s6575_s28 + $0x238] sm:$0xff]  ;;  %v4669_v2 = vld [vmem:[%s6575_s28 + $0x230] sm:$0xff]  ;;  %v4787_v6 = vld [vmem:[%s6575_s28 + $0x5e0] sm:$0xff] }
 0x183   : > { %1277 = vmatprep.subr.mxu0 %v4704_v20  ;;  %1344 = vmatprep.subr.mxu1 %v4714_v21  ;;  %v4666_v4 = vld [vmem:[%s6575_s28 + $0x218] sm:$0xff]  ;;  %v4665_v7 = vld [vmem:[%s6575_s28 + $0x210] sm:$0xff]  ;;  %v4784_v8 = vld [vmem:[%s6575_s28 + $0x5c8] sm:$0xff] }
 0x184   : > { %1278 = vmatpush1.msra.mxu0 %v4703_v22  ;;  %1345 = vmatpush1.msra.mxu1 %v4713_v23  ;;  %v4783_v9 = vld [vmem:[%s6575_s28 + $0x5c0] sm:$0xff]  ;;  %v4780_v10 = vld [vmem:[%s6575_s28 + $0x5a8] sm:$0xff] }
 0x185   : > { %1279 = vmatprep.subr.mxu0 %v4700_v24  ;;  %1346 = vmatprep.subr.mxu1 %v4710_v25  ;;  %v4779_v11 = vld [vmem:[%s6575_s28 + $0x5a0] sm:$0xff]  ;;  %v4776_v12 = vld [vmem:[%s6575_s28 + $0x588] sm:$0xff] }
 0x186   : > { %1280 = vmatpush1.msra.mxu0 %v4699_v26  ;;  %1347 = vmatpush1.msra.mxu1 %v4709_v27  ;;  %v4775_v13 = vld [vmem:[%s6575_s28 + $0x580] sm:$0xff]  ;;  %v4772_v14 = vld [vmem:[%s6575_s28 + $0x568] sm:$0xff] }
 0x187   : > { %1281 = vmatprep.subr.mxu0 %v4696_v28  ;;  %1348 = vmatprep.subr.mxu1 %v4706_v29  ;;  %v4771_v15 = vld [vmem:[%s6575_s28 + $0x560] sm:$0xff]  ;;  %v4768_v16 = vld [vmem:[%s6575_s28 + $0x548] sm:$0xff] }
 0x188   : > { %1282 = vmatpush1.msra.mxu0 %v4695_v30  ;;  %1349 = vmatpush1.msra.mxu1 %v4705_v31  ;;  %v4767_v17 = vld [vmem:[%s6575_s28 + $0x540] sm:$0xff]  ;;  %v4764_v18 = vld [vmem:[%s6575_s28 + $0x528] sm:$0xff] }
 0x189   : > { %1283 = vmatprep.subr.mxu0 %v4692_v32  ;;  %1350 = vmatprep.subr.mxu1 %v4702_v33  ;;  %v4763_v19 = vld [vmem:[%s6575_s28 + $0x520] sm:$0xff]  ;;  %v4760_v20 = vld [vmem:[%s6575_s28 + $0x508] sm:$0xff] }
 0x18a   : > { %1284 = vmatpush1.msra.mxu0 %v4691_v34  ;;  %1351 = vmatpush1.msra.mxu1 %v4701_v35  ;;  %v4759_v21 = vld [vmem:[%s6575_s28 + $0x500] sm:$0xff]  ;;  %v4756_v22 = vld [vmem:[%s6575_s28 + $0x4e8] sm:$0xff] }
 0x18b   : > { %1285 = vmatprep.subr.mxu0 %v4688_v36  ;;  %1352 = vmatprep.subr.mxu1 %v4698_v37  ;;  %v4755_v23 = vld [vmem:[%s6575_s28 + $0x4e0] sm:$0xff]  ;;  %v4752_v24 = vld [vmem:[%s6575_s28 + $0x4c8] sm:$0xff] }
 0x18c   : > { %1286 = vmatpush1.msra.mxu0 %v4687_v38  ;;  %1353 = vmatpush1.msra.mxu1 %v4697_v39  ;;  %v4751_v25 = vld [vmem:[%s6575_s28 + $0x4c0] sm:$0xff]  ;;  %v4748_v26 = vld [vmem:[%s6575_s28 + $0x4a8] sm:$0xff]  ;;  %v4790_v38 = vld [vmem:[%s6575_s28 + $0x5f8] sm:$0xff] }
 0x18d   : > { %1287 = vmatprep.subr.mxu0 %v4684_v40  ;;  %1354 = vmatprep.subr.mxu1 %v4694_v41  ;;  %v4747_v27 = vld [vmem:[%s6575_s28 + $0x4a0] sm:$0xff]  ;;  %v4744_v28 = vld [vmem:[%s6575_s28 + $0x488] sm:$0xff]  ;;  %v4789_v39 = vld [vmem:[%s6575_s28 + $0x5f0] sm:$0xff] }
 0x18e   : > { %1288 = vmatpush1.msra.mxu0 %v4683_v42  ;;  %1355 = vmatpush1.msra.mxu1 %v4693_v43  ;;  %v4743_v29 = vld [vmem:[%s6575_s28 + $0x480] sm:$0xff]  ;;  %v4740_v30 = vld [vmem:[%s6575_s28 + $0x468] sm:$0xff]  ;;  %v4786_v40 = vld [vmem:[%s6575_s28 + $0x5d8] sm:$0xff] }
 0x18f   : > { %1289 = vmatprep.subr.mxu0 %v4680_v44  ;;  %1356 = vmatprep.subr.mxu1 %v4690_v45  ;;  %v4739_v31 = vld [vmem:[%s6575_s28 + $0x460] sm:$0xff]  ;;  %v4736_v32 = vld [vmem:[%s6575_s28 + $0x448] sm:$0xff]  ;;  %v4785_v41 = vld [vmem:[%s6575_s28 + $0x5d0] sm:$0xff] }
 0x190   : > { %1290 = vmatpush1.msra.mxu0 %v4679_v46  ;;  %1357 = vmatpush1.msra.mxu1 %v4689_v47  ;;  %v4735_v33 = vld [vmem:[%s6575_s28 + $0x440] sm:$0xff]  ;;  %v4732_v34 = vld [vmem:[%s6575_s28 + $0x428] sm:$0xff]  ;;  %v4782_v42 = vld [vmem:[%s6575_s28 + $0x5b8] sm:$0xff] }
 0x191   : > { %1291 = vmatprep.subr.mxu0 %v4676_v48  ;;  %1358 = vmatprep.subr.mxu1 %v4686_v49  ;;  %v4731_v35 = vld [vmem:[%s6575_s28 + $0x420] sm:$0xff]  ;;  %v4728_v36 = vld [vmem:[%s6575_s28 + $0x408] sm:$0xff]  ;;  %v4781_v43 = vld [vmem:[%s6575_s28 + $0x5b0] sm:$0xff] }
 0x192   : > { %1292 = vmatpush1.msra.mxu0 %v4675_v50  ;;  %1359 = vmatpush1.msra.mxu1 %v4685_v51  ;;  %v4727_v37 = vld [vmem:[%s6575_s28 + $0x400] sm:$0xff]  ;;  %v4778_v44 = vld [vmem:[%s6575_s28 + $0x598] sm:$0xff]  ;;  %v4777_v45 = vld [vmem:[%s6575_s28 + $0x590] sm:$0xff] }
 0x193   : > { %1293 = vmatprep.subr.mxu0 %v4672_v52  ;;  %1360 = vmatprep.subr.mxu1 %v4682_v53  ;;  %v4774_v46 = vld [vmem:[%s6575_s28 + $0x578] sm:$0xff]  ;;  %v4773_v47 = vld [vmem:[%s6575_s28 + $0x570] sm:$0xff] }
 0x194   : > { %1294 = vmatpush1.msra.mxu0 %v4671_v54  ;;  %1361 = vmatpush1.msra.mxu1 %v4681_v55  ;;  %v4770_v48 = vld [vmem:[%s6575_s28 + $0x558] sm:$0xff]  ;;  %v4769_v49 = vld [vmem:[%s6575_s28 + $0x550] sm:$0xff] }
 0x195   : > { %1295 = vmatprep.subr.mxu0 %v4668_v56  ;;  %1362 = vmatprep.subr.mxu1 %v4678_v57  ;;  %v4766_v50 = vld [vmem:[%s6575_s28 + $0x538] sm:$0xff]  ;;  %v4765_v51 = vld [vmem:[%s6575_s28 + $0x530] sm:$0xff] }
 0x196   : > { %1296 = vmatpush1.msra.mxu0 %v4667_v58  ;;  %1331 = vmatprep.mubr.f32.mxu0 %v6109_v5  ;;  %v4762_v52 = vld [vmem:[%s6575_s28 + $0x518] sm:$0xff]  ;;  %v4761_v53 = vld [vmem:[%s6575_s28 + $0x510] sm:$0xff] }
 0x197   : > { %1297 = vmatprep.subr.mxu0 %v4664_v59  ;;  %1363 = vmatpush1.msra.mxu1 %v4677_v60  ;;  %v4758_v54 = vld [vmem:[%s6575_s28 + $0x4f8] sm:$0xff]  ;;  %v4757_v55 = vld [vmem:[%s6575_s28 + $0x4f0] sm:$0xff] }
 0x198   : > { %1298 = vmatpush1.msra.mxu0 %v4663_v61  ;;  %1364 = vmatprep.subr.mxu1 %v4674_v62  ;;  %v4754_v56 = vld [vmem:[%s6575_s28 + $0x4d8] sm:$0xff]  ;;  %v4753_v57 = vld [vmem:[%s6575_s28 + $0x4d0] sm:$0xff] }
 0x199   : > { %1332 = vmatmul.mubr.f32.vlgmr.msra.gmra.mxu0 %v6690_v0  ;;  %1365 = vmatpush1.msra.mxu1 %v4673_v63  ;;  %v4750_v58 = vld [vmem:[%s6575_s28 + $0x4b8] sm:$0xff]  ;;  %v4749_v59 = vld [vmem:[%s6575_s28 + $0x4b0] sm:$0xff] }
 0x19a   : > { %1366 = vmatprep.subr.mxu1 %v4670_v1  ;;  %1402 = vmatprep.mubr.f32.mxu1 %v6109_v5  ;;  %v4746_v60 = vld [vmem:[%s6575_s28 + $0x498] sm:$0xff]  ;;  %v4745_v61 = vld [vmem:[%s6575_s28 + $0x490] sm:$0xff] }
 0x19b   : > { %1367 = vmatpush1.msra.mxu1 %v4669_v2  ;;  %1474 = vmatprep.subr.mxu0 %v4788_v3  ;;  %v4742_v62 = vld [vmem:[%s6575_s28 + $0x478] sm:$0xff]  ;;  %v4741_v63 = vld [vmem:[%s6575_s28 + $0x470] sm:$0xff] }
 0x19c   : > { %1368 = vmatprep.subr.mxu1 %v4666_v4  ;;  %1475 = vmatpush1.msra.mxu0 %v4787_v6  ;;  %v4738_v1 = vld [vmem:[%s6575_s28 + $0x458] sm:$0xff]  ;;  %v4737_v2 = vld [vmem:[%s6575_s28 + $0x450] sm:$0xff] }
 0x19d   : > { %1369 = vmatpush1.msra.mxu1 %v4665_v7  ;;  %1538 = vmatprep.mubr.f32.mxu0 %v6109_v5  ;;  %v4734_v3 = vld [vmem:[%s6575_s28 + $0x438] sm:$0xff]  ;;  %v4733_v4 = vld [vmem:[%s6575_s28 + $0x430] sm:$0xff] }
 0x19e   : > { %1403 = vmatmul.mubr.f32.vlgmr.msra.gmra.mxu1 %v6690_v0  ;;  %1476 = vmatprep.subr.mxu0 %v4784_v8  ;;  %v4730_v6 = vld [vmem:[%s6575_s28 + $0x418] sm:$0xff]  ;;  %v4729_v7 = vld [vmem:[%s6575_s28 + $0x410] sm:$0xff] }
 0x19f   : > { %1609 = vmatprep.mubr.f32.mxu1 %v6109_v5  ;;  %1477 = vmatpush1.msra.mxu0 %v4783_v9 }
 0x1a0   : > { %1478 = vmatprep.subr.mxu0 %v4780_v10  ;;  %1545 = vmatprep.subr.mxu1 %v4790_v38 }
 0x1a1   : > { %1479 = vmatpush1.msra.mxu0 %v4779_v11  ;;  %1546 = vmatpush1.msra.mxu1 %v4789_v39 }
 0x1a2   : > { %1480 = vmatprep.subr.mxu0 %v4776_v12  ;;  %1547 = vmatprep.subr.mxu1 %v4786_v40 }
 0x1a3   : > { %1481 = vmatpush1.msra.mxu0 %v4775_v13  ;;  %1548 = vmatpush1.msra.mxu1 %v4785_v41 }
 0x1a4   : > { %1482 = vmatprep.subr.mxu0 %v4772_v14  ;;  %1549 = vmatprep.subr.mxu1 %v4782_v42 }
 0x1a5   : > { %1483 = vmatpush1.msra.mxu0 %v4771_v15  ;;  %1550 = vmatpush1.msra.mxu1 %v4781_v43 }
 0x1a6   : > { %1484 = vmatprep.subr.mxu0 %v4768_v16  ;;  %1551 = vmatprep.subr.mxu1 %v4778_v44 }
 0x1a7   : > { %1485 = vmatpush1.msra.mxu0 %v4767_v17  ;;  %1552 = vmatpush1.msra.mxu1 %v4777_v45  ;;  %v995_v17 = vld [vmem:[%s786_s24] sm:$0xff] }
 0x1a8   : > { %1486 = vmatprep.subr.mxu0 %v4764_v18  ;;  %1553 = vmatprep.subr.mxu1 %v4774_v46 }
 0x1a9   : > { %1487 = vmatpush1.msra.mxu0 %v4763_v19  ;;  %1554 = vmatpush1.msra.mxu1 %v4773_v47 }
 0x1aa   : > { %1488 = vmatprep.subr.mxu0 %v4760_v20  ;;  %1555 = vmatprep.subr.mxu1 %v4770_v48 }
 0x1ab   : > { %1489 = vmatpush1.msra.mxu0 %v4759_v21  ;;  %1556 = vmatpush1.msra.mxu1 %v4769_v49 }
 0x1ac   : > { %1490 = vmatprep.subr.mxu0 %v4756_v22  ;;  %1557 = vmatprep.subr.mxu1 %v4766_v50 }
 0x1ad   : > { %1491 = vmatpush1.msra.mxu0 %v4755_v23  ;;  %1558 = vmatpush1.msra.mxu1 %v4765_v51 }
 0x1ae   : > { %1492 = vmatprep.subr.mxu0 %v4752_v24  ;;  %1559 = vmatprep.subr.mxu1 %v4762_v52 }
 0x1af   : > { %1493 = vmatpush1.msra.mxu0 %v4751_v25  ;;  %1560 = vmatpush1.msra.mxu1 %v4761_v53 }
 0x1b0   : > { %1494 = vmatprep.subr.mxu0 %v4748_v26  ;;  %1561 = vmatprep.subr.mxu1 %v4758_v54  ;;  %v2272_v54 = vld [vmem:[%s6583_s25 + $0xf8] sm:$0xff] }
 0x1b1   : > { %1495 = vmatpush1.msra.mxu0 %v4747_v27  ;;  %1562 = vmatpush1.msra.mxu1 %v4757_v55  ;;  %v2256_v55 = vld [vmem:[%s6583_s25 + $0x78] sm:$0xff] }
 0x1b2   : > { %1496 = vmatprep.subr.mxu0 %v4744_v28  ;;  %1563 = vmatprep.subr.mxu1 %v4754_v56  ;;  %v2271_v56 = vld [vmem:[%s6583_s25 + $0xf0] sm:$0xff] }
 0x1b3   : > { %1497 = vmatpush1.msra.mxu0 %v4743_v29  ;;  %1564 = vmatpush1.msra.mxu1 %v4753_v57  ;;  %v2255_v57 = vld [vmem:[%s6583_s25 + $0x70] sm:$0xff] }
 0x1b4   : > { %1498 = vmatprep.subr.mxu0 %v4740_v30  ;;  %1565 = vmatprep.subr.mxu1 %v4750_v58  ;;  %v2270_v58 = vld [vmem:[%s6583_s25 + $0xe8] sm:$0xff] }
 0x1b5   : > { %1499 = vmatpush1.msra.mxu0 %v4739_v31  ;;  %1566 = vmatpush1.msra.mxu1 %v4749_v59  ;;  %v2254_v59 = vld [vmem:[%s6583_s25 + $0x68] sm:$0xff] }
 0x1b6   : > { %1500 = vmatprep.subr.mxu0 %v4736_v32  ;;  %1567 = vmatprep.subr.mxu1 %v4746_v60  ;;  %v2269_v60 = vld [vmem:[%s6583_s25 + $0xe0] sm:$0xff] }
 0x1b7   : > { %1501 = vmatpush1.msra.mxu0 %v4735_v33  ;;  %1568 = vmatpush1.msra.mxu1 %v4745_v61  ;;  %v2253_v61 = vld [vmem:[%s6583_s25 + $0x60] sm:$0xff] }
 0x1b8   : > { %1502 = vmatprep.subr.mxu0 %v4732_v34  ;;  %1569 = vmatprep.subr.mxu1 %v4742_v62  ;;  %v2268_v62 = vld [vmem:[%s6583_s25 + $0xd8] sm:$0xff] }
 0x1b9   : > { %1503 = vmatpush1.msra.mxu0 %v4731_v35  ;;  %1570 = vmatpush1.msra.mxu1 %v4741_v63  ;;  %v2252_v63 = vld [vmem:[%s6583_s25 + $0x58] sm:$0xff] }
 0x1ba   : > { %1504 = vmatprep.subr.mxu0 %v4728_v36  ;;  %1571 = vmatprep.subr.mxu1 %v4738_v1  ;;  %v2267_v1 = vld [vmem:[%s6583_s25 + $0xd0] sm:$0xff] }
 0x1bb   : > { %1505 = vmatpush1.msra.mxu0 %v4727_v37  ;;  %1572 = vmatpush1.msra.mxu1 %v4737_v2  ;;  %v2251_v2 = vld [vmem:[%s6583_s25 + $0x50] sm:$0xff] }
 0x1bc   : > { %1539 = vmatmul.mubr.f32.vlgmr.msra.gmra.mxu0 %v6690_v0  ;;  %5162 = vmatprep.subr.mxu0 %v6109_v5 }
 0x1bd   : > { %5164 = vmatprep.mubr.msk.f32.mxu0 %vm6110_vm0, %v6109_v5  ;;  %1573 = vmatprep.subr.mxu1 %v4734_v3  ;;  %v2266_v3 = vld [vmem:[%s6583_s25 + $0xc8] sm:$0xff] }
 0x1be   : > { %1574 = vmatpush1.msra.mxu1 %v4733_v4  ;;  %v2250_v4 = vld [vmem:[%s6583_s25 + $0x48] sm:$0xff] }
 0x1bf   : > { %1575 = vmatprep.subr.mxu1 %v4730_v6  ;;  %v2265_v6 = vld [vmem:[%s6583_s25 + $0xc0] sm:$0xff] }
 0x1c0   : > { %1576 = vmatpush1.msra.mxu1 %v4729_v7  ;;  %v2249_v7 = vld [vmem:[%s6583_s25 + $0x40] sm:$0xff] }
 0x1c1   : > { %5167 = vmatprep.subr.mxu1 %v6109_v5  ;;  %1610 = vmatmul.mubr.f32.vlgmr.msra.gmra.mxu1 %v6690_v0 }
 0x1c2   : > { %5169 = vmatprep.mubr.msk.f32.mxu1 %vm6110_vm0, %v6109_v5 }
 0x239   : > { %v1126_v8 = vpop.f32.mrf.mxu0 }
 0x23b   : > { %v1128_v9 = vpop.f32.mrf.mxu0 }
 0x23d   : > { %v1197_v11 = vpop.f32.mrf.mxu1 }
 0x23f   : > { %v1199_v13 = vpop.f32.mrf.mxu1 }
 0x259   : > { %v1333_v10 = vpop.f32.mrf.mxu0 }
 0x25a   : > { %5163 = vmatpush3.xpose.msra.mxu0 %v1333_v10  ;;  %v2263_v10 = vld [vmem:[%s6583_s25 + $0xb0] sm:$0xff] }
 0x25b   : > { %5172 = vmatprep.subr.mxu0 %v6109_v5  ;;  %v1335_v12 = vpop.f32.mrf.mxu0 }
 0x25d   : > { %5165 = vmatmul.mubr.f32.vlgmr.msra.gmra.mxu0 %v1126_v8  ;;  %v2264_v8 = vld [vmem:[%s6583_s25 + $0xb8] sm:$0xff] }
 0x25e   : > { %5173 = vmatpush3.xpose.msra.mxu0 %v1335_v12  ;;  %5174 = vmatprep.mubr.msk.f32.mxu0 %vm6110_vm0, %v6109_v5  ;;  %v1404_v0 = vpop.f32.mrf.mxu1  ;;  %v2262_v12 = vld [vmem:[%s6583_s25 + $0xa8] sm:$0xff] }
 0x25f   : > { %5182 = vmatprep.subr.mxu0 %v6109_v5 }
 0x260   : > { %v1406_v14 = vpop.f32.mrf.mxu1 }
 0x261   : > { %5175 = vmatmul.mubr.f32.vlgmr.msra.gmra.mxu0 %v1128_v9  ;;  %v2248_v9 = vld [vmem:[%s6583_s25 + $0x38] sm:$0xff] }
 0x262   : > { %5183 = vmatpush3.xpose.msra.mxu0 %v1404_v0  ;;  %5184 = vmatprep.mubr.msk.f32.mxu0 %vm6110_vm0, %v6109_v5  ;;  %v2261_v0 = vld [vmem:[%s6583_s25 + $0xa0] sm:$0xff] }
 0x263   : > { %5192 = vmatprep.subr.mxu0 %v6109_v5 }
 0x265   : > { %5185 = vmatmul.mubr.f32.vlgmr.msra.gmra.mxu0 %v1197_v11  ;;  %v2247_v11 = vld [vmem:[%s6583_s25 + $0x30] sm:$0xff] }
 0x266   : > { %5193 = vmatpush3.xpose.msra.mxu0 %v1406_v14  ;;  %5194 = vmatprep.mubr.msk.f32.mxu0 %vm6110_vm0, %v6109_v5  ;;  %v2245_v14 = vld [vmem:[%s6583_s25 + $0x20] sm:$0xff] }
 0x267   : > { %4955 = vmatprep.subr.mxu0 %v2272_v54  ;;  %v2294_v54 = vld [vmem:[%s6583_s25 + $0x1a8] sm:$0xff] }
 0x269   : > { %5195 = vmatmul.mubr.f32.vlgmr.msra.gmra.mxu0 %v1199_v13  ;;  %v2246_v13 = vld [vmem:[%s6583_s25 + $0x28] sm:$0xff] }
 0x26a   : > { %4956 = vmatpush3.msra.mxu0 %v2256_v55  ;;  %v2242_v55 = vld [vmem:[%s6583_s25 + $0x8] sm:$0xff] }
 0x26b   : > { %4957 = vmatprep.subr.mxu0 %v2271_v56  ;;  %v2278_v56 = vld [vmem:[%s6583_s25 + $0x128] sm:$0xff] }
 0x26c   : > { %4958 = vmatpush3.msra.mxu0 %v2255_v57  ;;  %v2257_v57 = vld [vmem:[%s6583_s25 + $0x80] sm:$0xff] }
 0x26d   : > { %4959 = vmatprep.subr.mxu0 %v2270_v58  ;;  %v2293_v58 = vld [vmem:[%s6583_s25 + $0x1a0] sm:$0xff] }
 0x26e   : > { %4960 = vmatpush3.msra.mxu0 %v2254_v59  ;;  %v2241_v59 = vld [vmem:[%s6583_s25] sm:$0xff] }
 0x26f   : > { %4961 = vmatprep.subr.mxu0 %v2269_v60  ;;  %v2277_v60 = vld [vmem:[%s6583_s25 + $0x120] sm:$0xff] }
 0x270   : > { %4962 = vmatpush3.msra.mxu0 %v2253_v61  ;;  %v2292_v61 = vld [vmem:[%s6583_s25 + $0x198] sm:$0xff] }
 0x271   : > { %4963 = vmatprep.subr.mxu0 %v2268_v62  ;;  %v2276_v62 = vld [vmem:[%s6583_s25 + $0x118] sm:$0xff] }
 0x272   : > { %4964 = vmatpush3.msra.mxu0 %v2252_v63  ;;  %v2291_v63 = vld [vmem:[%s6583_s25 + $0x190] sm:$0xff] }
 0x273   : > { %4965 = vmatprep.subr.mxu0 %v2267_v1  ;;  %v2275_v1 = vld [vmem:[%s6583_s25 + $0x110] sm:$0xff] }
 0x274   : > { %4966 = vmatpush3.msra.mxu0 %v2251_v2  ;;  %v2290_v2 = vld [vmem:[%s6583_s25 + $0x188] sm:$0xff] }
 0x275   : > { %4967 = vmatprep.subr.mxu0 %v2266_v3  ;;  %v2274_v3 = vld [vmem:[%s6583_s25 + $0x108] sm:$0xff] }
 0x276   : > { %4968 = vmatpush3.msra.mxu0 %v2250_v4  ;;  %v2289_v4 = vld [vmem:[%s6583_s25 + $0x180] sm:$0xff] }
 0x277   : > { %4969 = vmatprep.subr.mxu0 %v2265_v6  ;;  %v2273_v6 = vld [vmem:[%s6583_s25 + $0x100] sm:$0xff] }
 0x278   : > { %4970 = vmatpush3.msra.mxu0 %v2249_v7 }
 0x279   : > { %4971 = vmatprep.subr.mxu0 %v2264_v8 }
 0x27a   : > { %4972 = vmatpush3.msra.mxu0 %v2248_v9 }
 0x27b   : > { %4973 = vmatprep.subr.mxu0 %v2263_v10 }
 0x27c   : > { %v1540_v15 = vpop.f32.mrf.mxu0  ;;  %4974 = vmatpush3.msra.mxu0 %v2247_v11 }
 0x27d   : > { %5168 = vmatpush3.msra.mxu1 %v1540_v15  ;;  %4975 = vmatprep.subr.mxu0 %v2262_v12  ;;  %v2260_v15 = vld [vmem:[%s6583_s25 + $0x98] sm:$0xff] }
 0x27e   : > { %5177 = vmatprep.subr.mxu1 %v6109_v5  ;;  %v6848_v16 = vpop.f32.mrf.mxu0  ;;  %4976 = vmatpush3.msra.mxu0 %v2246_v13 }
 0x27f   : > { %4977 = vmatprep.subr.mxu0 %v2261_v0 }
 0x280   : > { %4978 = vmatpush3.msra.mxu0 %v2245_v14  ;;  %v2531_v14 = vld [vmem:[%s6589_s19 + $0x1e8] sm:$0xff] }
 0x281   : > { %4979 = vmatprep.subr.mxu0 %v2260_v15  ;;  %v2530_v15 = vld [vmem:[%s6589_s19 + $0x1e0] sm:$0xff] }
 0x31d   : > { %v1682_v18 = vpop.f32.mrf.mxu0 }
 0x31e   : > { %v1683_v19 = vadd.f32 %v1682_v18, %v995_v17 }
 0x31f   : > { %v5166_v20 = vpop.f32.mrf.mxu0 }
 0x320   : > { %v1687_v21 = vsel %vm1686_vm1, %v1683_v19, -inf }
 0x321   : > { %1688 = vmax.xlane.f32.xlu0 %v1687_v21  ;;  %v1838_v22 = vpop.f32.mrf.mxu0 }
 0x322   : > { %v1839_v23 = vadd.f32 %v1838_v22, %v995_v17 }
 0x323   : > { %v5176_v24 = vpop.f32.mrf.mxu0 }
 0x324   : > { %v1842_v25 = vsel %vm1686_vm1, %v1839_v23, -inf }
 0x325   : > { %1843 = vmax.xlane.f32.xlu0 %v1842_v25  ;;  %v1993_v26 = vpop.f32.mrf.mxu0  ;;  %v1611_v25 = vpop.f32.mrf.mxu1 }
 0x326   : > { %v1994_v27 = vadd.f32 %v1993_v26, %v995_v17 }
 0x327   : > { %v5186_v28 = vpop.f32.mrf.mxu0 }
 0x328   : > { %v1997_v29 = vsel %vm1686_vm1, %v1994_v27, -inf }
 0x329   : > { %1998 = vmax.xlane.f32.xlu1 %v1997_v29  ;;  %v2148_v30 = vpop.f32.mrf.mxu0  ;;  %v2304_v29 = vld [vmem:[%s6583_s25 + $0x1f8] sm:$0xff] }
 0x32a   : > { %v2149_v31 = vadd.f32 %v2148_v30, %v995_v17  ;;  %v2244_v17 = vld [vmem:[%s6583_s25 + $0x18] sm:$0xff] }
 0x32b   : > { %v5196_v32 = vpop.f32.mrf.mxu0  ;;  %4980 = vmatpush3.msra.mxu0 %v2244_v17  ;;  %v2533_v17 = vld [vmem:[%s6589_s19 + $0x1f8] sm:$0xff] }
 0x32c   : > { %v2152_v33 = vsel %vm1686_vm1, %v2149_v31, -inf  ;;  %v2288_v32 = vld [vmem:[%s6583_s25 + $0x178] sm:$0xff] }
 0x32d   : > { %2153 = vmax.xlane.f32.xlu1 %v2152_v33  ;;  %v2303_v33 = vld [vmem:[%s6583_s25 + $0x1f0] sm:$0xff] }
 0x3aa   : > { %v1689_v34 = vpop.xlane.xlu0 %1688 }
 0x3ab   : > { %v1690_v35 = vsub.f32 %v1683_v19, %v1689_v34  ;;  %v2287_v34 = vld [vmem:[%s6583_s25 + $0x170] sm:$0xff] }
 0x3ad   : > { %v1691_v36 = vmul.f32 1.442695, %v1690_v35  ;;  %v2302_v35 = vld [vmem:[%s6583_s25 + $0x1e8] sm:$0xff] }
 0x3ae   : > { %v1844_v37 = vpop.xlane.xlu0 %1843 }
 0x3af   : > { %5504 = vpow2.f32 %v1691_v36  ;;  %v1845_v38 = vsub.f32 %v1839_v23, %v1844_v37  ;;  %v2286_v36 = vld [vmem:[%s6583_s25 + $0x168] sm:$0xff]  ;;  %v2301_v37 = vld [vmem:[%s6583_s25 + $0x1e0] sm:$0xff] }
 0x3b1   : > { %v1846_v39 = vmul.f32 1.442695, %v1845_v38  ;;  %v2285_v38 = vld [vmem:[%s6583_s25 + $0x160] sm:$0xff] }
 0x3b2   : > { %v1999_v40 = vpop.xlane.xlu1 %1998 }
 0x3b3   : > { %5506 = vpow2.f32 %v1846_v39  ;;  %v2000_v41 = vsub.f32 %v1994_v27, %v1999_v40  ;;  %v2300_v39 = vld [vmem:[%s6583_s25 + $0x1d8] sm:$0xff] }
 0x3b4   : > { %v2284_v40 = vld [vmem:[%s6583_s25 + $0x158] sm:$0xff] }
 0x3b5   : > { %v2001_v42 = vmul.f32 1.442695, %v2000_v41  ;;  %v2299_v41 = vld [vmem:[%s6583_s25 + $0x1d0] sm:$0xff] }
 0x3b6   : > { %v2154_v43 = vpop.xlane.xlu1 %2153 }
 0x3b7   : > { %5508 = vpow2.f32 %v2001_v42  ;;  %v2155_v44 = vsub.f32 %v2149_v31, %v2154_v43  ;;  %v2283_v42 = vld [vmem:[%s6583_s25 + $0x150] sm:$0xff]  ;;  %v2298_v43 = vld [vmem:[%s6583_s25 + $0x1c8] sm:$0xff] }
 0x3b9   : > { %v2156_v45 = vmul.f32 1.442695, %v2155_v44  ;;  %v2282_v44 = vld [vmem:[%s6583_s25 + $0x148] sm:$0xff] }
 0x3bb   : > { %5510 = vpow2.f32 %v2156_v45  ;;  %v2297_v45 = vld [vmem:[%s6583_s25 + $0x1c0] sm:$0xff] }
 0x3bc   : > { %v6856_v46 = vpop.eup %5504 }
 0x3bd   : > { %v1693_v47 = vsel %vm1686_vm1, %v6856_v46, 0.0 }
 0x3be   : > { %1694 = vadd.xlane.f32.xlu0 %v1693_v47  ;;  %v2296_v47 = vld [vmem:[%s6583_s25 + $0x1b8] sm:$0xff] }
 0x3c0   : > { %v6860_v48 = vpop.eup %5506 }
 0x3c1   : > { %v1848_v49 = vsel %vm1686_vm1, %v6860_v48, 0.0 }
 0x3c2   : > { %1849 = vadd.xlane.f32.xlu1 %v1848_v49  ;;  %v2259_v49 = vld [vmem:[%s6583_s25 + $0x90] sm:$0xff] }
 0x3c3   : > { %4981 = vmatprep.subr.mxu0 %v2259_v49  ;;  %v2506_v49 = vld [vmem:[%s6589_s19 + $0x120] sm:$0xff] }
 0x3c4   : > { %v6864_v50 = vpop.eup %5508 }
 0x3c5   : > { %v2003_v51 = vsel %vm1686_vm1, %v6864_v50, 0.0 }
 0x3c6   : > { %2004 = vadd.xlane.f32.xlu0 %v2003_v51  ;;  %v2243_v51 = vld [vmem:[%s6583_s25 + $0x10] sm:$0xff] }
 0x3c7   : > { %4982 = vmatpush3.msra.mxu0 %v2243_v51  ;;  %v2503_v51 = vld [vmem:[%s6589_s19 + $0x108] sm:$0xff] }
 0x3c8   : > { %v6868_v52 = vpop.eup %5510 }
 0x3c9   : > { %v2158_v53 = vsel %vm1686_vm1, %v6868_v52, 0.0 }
 0x3ca   : > { %2159 = vadd.xlane.f32.xlu1 %v2158_v53  ;;  %v2258_v53 = vld [vmem:[%s6583_s25 + $0x88] sm:$0xff] }
 0x3cb   : > { %4983 = vmatprep.subr.mxu0 %v2258_v53  ;;  %v2502_v53 = vld [vmem:[%s6589_s19 + $0x100] sm:$0xff] }
 0x3cc   : > { %4984 = vmatpush3.msra.mxu0 %v2242_v55  ;;  %v2499_v55 = vld [vmem:[%s6589_s19 + $0xe8] sm:$0xff] }
 0x3cd   : > { %4985 = vmatprep.subr.mxu0 %v2257_v57  ;;  %v2498_v57 = vld [vmem:[%s6589_s19 + $0xe0] sm:$0xff] }
 0x3ce   : > { %4986 = vmatpush3.msra.mxu0 %v2241_v59  ;;  %v2495_v59 = vld [vmem:[%s6589_s19 + $0xc8] sm:$0xff] }
 0x3cf   : > { %2534 = vmatprep.subr.mxu0 %v2531_v14  ;;  %v2478_v14 = vld [vmem:[%s6589_s19 + $0x40] sm:$0xff] }
 0x447   : > { %v1695_v18 = vpop.xlane.xlu0 %1694 }
 0x448   : > { %5512 = vrcp.f32 %v1695_v18  ;;  %v2527_v18 = vld [vmem:[%s6589_s19 + $0x1c8] sm:$0xff] }
 0x44b   : > { %v1850_v19 = vpop.xlane.xlu1 %1849 }
 0x44c   : > { %5514 = vrcp.f32 %v1850_v19  ;;  %v2532_v19 = vld [vmem:[%s6589_s19 + $0x1f0] sm:$0xff] }
 0x44f   : > { %v2005_v20 = vpop.xlane.xlu0 %2004 }
 0x450   : > { %5516 = vrcp.f32 %v2005_v20  ;;  %v2526_v20 = vld [vmem:[%s6589_s19 + $0x1c0] sm:$0xff] }
 0x453   : > { %v2160_v21 = vpop.xlane.xlu1 %2159 }
 0x454   : > { %5518 = vrcp.f32 %v2160_v21  ;;  %v2529_v21 = vld [vmem:[%s6589_s19 + $0x1d8] sm:$0xff] }
 0x455   : > { %v5513_v22 = vpop.eup %5512 }
 0x456   : > { %v1697_v23 = vmul.f32 %v5513_v22, %v6856_v46  ;;  %v2281_v46 = vld [vmem:[%s6583_s25 + $0x140] sm:$0xff]  ;;  %v2523_v22 = vld [vmem:[%s6589_s19 + $0x1a8] sm:$0xff] }
 0x458   : > { %5170 = vmatmul.mubr.msk.f32.vlgmr.msra.gmra.mxu1 %vm1686_vm1, %v1697_v23  ;;  %v2528_v23 = vld [vmem:[%s6589_s19 + $0x1d0] sm:$0xff] }
 0x459   : > { %v5515_v24 = vpop.eup %5514  ;;  %5178 = vmatpush3.msra.mxu1 %v6848_v16  ;;  %5179 = vmatprep.mubr.msk.f32.mxu1 %vm6110_vm0, %v6109_v5  ;;  %v1613_v16 = vpop.f32.mrf.mxu1 }
 0x45a   : > { %v1852_v26 = vmul.f32 %v5515_v24, %v6860_v48  ;;  %5187 = vmatprep.subr.mxu1 %v6109_v5  ;;  %v2280_v48 = vld [vmem:[%s6583_s25 + $0x138] sm:$0xff] }
 0x45c   : > { %5180 = vmatmul.mubr.msk.f32.vlgmr.msra.gmra.mxu1 %vm1686_vm1, %v1852_v26 }
 0x45d   : > { %v5517_v27 = vpop.eup %5516  ;;  %5188 = vmatpush3.msra.mxu1 %v1611_v25  ;;  %5189 = vmatprep.mubr.msk.f32.mxu1 %vm6110_vm0, %v6109_v5 }
 0x45e   : > { %5197 = vmatprep.subr.mxu1 %v6109_v5  ;;  %v2007_v28 = vmul.f32 %v5517_v27, %v6864_v50  ;;  %v2295_v50 = vld [vmem:[%s6583_s25 + $0x1b0] sm:$0xff] }
 0x460   : > { %5190 = vmatmul.mubr.msk.f32.vlgmr.msra.gmra.mxu1 %vm1686_vm1, %v2007_v28  ;;  %v5542_v28 = vld [vmem:[#allocation2] sm:$0xff] }
 0x461   : > { %v5519_v30 = vpop.eup %5518  ;;  %5198 = vmatpush3.msra.mxu1 %v1613_v16  ;;  %5199 = vmatprep.mubr.msk.f32.mxu1 %vm6110_vm0, %v6109_v5 }
 0x462   : > { %v2162_v31 = vmul.f32 %v5519_v30, %v6868_v52  ;;  %4990 = vmatprep.subr.mxu1 %v2304_v29  ;;  %v2279_v52 = vld [vmem:[%s6583_s25 + $0x130] sm:$0xff] }
 0x464   : > { %5200 = vmatmul.mubr.msk.f32.vlgmr.msra.gmra.mxu1 %vm1686_vm1, %v2162_v31 }
 0x465   : > { %4991 = vmatpush3.msra.mxu1 %v2288_v32 }
 0x466   : > { %4992 = vmatprep.subr.mxu1 %v2303_v33  ;;  %v2522_v33 = vld [vmem:[%s6589_s19 + $0x1a0] sm:$0xff] }
 0x467   : > { %4993 = vmatpush3.msra.mxu1 %v2287_v34  ;;  %v2525_v34 = vld [vmem:[%s6589_s19 + $0x1b8] sm:$0xff] }
 0x468   : > { %4994 = vmatprep.subr.mxu1 %v2302_v35  ;;  %v2519_v35 = vld [vmem:[%s6589_s19 + $0x188] sm:$0xff] }
 0x469   : > { %4995 = vmatpush3.msra.mxu1 %v2286_v36  ;;  %v2524_v36 = vld [vmem:[%s6589_s19 + $0x1b0] sm:$0xff] }
 0x46a   : > { %4996 = vmatprep.subr.mxu1 %v2301_v37  ;;  %v2518_v37 = vld [vmem:[%s6589_s19 + $0x180] sm:$0xff] }
 0x46b   : > { %4997 = vmatpush3.msra.mxu1 %v2285_v38  ;;  %v2521_v38 = vld [vmem:[%s6589_s19 + $0x198] sm:$0xff] }
 0x46c   : > { %4998 = vmatprep.subr.mxu1 %v2300_v39  ;;  %v2515_v39 = vld [vmem:[%s6589_s19 + $0x168] sm:$0xff] }
 0x46d   : > { %4999 = vmatpush3.msra.mxu1 %v2284_v40  ;;  %v2520_v40 = vld [vmem:[%s6589_s19 + $0x190] sm:$0xff] }
 0x46e   : > { %5000 = vmatprep.subr.mxu1 %v2299_v41  ;;  %v2514_v41 = vld [vmem:[%s6589_s19 + $0x160] sm:$0xff] }
 0x46f   : > { %5001 = vmatpush3.msra.mxu1 %v2283_v42  ;;  %v2517_v42 = vld [vmem:[%s6589_s19 + $0x178] sm:$0xff] }
 0x470   : > { %5002 = vmatprep.subr.mxu1 %v2298_v43  ;;  %v2511_v43 = vld [vmem:[%s6589_s19 + $0x148] sm:$0xff] }
 0x471   : > { %5003 = vmatpush3.msra.mxu1 %v2282_v44  ;;  %v2516_v44 = vld [vmem:[%s6589_s19 + $0x170] sm:$0xff] }
 0x472   : > { %5004 = vmatprep.subr.mxu1 %v2297_v45  ;;  %v2510_v45 = vld [vmem:[%s6589_s19 + $0x140] sm:$0xff] }
 0x473   : > { %5005 = vmatpush3.msra.mxu1 %v2281_v46  ;;  %v2513_v46 = vld [vmem:[%s6589_s19 + $0x158] sm:$0xff] }
 0x474   : > { %5006 = vmatprep.subr.mxu1 %v2296_v47  ;;  %v2507_v47 = vld [vmem:[%s6589_s19 + $0x128] sm:$0xff] }
 0x475   : > { %5007 = vmatpush3.msra.mxu1 %v2280_v48  ;;  %v2512_v48 = vld [vmem:[%s6589_s19 + $0x150] sm:$0xff] }
 0x476   : > { %5008 = vmatprep.subr.mxu1 %v2295_v50  ;;  %v2509_v50 = vld [vmem:[%s6589_s19 + $0x138] sm:$0xff] }
 0x477   : > { %5009 = vmatpush3.msra.mxu1 %v2279_v52  ;;  %v2508_v52 = vld [vmem:[%s6589_s19 + $0x130] sm:$0xff] }
 0x478   : > { %5010 = vmatprep.subr.mxu1 %v2294_v54  ;;  %v2505_v54 = vld [vmem:[%s6589_s19 + $0x118] sm:$0xff] }
 0x479   : > { %5011 = vmatpush3.msra.mxu1 %v2278_v56  ;;  %v2504_v56 = vld [vmem:[%s6589_s19 + $0x110] sm:$0xff] }
 0x47a   : > { %5012 = vmatprep.subr.mxu1 %v2293_v58  ;;  %v2501_v58 = vld [vmem:[%s6589_s19 + $0xf8] sm:$0xff] }
 0x47b   : > { %5013 = vmatpush3.msra.mxu1 %v2277_v60  ;;  %v2500_v60 = vld [vmem:[%s6589_s19 + $0xf0] sm:$0xff] }
 0x47c   : > { %5014 = vmatprep.subr.mxu1 %v2292_v61  ;;  %v2494_v61 = vld [vmem:[%s6589_s19 + $0xc0] sm:$0xff] }
 0x47d   : > { %5015 = vmatpush3.msra.mxu1 %v2276_v62  ;;  %v2497_v62 = vld [vmem:[%s6589_s19 + $0xd8] sm:$0xff] }
 0x47e   : > { %5016 = vmatprep.subr.mxu1 %v2291_v63  ;;  %v2491_v63 = vld [vmem:[%s6589_s19 + $0xa8] sm:$0xff] }
 0x47f   : > { %5017 = vmatpush3.msra.mxu1 %v2275_v1  ;;  %v2496_v1 = vld [vmem:[%s6589_s19 + $0xd0] sm:$0xff] }
 0x480   : > { %5018 = vmatprep.subr.mxu1 %v2290_v2  ;;  %v2490_v2 = vld [vmem:[%s6589_s19 + $0xa0] sm:$0xff] }
 0x481   : > { %5019 = vmatpush3.msra.mxu1 %v2274_v3  ;;  %v2493_v3 = vld [vmem:[%s6589_s19 + $0xb8] sm:$0xff] }
 0x482   : > { %5020 = vmatprep.subr.mxu1 %v2289_v4  ;;  %v2487_v4 = vld [vmem:[%s6589_s19 + $0x88] sm:$0xff] }
 0x483   : > { %5021 = vmatpush3.msra.mxu1 %v2273_v6  ;;  %v2492_v6 = vld [vmem:[%s6589_s19 + $0xb0] sm:$0xff] }
 0x484   : > { %2605 = vmatprep.subr.mxu1 %v2533_v17  ;;  %v2475_v17 = vld [vmem:[%s6589_s19 + $0x28] sm:$0xff] }
 0x518   : > { %v1767_v7 = vpop.f32.mrf.mxu1 }
 0x51a   : > { %v5171_v8 = vpop.f32.mrf.mxu1 }
 0x51b   : > { %v2489_v8 = vld [vmem:[%s6589_s19 + $0x98] sm:$0xff] }
 0x51c   : > { %v1922_v9 = vpop.f32.mrf.mxu1 }
 0x51d   : > { %2369 = vmatprep.mubr.f32.mxu0 %v1922_v9  ;;  %v2483_v9 = vld [vmem:[%s6589_s19 + $0x68] sm:$0xff] }
 0x51e   : > { %v5181_v10 = vpop.f32.mrf.mxu1  ;;  %2370 = vmatmul.mubr.f32.vlgmr.msra.gmra.mxu0 %v1767_v7  ;;  %v2486_v7 = vld [vmem:[%s6589_s19 + $0x80] sm:$0xff] }
 0x51f   : > { %2598 = vmatprep.mubr.f32.mxu0 %v6109_v5  ;;  %2535 = vmatpush1.msra.mxu0 %v2530_v15  ;;  %v2488_v10 = vld [vmem:[%s6589_s19 + $0x90] sm:$0xff]  ;;  %v2481_v15 = vld [vmem:[%s6589_s19 + $0x58] sm:$0xff] }
 0x520   : > { %v2077_v11 = vpop.f32.mrf.mxu1  ;;  %2536 = vmatprep.subr.mxu0 %v2527_v18  ;;  %v2480_v18 = vld [vmem:[%s6589_s19 + $0x50] sm:$0xff] }
 0x521   : > { %2537 = vmatpush1.msra.mxu0 %v2526_v20  ;;  %v2477_v20 = vld [vmem:[%s6589_s19 + $0x38] sm:$0xff] }
 0x522   : > { %v5191_v12 = vpop.f32.mrf.mxu1  ;;  %2538 = vmatprep.subr.mxu0 %v2523_v22  ;;  %v2476_v22 = vld [vmem:[%s6589_s19 + $0x30] sm:$0xff] }
 0x523   : > { %2539 = vmatpush1.msra.mxu0 %v2522_v33  ;;  %v2485_v12 = vld [vmem:[%s6589_s19 + $0x78] sm:$0xff] }
 0x524   : > { %v2232_v13 = vpop.f32.mrf.mxu1  ;;  %2540 = vmatprep.subr.mxu0 %v2519_v35  ;;  %v2458_v35 = vlaneseq }
 0x525   : > { %2439 = vmatprep.mubr.f32.mxu1 %v2232_v13  ;;  %2541 = vmatpush1.msra.mxu0 %v2518_v37  ;;  %v2479_v13 = vld [vmem:[%s6589_s19 + $0x48] sm:$0xff] }
 0x526   : > { %v5201_v0 = vpop.f32.mrf.mxu1  ;;  %2440 = vmatmul.mubr.f32.vlgmr.msra.gmra.mxu1 %v2077_v11  ;;  %2542 = vmatprep.subr.mxu0 %v2515_v39  ;;  %v2482_v11 = vld [vmem:[%s6589_s19 + $0x60] sm:$0xff] }
 0x527   : > { %2669 = vmatprep.mubr.f32.mxu1 %v6109_v5  ;;  %2606 = vmatpush1.msra.mxu1 %v2532_v19  ;;  %v2484_v0 = vld [vmem:[%s6589_s19 + $0x70] sm:$0xff]  ;;  %v2474_v19 = vld [vmem:[%s6589_s19 + $0x20] sm:$0xff] }
 0x528   : > { %2607 = vmatprep.subr.mxu1 %v2529_v21  ;;  %2543 = vmatpush1.msra.mxu0 %v2514_v41  ;;  %v2471_v21 = vld [vmem:[%s6589_s19 + $0x8] sm:$0xff] }
 0x529   : > { %2608 = vmatpush1.msra.mxu1 %v2528_v23  ;;  %2544 = vmatprep.subr.mxu0 %v2511_v43  ;;  %v2470_v23 = vld [vmem:[%s6589_s19] sm:$0xff] }
 0x52a   : > { %2609 = vmatprep.subr.mxu1 %v2525_v34  ;;  %2545 = vmatpush1.msra.mxu0 %v2510_v45 }
 0x52b   : > { %2610 = vmatpush1.msra.mxu1 %v2524_v36  ;;  %2546 = vmatprep.subr.mxu0 %v2507_v47  ;;  %v7026_v36 = vshrl.u32 %v2458_v35, 7  ;;  %v4855_v47 = vld [vmem:[%s6589_s19 + $0x3e0] sm:$0xff] }
 0x52c   : > { %2611 = vmatprep.subr.mxu1 %v2521_v38  ;;  %2547 = vmatpush1.msra.mxu0 %v2506_v49  ;;  %v994_v38 = vld [vmem:[%s6600_s12] sm:$0xff] }
 0x52d   : > { %2612 = vmatpush1.msra.mxu1 %v2520_v40  ;;  %2548 = vmatprep.subr.mxu0 %v2503_v51  ;;  %v2460_v37 = vsub.s32 0, %v7026_v36  ;;  %v2465_v39 = vsub.s32 1, %v7026_v36  ;;  %v4852_v49 = vld [vmem:[%s6589_s19 + $0x3c8] sm:$0xff]  ;;  %v4853_v51 = vld [vmem:[%s6589_s19 + $0x3d0] sm:$0xff]  ;;  %v4803_v35 = vld [vmem:[%s6589_s19 + $0x240] sm:$0xff] }
 0x52e   : > { %2613 = vmatprep.subr.mxu1 %v2517_v42  ;;  %2549 = vmatpush1.msra.mxu0 %v2502_v53  ;;  %v4850_v53 = vld [vmem:[%s6589_s19 + $0x3b8] sm:$0xff] }
 0x52f   : > { %2614 = vmatpush1.msra.mxu1 %v2516_v44  ;;  %2550 = vmatprep.subr.mxu0 %v2499_v55  ;;  %v2461_v41 = vrot.slane %v994_v38, %v2460_v37  ;;  %v2466_v44 = vrot.slane %v994_v38, %v2465_v39  ;;  %v4849_v55 = vld [vmem:[%s6589_s19 + $0x3b0] sm:$0xff]  ;;  %v4806_v37 = vld [vmem:[%s6589_s19 + $0x258] sm:$0xff]  ;;  %v4800_v38 = vld [vmem:[%s6589_s19 + $0x228] sm:$0xff] }
 0x530   : > { %2615 = vmatprep.subr.mxu1 %v2513_v46  ;;  %2551 = vmatpush1.msra.mxu0 %v2498_v57  ;;  %v4846_v57 = vld [vmem:[%s6589_s19 + $0x398] sm:$0xff]  ;;  %v4805_v39 = vld [vmem:[%s6589_s19 + $0x250] sm:$0xff] }
 0x531   : > { %2616 = vmatpush1.msra.mxu1 %v2512_v48  ;;  %2552 = vmatprep.subr.mxu0 %v2495_v59  ;;  %v4857_v48 = vld [vmem:[%s6589_s19 + $0x3f0] sm:$0xff] }
 0x532   : > { %2617 = vmatprep.subr.mxu1 %v2509_v50  ;;  %2553 = vmatpush1.msra.mxu0 %v2494_v61  ;;  %v4854_v50 = vld [vmem:[%s6589_s19 + $0x3d8] sm:$0xff]  ;;  %v4845_v59 = vld [vmem:[%s6589_s19 + $0x390] sm:$0xff] }
 0x533   : > { %2618 = vmatpush1.msra.mxu1 %v2508_v52  ;;  %2554 = vmatprep.subr.mxu0 %v2491_v63  ;;  %v4848_v52 = vld [vmem:[%s6589_s19 + $0x3a8] sm:$0xff]  ;;  %v4842_v61 = vld [vmem:[%s6589_s19 + $0x378] sm:$0xff]  ;;  %v4841_v63 = vld [vmem:[%s6589_s19 + $0x370] sm:$0xff] }
 0x534   : > { %2619 = vmatprep.subr.mxu1 %v2505_v54  ;;  %2555 = vmatpush1.msra.mxu0 %v2490_v2  ;;  %v4847_v54 = vld [vmem:[%s6589_s19 + $0x3a0] sm:$0xff]  ;;  %v4838_v2 = vld [vmem:[%s6589_s19 + $0x358] sm:$0xff] }
 0x535   : > { %2620 = vmatpush1.msra.mxu1 %v2504_v56  ;;  %2556 = vmatprep.subr.mxu0 %v2487_v4  ;;  %v4844_v56 = vld [vmem:[%s6589_s19 + $0x388] sm:$0xff]  ;;  %v4837_v4 = vld [vmem:[%s6589_s19 + $0x350] sm:$0xff] }
 0x536   : > { %2621 = vmatprep.subr.mxu1 %v2501_v58  ;;  %2557 = vmatpush1.msra.mxu0 %v2486_v7  ;;  %v4843_v58 = vld [vmem:[%s6589_s19 + $0x380] sm:$0xff]  ;;  %v4834_v7 = vld [vmem:[%s6589_s19 + $0x338] sm:$0xff] }
 0x537   : > { %2622 = vmatpush1.msra.mxu1 %v2500_v60  ;;  %2558 = vmatprep.subr.mxu0 %v2483_v9  ;;  %v4840_v60 = vld [vmem:[%s6589_s19 + $0x368] sm:$0xff]  ;;  %v4833_v9 = vld [vmem:[%s6589_s19 + $0x330] sm:$0xff] }
 0x538   : > { %2623 = vmatprep.subr.mxu1 %v2497_v62  ;;  %2559 = vmatpush1.msra.mxu0 %v2482_v11  ;;  %v4839_v62 = vld [vmem:[%s6589_s19 + $0x360] sm:$0xff]  ;;  %v4830_v11 = vld [vmem:[%s6589_s19 + $0x318] sm:$0xff] }
 0x539   : > { %2624 = vmatpush1.msra.mxu1 %v2496_v1  ;;  %2560 = vmatprep.subr.mxu0 %v2479_v13  ;;  %v4836_v1 = vld [vmem:[%s6589_s19 + $0x348] sm:$0xff]  ;;  %v4829_v13 = vld [vmem:[%s6589_s19 + $0x310] sm:$0xff] }
 0x53a   : > { %2625 = vmatprep.subr.mxu1 %v2493_v3  ;;  %2561 = vmatpush1.msra.mxu0 %v2478_v14  ;;  %v4835_v3 = vld [vmem:[%s6589_s19 + $0x340] sm:$0xff]  ;;  %v4826_v14 = vld [vmem:[%s6589_s19 + $0x2f8] sm:$0xff] }
 0x53b   : > { %2626 = vmatpush1.msra.mxu1 %v2492_v6  ;;  %2562 = vmatprep.subr.mxu0 %v2475_v17  ;;  %v4832_v6 = vld [vmem:[%s6589_s19 + $0x328] sm:$0xff]  ;;  %v4825_v17 = vld [vmem:[%s6589_s19 + $0x2f0] sm:$0xff] }
 0x53c   : > { %2627 = vmatprep.subr.mxu1 %v2489_v8  ;;  %2563 = vmatpush1.msra.mxu0 %v2474_v19  ;;  %v4831_v8 = vld [vmem:[%s6589_s19 + $0x320] sm:$0xff]  ;;  %v4822_v19 = vld [vmem:[%s6589_s19 + $0x2d8] sm:$0xff] }
 0x53d   : > { %2628 = vmatpush1.msra.mxu1 %v2488_v10  ;;  %2564 = vmatprep.subr.mxu0 %v2471_v21  ;;  %v4828_v10 = vld [vmem:[%s6589_s19 + $0x308] sm:$0xff]  ;;  %v4821_v21 = vld [vmem:[%s6589_s19 + $0x2d0] sm:$0xff] }
 0x53e   : > { %2629 = vmatprep.subr.mxu1 %v2485_v12  ;;  %2565 = vmatpush1.msra.mxu0 %v2470_v23  ;;  %v4827_v12 = vld [vmem:[%s6589_s19 + $0x300] sm:$0xff]  ;;  %v4818_v23 = vld [vmem:[%s6589_s19 + $0x2b8] sm:$0xff] }
 0x53f   : > { %2630 = vmatpush1.msra.mxu1 %v2484_v0  ;;  %v4824_v0 = vld [vmem:[%s6589_s19 + $0x2e8] sm:$0xff] }
 0x540   : > { %2631 = vmatprep.subr.mxu1 %v2481_v15  ;;  %v4823_v15 = vld [vmem:[%s6589_s19 + $0x2e0] sm:$0xff] }
 0x541   : > { %2632 = vmatpush1.msra.mxu1 %v2480_v18  ;;  %v4820_v18 = vld [vmem:[%s6589_s19 + $0x2c8] sm:$0xff] }
 0x542   : > { %2633 = vmatprep.subr.mxu1 %v2477_v20  ;;  %v4819_v20 = vld [vmem:[%s6589_s19 + $0x2c0] sm:$0xff] }
 0x543   : > { %2634 = vmatpush1.msra.mxu1 %v2476_v22  ;;  %v4816_v22 = vld [vmem:[%s6589_s19 + $0x2a8] sm:$0xff] }
 0x5de   : > { %v4987_v24 = vpop.f32.mrf.mxu0 }
 0x5e0   : > { %v4988_v25 = vpop.f32.mrf.mxu0 }
 0x5e1   : > { %v4989_v26 = vadd.f32 %v4988_v25, %v4987_v24  ;;  %v2473_v24 = vld [vmem:[%s6589_s19 + $0x18] sm:$0xff]  ;;  %v2472_v25 = vld [vmem:[%s6589_s19 + $0x10] sm:$0xff] }
 0x5e2   : > { %2635 = vmatprep.subr.mxu1 %v2473_v24  ;;  %v4815_v24 = vld [vmem:[%s6589_s19 + $0x2a0] sm:$0xff] }
 0x5e3   : > { %v2372_v29 = vadd.f32 %v5542_v28, %v4989_v26  ;;  %v4856_v26 = vld [vmem:[%s6589_s19 + $0x3e8] sm:$0xff]  ;;  %2636 = vmatpush1.msra.mxu1 %v2472_v25  ;;  %v4817_v25 = vld [vmem:[%s6589_s19 + $0x2b0] sm:$0xff] }
 0x5e4   : > { %2741 = vmatprep.subr.mxu0 %v4856_v26  ;;  %v4812_v26 = vld [vmem:[%s6589_s19 + $0x288] sm:$0xff] }
 0x5e6   : > { %v5022_v27 = vpop.f32.mrf.mxu1 }
 0x5e8   : > { %v5023_v16 = vpop.f32.mrf.mxu1 }
 0x5e9   : > { %v5024_v30 = vadd.f32 %v5023_v16, %v5022_v27  ;;  %v4858_v27 = vld [vmem:[%s6589_s19 + $0x3f8] sm:$0xff] }
 0x5ea   : > { %2812 = vmatprep.subr.mxu1 %v4858_v27  ;;  %v4814_v27 = vld [vmem:[%s6589_s19 + $0x298] sm:$0xff] }
 0x5eb   : > { %v6964_v31 = vadd.f32 %v5024_v30, %v2372_v29 }
 0x5ed   : > { %2445 = vadd.xlane.f32.xlu0 %v6964_v31  ;;  %v2448_v32 = vmul.f32 %v6964_v31, %v6964_v31 }
 0x5ef   : > { %2449 = vadd.xlane.f32.xlu1 %v2448_v32 }
 0x676   : > { %v2446_v16 = vpop.xlane.xlu0 %2445 }
 0x677   : > { %v2447_v28 = vmul.f32 0.03125, %v2446_v16  ;;  %v4811_v16 = vld [vmem:[%s6589_s19 + $0x280] sm:$0xff] }
 0x678   : > { %v2450_v29 = vpop.xlane.xlu1 %2449 }
 0x679   : > { %v2452_v30 = vmul.f32 %v2447_v28, %v2447_v28  ;;  %v2451_v32 = vmul.f32 0.03125, %v2450_v29  ;;  %v2454_v40 = vsub.f32 %v6964_v31, %v2447_v28  ;;  %v4851_v31 = vld [vmem:[%s6589_s19 + $0x3c0] sm:$0xff]  ;;  %v4813_v28 = vld [vmem:[%s6589_s19 + $0x290] sm:$0xff]  ;;  %v4808_v29 = vld [vmem:[%s6589_s19 + $0x268] sm:$0xff] }
 0x67b   : > { %v2453_v33 = vsub.f32 %v2451_v32, %v2452_v30  ;;  %v4810_v30 = vld [vmem:[%s6589_s19 + $0x278] sm:$0xff]  ;;  %v4807_v32 = vld [vmem:[%s6589_s19 + $0x260] sm:$0xff] }
 0x67d   : > { %v2455_v34 = vadd.f32 1e-05, %v2453_v33  ;;  %v4804_v33 = vld [vmem:[%s6589_s19 + $0x248] sm:$0xff] }
 0x67f   : > { %5520 = vrsqrt.f32 %v2455_v34  ;;  %v4809_v34 = vld [vmem:[%s6589_s19 + $0x270] sm:$0xff] }
 0x68c   : > { %v5521_v42 = vpop.eup %5520 }
 0x68d   : > { %v2457_v43 = vmul.f32 %v5521_v42, %v2454_v40  ;;  %v4799_v40 = vld [vmem:[%s6589_s19 + $0x220] sm:$0xff]  ;;  %v4796_v42 = vld [vmem:[%s6589_s19 + $0x208] sm:$0xff] }
 0x68f   : > { %v2462_v45 = vmul.f32 %v2461_v41, %v2457_v43  ;;  %v4802_v41 = vld [vmem:[%s6589_s19 + $0x238] sm:$0xff]  ;;  %v4801_v43 = vld [vmem:[%s6589_s19 + $0x230] sm:$0xff] }
 0x691   : > { %v7032_v46 = vadd.f32 %v2466_v44, %v2462_v45  ;;  %v4795_v44 = vld [vmem:[%s6589_s19 + $0x200] sm:$0xff]  ;;  %v4798_v45 = vld [vmem:[%s6589_s19 + $0x218] sm:$0xff] }
 0x693   : > { %2599 = vmatmul.mubr.f32.vlgmr.msra.gmra.mxu0 %v7032_v46  ;;  %2670 = vmatmul.mubr.f32.vlgmr.msra.gmra.mxu1 %v7032_v46 }
 0x694   : > { %2742 = vmatpush1.msra.mxu0 %v4855_v47  ;;  %2813 = vmatpush1.msra.mxu1 %v4857_v48  ;;  %v7100_v47 = vld [vmem:[%s777_s29] sm:$0xff] }
 0x695   : > { %2743 = vmatprep.subr.mxu0 %v4852_v49  ;;  %2814 = vmatprep.subr.mxu1 %v4854_v50  ;;  %v4797_v48 = vld [vmem:[%s6589_s19 + $0x210] sm:$0xff]  ;;  %v4920_v49 = vld [vmem:[%s6589_s19 + $0x5e8] sm:$0xff]  ;;  %v4919_v50 = vld [vmem:[%s6589_s19 + $0x5e0] sm:$0xff] }
 0x696   : > { %2744 = vmatpush1.msra.mxu0 %v4851_v31  ;;  %2815 = vmatpush1.msra.mxu1 %v4853_v51  ;;  %v4916_v31 = vld [vmem:[%s6589_s19 + $0x5c8] sm:$0xff]  ;;  %v4915_v51 = vld [vmem:[%s6589_s19 + $0x5c0] sm:$0xff] }
 0x697   : > { %2745 = vmatprep.subr.mxu0 %v4848_v52  ;;  %2816 = vmatprep.subr.mxu1 %v4850_v53  ;;  %v4912_v52 = vld [vmem:[%s6589_s19 + $0x5a8] sm:$0xff]  ;;  %v4911_v53 = vld [vmem:[%s6589_s19 + $0x5a0] sm:$0xff] }
 0x698   : > { %2746 = vmatpush1.msra.mxu0 %v4847_v54  ;;  %2817 = vmatpush1.msra.mxu1 %v4849_v55  ;;  %v4908_v54 = vld [vmem:[%s6589_s19 + $0x588] sm:$0xff]  ;;  %v4907_v55 = vld [vmem:[%s6589_s19 + $0x580] sm:$0xff] }
 0x699   : > { %2747 = vmatprep.subr.mxu0 %v4844_v56  ;;  %2818 = vmatprep.subr.mxu1 %v4846_v57  ;;  %v4904_v56 = vld [vmem:[%s6589_s19 + $0x568] sm:$0xff]  ;;  %v4903_v57 = vld [vmem:[%s6589_s19 + $0x560] sm:$0xff] }
 0x69a   : > { %2748 = vmatpush1.msra.mxu0 %v4843_v58  ;;  %2819 = vmatpush1.msra.mxu1 %v4845_v59  ;;  %v4900_v58 = vld [vmem:[%s6589_s19 + $0x548] sm:$0xff]  ;;  %v4899_v59 = vld [vmem:[%s6589_s19 + $0x540] sm:$0xff] }
 0x69b   : > { %2749 = vmatprep.subr.mxu0 %v4840_v60  ;;  %2820 = vmatprep.subr.mxu1 %v4842_v61  ;;  %v4896_v60 = vld [vmem:[%s6589_s19 + $0x528] sm:$0xff]  ;;  %v4895_v61 = vld [vmem:[%s6589_s19 + $0x520] sm:$0xff] }
 0x69c   : > { %2750 = vmatpush1.msra.mxu0 %v4839_v62  ;;  %2821 = vmatpush1.msra.mxu1 %v4841_v63  ;;  %v4892_v62 = vld [vmem:[%s6589_s19 + $0x508] sm:$0xff]  ;;  %v4891_v63 = vld [vmem:[%s6589_s19 + $0x500] sm:$0xff] }
 0x69d   : > { %2751 = vmatprep.subr.mxu0 %v4836_v1  ;;  %2822 = vmatprep.subr.mxu1 %v4838_v2  ;;  %v4888_v1 = vld [vmem:[%s6589_s19 + $0x4e8] sm:$0xff]  ;;  %v4887_v2 = vld [vmem:[%s6589_s19 + $0x4e0] sm:$0xff] }
 0x69e   : > { %2752 = vmatpush1.msra.mxu0 %v4835_v3  ;;  %2823 = vmatpush1.msra.mxu1 %v4837_v4  ;;  %v4884_v3 = vld [vmem:[%s6589_s19 + $0x4c8] sm:$0xff]  ;;  %v4883_v4 = vld [vmem:[%s6589_s19 + $0x4c0] sm:$0xff] }
 0x69f   : > { %2753 = vmatprep.subr.mxu0 %v4832_v6  ;;  %2824 = vmatprep.subr.mxu1 %v4834_v7  ;;  %v4880_v6 = vld [vmem:[%s6589_s19 + $0x4a8] sm:$0xff]  ;;  %v4879_v7 = vld [vmem:[%s6589_s19 + $0x4a0] sm:$0xff] }
 0x6a0   : > { %2754 = vmatpush1.msra.mxu0 %v4831_v8  ;;  %2825 = vmatpush1.msra.mxu1 %v4833_v9  ;;  %v4876_v8 = vld [vmem:[%s6589_s19 + $0x488] sm:$0xff]  ;;  %v4875_v9 = vld [vmem:[%s6589_s19 + $0x480] sm:$0xff] }
 0x6a1   : > { %2755 = vmatprep.subr.mxu0 %v4828_v10  ;;  %2826 = vmatprep.subr.mxu1 %v4830_v11  ;;  %v4872_v10 = vld [vmem:[%s6589_s19 + $0x468] sm:$0xff]  ;;  %v4871_v11 = vld [vmem:[%s6589_s19 + $0x460] sm:$0xff] }
 0x6a2   : > { %2756 = vmatpush1.msra.mxu0 %v4827_v12  ;;  %2827 = vmatpush1.msra.mxu1 %v4829_v13  ;;  %v4868_v12 = vld [vmem:[%s6589_s19 + $0x448] sm:$0xff]  ;;  %v4867_v13 = vld [vmem:[%s6589_s19 + $0x440] sm:$0xff] }
 0x6a3   : > { %2757 = vmatprep.subr.mxu0 %v4824_v0  ;;  %2828 = vmatprep.subr.mxu1 %v4826_v14  ;;  %v4864_v0 = vld [vmem:[%s6589_s19 + $0x428] sm:$0xff]  ;;  %v4863_v14 = vld [vmem:[%s6589_s19 + $0x420] sm:$0xff] }
 0x6a4   : > { %2758 = vmatpush1.msra.mxu0 %v4823_v15  ;;  %2829 = vmatpush1.msra.mxu1 %v4825_v17  ;;  %v4860_v15 = vld [vmem:[%s6589_s19 + $0x408] sm:$0xff]  ;;  %v4859_v17 = vld [vmem:[%s6589_s19 + $0x400] sm:$0xff] }
 0x6a5   : > { %2759 = vmatprep.subr.mxu0 %v4820_v18  ;;  %2830 = vmatprep.subr.mxu1 %v4822_v19  ;;  %v4922_v18 = vld [vmem:[%s6589_s19 + $0x5f8] sm:$0xff]  ;;  %v4921_v19 = vld [vmem:[%s6589_s19 + $0x5f0] sm:$0xff] }
 0x6a6   : > { %2760 = vmatpush1.msra.mxu0 %v4819_v20  ;;  %2831 = vmatpush1.msra.mxu1 %v4821_v21  ;;  %v4918_v20 = vld [vmem:[%s6589_s19 + $0x5d8] sm:$0xff]  ;;  %v4917_v21 = vld [vmem:[%s6589_s19 + $0x5d0] sm:$0xff] }
 0x6a7   : > { %2761 = vmatprep.subr.mxu0 %v4816_v22  ;;  %2832 = vmatprep.subr.mxu1 %v4818_v23  ;;  %v4914_v22 = vld [vmem:[%s6589_s19 + $0x5b8] sm:$0xff]  ;;  %v4913_v23 = vld [vmem:[%s6589_s19 + $0x5b0] sm:$0xff] }
 0x6a8   : > { %2762 = vmatpush1.msra.mxu0 %v4815_v24  ;;  %2833 = vmatpush1.msra.mxu1 %v4817_v25  ;;  %v4910_v24 = vld [vmem:[%s6589_s19 + $0x598] sm:$0xff]  ;;  %v4909_v25 = vld [vmem:[%s6589_s19 + $0x590] sm:$0xff] }
 0x6a9   : > { %2763 = vmatprep.subr.mxu0 %v4812_v26  ;;  %2834 = vmatprep.subr.mxu1 %v4814_v27  ;;  %v4906_v26 = vld [vmem:[%s6589_s19 + $0x578] sm:$0xff]  ;;  %v4905_v27 = vld [vmem:[%s6589_s19 + $0x570] sm:$0xff] }
 0x6aa   : > { %2764 = vmatpush1.msra.mxu0 %v4811_v16  ;;  %2835 = vmatpush1.msra.mxu1 %v4813_v28  ;;  %v4902_v16 = vld [vmem:[%s6589_s19 + $0x558] sm:$0xff]  ;;  %v4901_v28 = vld [vmem:[%s6589_s19 + $0x550] sm:$0xff] }
 0x6ab   : > { %2765 = vmatprep.subr.mxu0 %v4808_v29  ;;  %2836 = vmatprep.subr.mxu1 %v4810_v30  ;;  %v4898_v29 = vld [vmem:[%s6589_s19 + $0x538] sm:$0xff]  ;;  %v4897_v30 = vld [vmem:[%s6589_s19 + $0x530] sm:$0xff] }
 0x6ac   : > { %2766 = vmatpush1.msra.mxu0 %v4807_v32  ;;  %2805 = vmatprep.mubr.f32.mxu0 %v6109_v5  ;;  %v4894_v32 = vld [vmem:[%s6589_s19 + $0x518] sm:$0xff] }
 0x6ad   : > { %2767 = vmatprep.subr.mxu0 %v4804_v33  ;;  %2837 = vmatpush1.msra.mxu1 %v4809_v34  ;;  %v4893_v33 = vld [vmem:[%s6589_s19 + $0x510] sm:$0xff]  ;;  %v4890_v34 = vld [vmem:[%s6589_s19 + $0x4f8] sm:$0xff] }
 0x6ae   : > { %2768 = vmatpush1.msra.mxu0 %v4803_v35  ;;  %2838 = vmatprep.subr.mxu1 %v4806_v37  ;;  %v4889_v35 = vld [vmem:[%s6589_s19 + $0x4f0] sm:$0xff]  ;;  %v4886_v37 = vld [vmem:[%s6589_s19 + $0x4d8] sm:$0xff] }
 0x6af   : > { %2769 = vmatprep.subr.mxu0 %v4800_v38  ;;  %2839 = vmatpush1.msra.mxu1 %v4805_v39  ;;  %v4885_v38 = vld [vmem:[%s6589_s19 + $0x4d0] sm:$0xff]  ;;  %v4882_v39 = vld [vmem:[%s6589_s19 + $0x4b8] sm:$0xff] }
 0x6b0   : > { %2770 = vmatpush1.msra.mxu0 %v4799_v40  ;;  %2840 = vmatprep.subr.mxu1 %v4802_v41  ;;  %v4881_v40 = vld [vmem:[%s6589_s19 + $0x4b0] sm:$0xff]  ;;  %v4878_v41 = vld [vmem:[%s6589_s19 + $0x498] sm:$0xff] }
 0x6b1   : > { %2771 = vmatprep.subr.mxu0 %v4796_v42  ;;  %2841 = vmatpush1.msra.mxu1 %v4801_v43  ;;  %v4877_v42 = vld [vmem:[%s6589_s19 + $0x490] sm:$0xff]  ;;  %v4874_v43 = vld [vmem:[%s6589_s19 + $0x478] sm:$0xff] }
 0x6b2   : > { %2772 = vmatpush1.msra.mxu0 %v4795_v44  ;;  %2842 = vmatprep.subr.mxu1 %v4798_v45  ;;  %v4873_v44 = vld [vmem:[%s6589_s19 + $0x470] sm:$0xff]  ;;  %v4870_v45 = vld [vmem:[%s6589_s19 + $0x458] sm:$0xff] }
 0x6b3   : > { %2806 = vmatmul.mubr.f32.vlgmr.msra.gmra.mxu0 %v7100_v47  ;;  %2843 = vmatpush1.msra.mxu1 %v4797_v48  ;;  %v4869_v48 = vld [vmem:[%s6589_s19 + $0x450] sm:$0xff] }
 0x6b4   : > { %2876 = vmatprep.mubr.f32.mxu1 %v6109_v5  ;;  %2948 = vmatprep.subr.mxu0 %v4920_v49  ;;  %v4866_v49 = vld [vmem:[%s6589_s19 + $0x438] sm:$0xff] }
 0x6b5   : > { %2877 = vmatmul.mubr.f32.vlgmr.msra.gmra.mxu1 %v7100_v47  ;;  %2949 = vmatpush1.msra.mxu0 %v4919_v50  ;;  %v4865_v50 = vld [vmem:[%s6589_s19 + $0x430] sm:$0xff] }
 0x6b6   : > { %3012 = vmatprep.mubr.f32.mxu0 %v6109_v5  ;;  %3083 = vmatprep.mubr.f32.mxu1 %v6109_v5 }
 0x6b7   : > { %2950 = vmatprep.subr.mxu0 %v4916_v31  ;;  %3019 = vmatprep.subr.mxu1 %v4922_v18  ;;  %v4862_v31 = vld [vmem:[%s6589_s19 + $0x418] sm:$0xff] }
 0x6b8   : > { %2951 = vmatpush1.msra.mxu0 %v4915_v51  ;;  %3020 = vmatpush1.msra.mxu1 %v4921_v19  ;;  %v4861_v51 = vld [vmem:[%s6589_s19 + $0x410] sm:$0xff] }
 0x6b9   : > { %2952 = vmatprep.subr.mxu0 %v4912_v52  ;;  %3021 = vmatprep.subr.mxu1 %v4918_v20 }
 0x6ba   : > { %2953 = vmatpush1.msra.mxu0 %v4911_v53  ;;  %3022 = vmatpush1.msra.mxu1 %v4917_v21 }
 0x6bb   : > { %2954 = vmatprep.subr.mxu0 %v4908_v54  ;;  %3023 = vmatprep.subr.mxu1 %v4914_v22 }
 0x6bc   : > { %2955 = vmatpush1.msra.mxu0 %v4907_v55  ;;  %3024 = vmatpush1.msra.mxu1 %v4913_v23 }
 0x6bd   : > { %2956 = vmatprep.subr.mxu0 %v4904_v56  ;;  %3025 = vmatprep.subr.mxu1 %v4910_v24 }
 0x6be   : > { %2957 = vmatpush1.msra.mxu0 %v4903_v57  ;;  %3026 = vmatpush1.msra.mxu1 %v4909_v25 }
 0x6bf   : > { %2958 = vmatprep.subr.mxu0 %v4900_v58  ;;  %3027 = vmatprep.subr.mxu1 %v4906_v26 }
 0x6c0   : > { %2959 = vmatpush1.msra.mxu0 %v4899_v59  ;;  %3028 = vmatpush1.msra.mxu1 %v4905_v27 }
 0x6c1   : > { %2960 = vmatprep.subr.mxu0 %v4896_v60  ;;  %3029 = vmatprep.subr.mxu1 %v4902_v16 }
 0x6c2   : > { %2961 = vmatpush1.msra.mxu0 %v4895_v61  ;;  %3030 = vmatpush1.msra.mxu1 %v4901_v28  ;;  %v2469_v61 = vld [vmem:[%s795_s17] sm:$0xff] }
 0x6c3   : > { %2962 = vmatprep.subr.mxu0 %v4892_v62  ;;  %3031 = vmatprep.subr.mxu1 %v4898_v29 }
 0x6c4   : > { %2963 = vmatpush1.msra.mxu0 %v4891_v63  ;;  %3032 = vmatpush1.msra.mxu1 %v4897_v30 }
 0x6c5   : > { %2964 = vmatprep.subr.mxu0 %v4888_v1  ;;  %3033 = vmatprep.subr.mxu1 %v4894_v32 }
 0x6c6   : > { %2965 = vmatpush1.msra.mxu0 %v4887_v2  ;;  %3034 = vmatpush1.msra.mxu1 %v4893_v33 }
 0x6c7   : > { %2966 = vmatprep.subr.mxu0 %v4884_v3  ;;  %3035 = vmatprep.subr.mxu1 %v4890_v34 }
 0x6c8   : > { %2967 = vmatpush1.msra.mxu0 %v4883_v4  ;;  %3036 = vmatpush1.msra.mxu1 %v4889_v35 }
 0x6c9   : > { %2968 = vmatprep.subr.mxu0 %v4880_v6  ;;  %3037 = vmatprep.subr.mxu1 %v4886_v37  ;;  %v3745_v37 = vld [vmem:[%s6592_s20 + $0xf8] sm:$0xff] }
 0x6ca   : > { %2969 = vmatpush1.msra.mxu0 %v4879_v7  ;;  %3038 = vmatpush1.msra.mxu1 %v4885_v38  ;;  %v3729_v38 = vld [vmem:[%s6592_s20 + $0x78] sm:$0xff] }
 0x6cb   : > { %2970 = vmatprep.subr.mxu0 %v4876_v8  ;;  %3039 = vmatprep.subr.mxu1 %v4882_v39  ;;  %v3744_v39 = vld [vmem:[%s6592_s20 + $0xf0] sm:$0xff] }
 0x6cc   : > { %2971 = vmatpush1.msra.mxu0 %v4875_v9  ;;  %3040 = vmatpush1.msra.mxu1 %v4881_v40  ;;  %v3728_v40 = vld [vmem:[%s6592_s20 + $0x70] sm:$0xff] }
 0x6cd   : > { %2972 = vmatprep.subr.mxu0 %v4872_v10  ;;  %3041 = vmatprep.subr.mxu1 %v4878_v41  ;;  %v3743_v41 = vld [vmem:[%s6592_s20 + $0xe8] sm:$0xff] }
 0x6ce   : > { %2973 = vmatpush1.msra.mxu0 %v4871_v11  ;;  %3042 = vmatpush1.msra.mxu1 %v4877_v42  ;;  %v3727_v42 = vld [vmem:[%s6592_s20 + $0x68] sm:$0xff] }
 0x6cf   : > { %2974 = vmatprep.subr.mxu0 %v4868_v12  ;;  %3043 = vmatprep.subr.mxu1 %v4874_v43  ;;  %v3742_v43 = vld [vmem:[%s6592_s20 + $0xe0] sm:$0xff] }
 0x6d0   : > { %2975 = vmatpush1.msra.mxu0 %v4867_v13  ;;  %3044 = vmatpush1.msra.mxu1 %v4873_v44  ;;  %v3726_v44 = vld [vmem:[%s6592_s20 + $0x60] sm:$0xff] }
 0x6d1   : > { %2976 = vmatprep.subr.mxu0 %v4864_v0  ;;  %3045 = vmatprep.subr.mxu1 %v4870_v45  ;;  %v3741_v45 = vld [vmem:[%s6592_s20 + $0xd8] sm:$0xff] }
 0x6d2   : > { %2977 = vmatpush1.msra.mxu0 %v4863_v14  ;;  %3046 = vmatpush1.msra.mxu1 %v4869_v48  ;;  %v3725_v48 = vld [vmem:[%s6592_s20 + $0x58] sm:$0xff] }
 0x6d3   : > { %2978 = vmatprep.subr.mxu0 %v4860_v15  ;;  %3047 = vmatprep.subr.mxu1 %v4866_v49  ;;  %v3740_v49 = vld [vmem:[%s6592_s20 + $0xd0] sm:$0xff] }
 0x6d4   : > { %2979 = vmatpush1.msra.mxu0 %v4859_v17  ;;  %3048 = vmatpush1.msra.mxu1 %v4865_v50  ;;  %v3724_v50 = vld [vmem:[%s6592_s20 + $0x50] sm:$0xff] }
 0x6d5   : > { %3013 = vmatmul.mubr.f32.vlgmr.msra.gmra.mxu0 %v7100_v47  ;;  %5202 = vmatprep.subr.mxu0 %v6109_v5 }
 0x6d6   : > { %5204 = vmatprep.mubr.msk.f32.mxu0 %vm6110_vm0, %v6109_v5  ;;  %3049 = vmatprep.subr.mxu1 %v4862_v31  ;;  %v3739_v31 = vld [vmem:[%s6592_s20 + $0xc8] sm:$0xff] }
 0x6d7   : > { %3050 = vmatpush1.msra.mxu1 %v4861_v51  ;;  %v3723_v51 = vld [vmem:[%s6592_s20 + $0x48] sm:$0xff] }
 0x6d8   : > { %5207 = vmatprep.subr.mxu1 %v6109_v5  ;;  %3084 = vmatmul.mubr.f32.vlgmr.msra.gmra.mxu1 %v7100_v47 }
 0x6d9   : > { %5209 = vmatprep.mubr.msk.f32.mxu1 %vm6110_vm0, %v6109_v5 }
 0x753   : > { %v2600_v52 = vpop.f32.mrf.mxu0  ;;  %v2671_v55 = vpop.f32.mrf.mxu1 }
 0x755   : > { %v2602_v53 = vpop.f32.mrf.mxu0  ;;  %v2673_v57 = vpop.f32.mrf.mxu1 }
 0x773   : > { %v2807_v54 = vpop.f32.mrf.mxu0 }
 0x774   : > { %5203 = vmatpush3.xpose.msra.mxu0 %v2807_v54  ;;  %v3737_v54 = vld [vmem:[%s6592_s20 + $0xb8] sm:$0xff] }
 0x775   : > { %5212 = vmatprep.subr.mxu0 %v6109_v5  ;;  %v2809_v56 = vpop.f32.mrf.mxu0  ;;  %v2878_v47 = vpop.f32.mrf.mxu1 }
 0x777   : > { %5205 = vmatmul.mubr.f32.vlgmr.msra.gmra.mxu0 %v2600_v52  ;;  %v2880_v58 = vpop.f32.mrf.mxu1  ;;  %v3738_v52 = vld [vmem:[%s6592_s20 + $0xc0] sm:$0xff] }
 0x778   : > { %5213 = vmatpush3.xpose.msra.mxu0 %v2809_v56  ;;  %5214 = vmatprep.mubr.msk.f32.mxu0 %vm6110_vm0, %v6109_v5  ;;  %v3736_v56 = vld [vmem:[%s6592_s20 + $0xb0] sm:$0xff] }
 0x779   : > { %5222 = vmatprep.subr.mxu0 %v6109_v5 }
 0x77b   : > { %5215 = vmatmul.mubr.f32.vlgmr.msra.gmra.mxu0 %v2602_v53  ;;  %v3722_v53 = vld [vmem:[%s6592_s20 + $0x40] sm:$0xff] }
 0x77c   : > { %5223 = vmatpush3.xpose.msra.mxu0 %v2878_v47  ;;  %5224 = vmatprep.mubr.msk.f32.mxu0 %vm6110_vm0, %v6109_v5  ;;  %v3735_v47 = vld [vmem:[%s6592_s20 + $0xa8] sm:$0xff] }
 0x77d   : > { %5232 = vmatprep.subr.mxu0 %v6109_v5 }
 0x77f   : > { %5225 = vmatmul.mubr.f32.vlgmr.msra.gmra.mxu0 %v2671_v55  ;;  %v3721_v55 = vld [vmem:[%s6592_s20 + $0x38] sm:$0xff] }
 0x780   : > { %5233 = vmatpush3.xpose.msra.mxu0 %v2880_v58  ;;  %5234 = vmatprep.mubr.msk.f32.mxu0 %vm6110_vm0, %v6109_v5  ;;  %v3719_v58 = vld [vmem:[%s6592_s20 + $0x28] sm:$0xff] }
 0x781   : > { %5041 = vmatprep.subr.mxu0 %v3745_v37  ;;  %v3752_v37 = vld [vmem:[%s6592_s20 + $0x130] sm:$0xff] }
 0x783   : > { %5235 = vmatmul.mubr.f32.vlgmr.msra.gmra.mxu0 %v2673_v57  ;;  %v3720_v57 = vld [vmem:[%s6592_s20 + $0x30] sm:$0xff] }
 0x784   : > { %5042 = vmatpush3.msra.mxu0 %v3729_v38  ;;  %v3731_v38 = vld [vmem:[%s6592_s20 + $0x88] sm:$0xff] }
 0x785   : > { %5043 = vmatprep.subr.mxu0 %v3744_v39  ;;  %v3767_v39 = vld [vmem:[%s6592_s20 + $0x1a8] sm:$0xff] }
 0x786   : > { %5044 = vmatpush3.msra.mxu0 %v3728_v40  ;;  %v3715_v40 = vld [vmem:[%s6592_s20 + $0x8] sm:$0xff] }
 0x787   : > { %5045 = vmatprep.subr.mxu0 %v3743_v41  ;;  %v3751_v41 = vld [vmem:[%s6592_s20 + $0x128] sm:$0xff] }
 0x788   : > { %5046 = vmatpush3.msra.mxu0 %v3727_v42  ;;  %v3730_v42 = vld [vmem:[%s6592_s20 + $0x80] sm:$0xff] }
 0x789   : > { %5047 = vmatprep.subr.mxu0 %v3742_v43  ;;  %v3766_v43 = vld [vmem:[%s6592_s20 + $0x1a0] sm:$0xff] }
 0x78a   : > { %5048 = vmatpush3.msra.mxu0 %v3726_v44  ;;  %v3714_v44 = vld [vmem:[%s6592_s20] sm:$0xff] }
 0x78b   : > { %5049 = vmatprep.subr.mxu0 %v3741_v45  ;;  %v3750_v45 = vld [vmem:[%s6592_s20 + $0x120] sm:$0xff] }
 0x78c   : > { %5050 = vmatpush3.msra.mxu0 %v3725_v48  ;;  %v3765_v48 = vld [vmem:[%s6592_s20 + $0x198] sm:$0xff] }
 0x78d   : > { %5051 = vmatprep.subr.mxu0 %v3740_v49  ;;  %v3749_v49 = vld [vmem:[%s6592_s20 + $0x118] sm:$0xff] }
 0x78e   : > { %5052 = vmatpush3.msra.mxu0 %v3724_v50  ;;  %v3764_v50 = vld [vmem:[%s6592_s20 + $0x190] sm:$0xff] }
 0x78f   : > { %5053 = vmatprep.subr.mxu0 %v3739_v31  ;;  %v3748_v31 = vld [vmem:[%s6592_s20 + $0x110] sm:$0xff] }
 0x790   : > { %5054 = vmatpush3.msra.mxu0 %v3723_v51  ;;  %v3763_v51 = vld [vmem:[%s6592_s20 + $0x188] sm:$0xff] }
 0x791   : > { %5055 = vmatprep.subr.mxu0 %v3738_v52  ;;  %v3747_v52 = vld [vmem:[%s6592_s20 + $0x108] sm:$0xff] }
 0x792   : > { %5056 = vmatpush3.msra.mxu0 %v3722_v53  ;;  %v3762_v53 = vld [vmem:[%s6592_s20 + $0x180] sm:$0xff] }
 0x793   : > { %5057 = vmatprep.subr.mxu0 %v3737_v54  ;;  %v3746_v54 = vld [vmem:[%s6592_s20 + $0x100] sm:$0xff] }
 0x794   : > { %5058 = vmatpush3.msra.mxu0 %v3721_v55 }
 0x795   : > { %v3014_v59 = vpop.f32.mrf.mxu0  ;;  %5059 = vmatprep.subr.mxu0 %v3736_v56 }
 0x796   : > { %5208 = vmatpush3.msra.mxu1 %v3014_v59  ;;  %5060 = vmatpush3.msra.mxu0 %v3720_v57  ;;  %v3734_v59 = vld [vmem:[%s6592_s20 + $0xa0] sm:$0xff] }
 0x797   : > { %5217 = vmatprep.subr.mxu1 %v6109_v5  ;;  %v7190_v60 = vpop.f32.mrf.mxu0  ;;  %5061 = vmatprep.subr.mxu0 %v3735_v47 }
 0x798   : > { %5062 = vmatpush3.msra.mxu0 %v3719_v58 }
 0x799   : > { %5063 = vmatprep.subr.mxu0 %v3734_v59 }
 0x837   : > { %v3156_v62 = vpop.f32.mrf.mxu0 }
 0x838   : > { %v3157_v63 = vadd.f32 %v3156_v62, %v2469_v61  ;;  %v3733_v62 = vld [vmem:[%s6592_s20 + $0x98] sm:$0xff] }
 0x839   : > { %v5206_v1 = vpop.f32.mrf.mxu0 }
 0x83a   : > { %v3160_v2 = vsel %vm1686_vm1, %v3157_v63, -inf }
 0x83b   : > { %3161 = vmax.xlane.f32.xlu0 %v3160_v2  ;;  %v3311_v3 = vpop.f32.mrf.mxu0 }
 0x83c   : > { %v3312_v4 = vadd.f32 %v3311_v3, %v2469_v61 }
 0x83d   : > { %v5216_v6 = vpop.f32.mrf.mxu0 }
 0x83e   : > { %v3315_v7 = vsel %vm1686_vm1, %v3312_v4, -inf }
 0x83f   : > { %3316 = vmax.xlane.f32.xlu1 %v3315_v7  ;;  %v3466_v8 = vpop.f32.mrf.mxu0 }
 0x840   : > { %v3467_v9 = vadd.f32 %v3466_v8, %v2469_v61 }
 0x841   : > { %v5226_v10 = vpop.f32.mrf.mxu0 }
 0x842   : > { %v3470_v11 = vsel %vm1686_vm1, %v3467_v9, -inf }
 0x843   : > { %3471 = vmax.xlane.f32.xlu0 %v3470_v11  ;;  %v3621_v12 = vpop.f32.mrf.mxu0 }
 0x844   : > { %v3622_v13 = vadd.f32 %v3621_v12, %v2469_v61  ;;  %v3718_v61 = vld [vmem:[%s6592_s20 + $0x20] sm:$0xff] }
 0x845   : > { %v5236_v0 = vpop.f32.mrf.mxu0  ;;  %5064 = vmatpush3.msra.mxu0 %v3718_v61 }
 0x846   : > { %v3625_v14 = vsel %vm1686_vm1, %v3622_v13, -inf  ;;  %5065 = vmatprep.subr.mxu0 %v3733_v62 }
 0x847   : > { %3626 = vmax.xlane.f32.xlu1 %v3625_v14 }
 0x8c4   : > { %v3162_v15 = vpop.xlane.xlu0 %3161 }
 0x8c5   : > { %v3163_v17 = vsub.f32 %v3157_v63, %v3162_v15  ;;  %v3717_v63 = vld [vmem:[%s6592_s20 + $0x18] sm:$0xff] }
 0x8c6   : > { %5066 = vmatpush3.msra.mxu0 %v3717_v63  ;;  %v3761_v15 = vld [vmem:[%s6592_s20 + $0x178] sm:$0xff]  ;;  %v3956_v63 = vld [vmem:[%s6603_s13 + $0x78] sm:$0xff] }
 0x8c7   : > { %v3164_v18 = vmul.f32 1.442695, %v3163_v17  ;;  %v3776_v17 = vld [vmem:[%s6592_s20 + $0x1f0] sm:$0xff] }
 0x8c8   : > { %v3317_v19 = vpop.xlane.xlu1 %3316 }
 0x8c9   : > { %5522 = vpow2.f32 %v3164_v18  ;;  %v3318_v20 = vsub.f32 %v3312_v4, %v3317_v19  ;;  %v3760_v18 = vld [vmem:[%s6592_s20 + $0x170] sm:$0xff]  ;;  %v3775_v19 = vld [vmem:[%s6592_s20 + $0x1e8] sm:$0xff] }
 0x8cb   : > { %v3319_v21 = vmul.f32 1.442695, %v3318_v20  ;;  %v3759_v20 = vld [vmem:[%s6592_s20 + $0x168] sm:$0xff] }
 0x8cc   : > { %v3472_v22 = vpop.xlane.xlu0 %3471 }
 0x8cd   : > { %5524 = vpow2.f32 %v3319_v21  ;;  %v3473_v23 = vsub.f32 %v3467_v9, %v3472_v22  ;;  %v3085_v9 = vpop.f32.mrf.mxu1  ;;  %v3774_v21 = vld [vmem:[%s6592_s20 + $0x1e0] sm:$0xff] }
 0x8ce   : > { %v3758_v22 = vld [vmem:[%s6592_s20 + $0x160] sm:$0xff] }
 0x8cf   : > { %v3474_v24 = vmul.f32 1.442695, %v3473_v23  ;;  %v3773_v23 = vld [vmem:[%s6592_s20 + $0x1d8] sm:$0xff] }
 0x8d0   : > { %v3627_v25 = vpop.xlane.xlu1 %3626 }
 0x8d1   : > { %5526 = vpow2.f32 %v3474_v24  ;;  %v3628_v26 = vsub.f32 %v3622_v13, %v3627_v25  ;;  %v3777_v13 = vld [vmem:[%s6592_s20 + $0x1f8] sm:$0xff]  ;;  %v3772_v25 = vld [vmem:[%s6592_s20 + $0x1d0] sm:$0xff] }
 0x8d2   : > { %v3757_v24 = vld [vmem:[%s6592_s20 + $0x158] sm:$0xff] }
 0x8d3   : > { %v3629_v27 = vmul.f32 1.442695, %v3628_v26  ;;  %v3756_v26 = vld [vmem:[%s6592_s20 + $0x150] sm:$0xff] }
 0x8d5   : > { %5528 = vpow2.f32 %v3629_v27  ;;  %v3771_v27 = vld [vmem:[%s6592_s20 + $0x1c8] sm:$0xff] }
 0x8d6   : > { %v7198_v16 = vpop.eup %5522 }
 0x8d7   : > { %v3166_v28 = vsel %vm1686_vm1, %v7198_v16, 0.0 }
 0x8d8   : > { %3167 = vadd.xlane.f32.xlu0 %v3166_v28  ;;  %v3770_v28 = vld [vmem:[%s6592_s20 + $0x1c0] sm:$0xff] }
 0x8da   : > { %v7202_v29 = vpop.eup %5524 }
 0x8db   : > { %v3321_v30 = vsel %vm1686_vm1, %v7202_v29, 0.0 }
 0x8dc   : > { %3322 = vadd.xlane.f32.xlu1 %v3321_v30  ;;  %v3769_v30 = vld [vmem:[%s6592_s20 + $0x1b8] sm:$0xff] }
 0x8de   : > { %v7206_v32 = vpop.eup %5526 }
 0x8df   : > { %v3476_v33 = vsel %vm1686_vm1, %v7206_v32, 0.0 }
 0x8e0   : > { %3477 = vadd.xlane.f32.xlu0 %v3476_v33  ;;  %v3732_v33 = vld [vmem:[%s6592_s20 + $0x90] sm:$0xff] }
 0x8e1   : > { %5067 = vmatprep.subr.mxu0 %v3732_v33  ;;  %v4041_v33 = vld [vmem:[%s6611_s27 + $0x30] sm:$0xff] }
 0x8e2   : > { %v7210_v34 = vpop.eup %5528 }
 0x8e3   : > { %v3631_v35 = vsel %vm1686_vm1, %v7210_v34, 0.0 }
 0x8e4   : > { %3632 = vadd.xlane.f32.xlu1 %v3631_v35  ;;  %v3716_v35 = vld [vmem:[%s6592_s20 + $0x10] sm:$0xff] }
 0x8e5   : > { %5068 = vmatpush3.msra.mxu0 %v3716_v35  ;;  %v4039_v35 = vld [vmem:[%s6611_s27 + $0x20] sm:$0xff] }
 0x8e6   : > { %5069 = vmatprep.subr.mxu0 %v3731_v38 }
 0x8e7   : > { %5070 = vmatpush3.msra.mxu0 %v3715_v40 }
 0x8e8   : > { %5071 = vmatprep.subr.mxu0 %v3730_v42 }
 0x8e9   : > { %5072 = vmatpush3.msra.mxu0 %v3714_v44 }
 0x8ea   : > { %5242 = vmatprep.subr.mxu0 %v6109_v5 }
 0x961   : > { %v3168_v1 = vpop.xlane.xlu0 %3167 }
 0x962   : > { %5530 = vrcp.f32 %v3168_v1  ;;  %v3955_v1 = vld [vmem:[%s6603_s13 + $0x70] sm:$0xff] }
 0x965   : > { %v3323_v2 = vpop.xlane.xlu1 %3322 }
 0x966   : > { %5532 = vrcp.f32 %v3323_v2 }
 0x969   : > { %v3478_v3 = vpop.xlane.xlu0 %3477 }
 0x96a   : > { %5534 = vrcp.f32 %v3478_v3 }
 0x96d   : > { %v3633_v4 = vpop.xlane.xlu1 %3632 }
 0x96e   : > { %5536 = vrcp.f32 %v3633_v4 }
 0x96f   : > { %v5531_v6 = vpop.eup %5530 }
 0x970   : > { %v3170_v7 = vmul.f32 %v5531_v6, %v7198_v16  ;;  %v3755_v16 = vld [vmem:[%s6592_s20 + $0x148] sm:$0xff] }
 0x972   : > { %5210 = vmatmul.mubr.msk.f32.vlgmr.msra.gmra.mxu1 %vm1686_vm1, %v3170_v7 }
 0x973   : > { %v5533_v8 = vpop.eup %5532  ;;  %5218 = vmatpush3.msra.mxu1 %v7190_v60  ;;  %5219 = vmatprep.mubr.msk.f32.mxu1 %vm6110_vm0, %v6109_v5  ;;  %v3087_v60 = vpop.f32.mrf.mxu1 }
 0x974   : > { %v3325_v10 = vmul.f32 %v5533_v8, %v7202_v29  ;;  %5227 = vmatprep.subr.mxu1 %v6109_v5  ;;  %v3754_v29 = vld [vmem:[%s6592_s20 + $0x140] sm:$0xff] }
 0x976   : > { %5220 = vmatmul.mubr.msk.f32.vlgmr.msra.gmra.mxu1 %vm1686_vm1, %v3325_v10 }
 0x977   : > { %v5535_v11 = vpop.eup %5534  ;;  %5228 = vmatpush3.msra.mxu1 %v3085_v9  ;;  %5229 = vmatprep.mubr.msk.f32.mxu1 %vm6110_vm0, %v6109_v5 }
 0x978   : > { %5237 = vmatprep.subr.mxu1 %v6109_v5  ;;  %v3480_v12 = vmul.f32 %v5535_v11, %v7206_v32  ;;  %v3753_v32 = vld [vmem:[%s6592_s20 + $0x138] sm:$0xff] }
 0x97a   : > { %5230 = vmatmul.mubr.msk.f32.vlgmr.msra.gmra.mxu1 %vm1686_vm1, %v3480_v12  ;;  %v3953_v12 = vld [vmem:[%s6603_s13 + $0x60] sm:$0xff] }
 0x97b   : > { %v5537_v0 = vpop.eup %5536  ;;  %5238 = vmatpush3.msra.mxu1 %v3087_v60  ;;  %5239 = vmatprep.mubr.msk.f32.mxu1 %vm6110_vm0, %v6109_v5  ;;  %v3954_v60 = vld [vmem:[%s6603_s13 + $0x68] sm:$0xff] }
 0x97c   : > { %v3635_v14 = vmul.f32 %v5537_v0, %v7210_v34  ;;  %5076 = vmatprep.subr.mxu1 %v3777_v13  ;;  %v3768_v34 = vld [vmem:[%s6592_s20 + $0x1b0] sm:$0xff]  ;;  %v3951_v13 = vld [vmem:[%s6603_s13 + $0x50] sm:$0xff]  ;;  %v3950_v0 = vld [vmem:[%s6603_s13 + $0x48] sm:$0xff] }
 0x97e   : > { %5240 = vmatmul.mubr.msk.f32.vlgmr.msra.gmra.mxu1 %vm1686_vm1, %v3635_v14  ;;  %v3949_v14 = vld [vmem:[%s6603_s13 + $0x40] sm:$0xff] }
 0x97f   : > { %5077 = vmatpush3.msra.mxu1 %v3761_v15  ;;  %v3948_v15 = vld [vmem:[%s6603_s13 + $0x38] sm:$0xff] }
 0x980   : > { %5078 = vmatprep.subr.mxu1 %v3776_v17  ;;  %v3947_v17 = vld [vmem:[%s6603_s13 + $0x30] sm:$0xff] }
 0x981   : > { %5079 = vmatpush3.msra.mxu1 %v3760_v18  ;;  %v3946_v18 = vld [vmem:[%s6603_s13 + $0x28] sm:$0xff] }
 0x982   : > { %5080 = vmatprep.subr.mxu1 %v3775_v19  ;;  %v3945_v19 = vld [vmem:[%s6603_s13 + $0x20] sm:$0xff] }
 0x983   : > { %5081 = vmatpush3.msra.mxu1 %v3759_v20  ;;  %v3944_v20 = vld [vmem:[%s6603_s13 + $0x18] sm:$0xff] }
 0x984   : > { %5082 = vmatprep.subr.mxu1 %v3774_v21  ;;  %v3943_v21 = vld [vmem:[%s6603_s13 + $0x10] sm:$0xff] }
 0x985   : > { %5083 = vmatpush3.msra.mxu1 %v3758_v22  ;;  %v3942_v22 = vld [vmem:[%s6603_s13 + $0x8] sm:$0xff] }
 0x986   : > { %5084 = vmatprep.subr.mxu1 %v3773_v23  ;;  %v3941_v23 = vld [vmem:[%s6603_s13] sm:$0xff] }
 0x987   : > { %5085 = vmatpush3.msra.mxu1 %v3757_v24  ;;  %v4050_v24 = vld [vmem:[%s6611_s27 + $0x78] sm:$0xff] }
 0x988   : > { %5086 = vmatprep.subr.mxu1 %v3772_v25  ;;  %v4049_v25 = vld [vmem:[%s6611_s27 + $0x70] sm:$0xff] }
 0x989   : > { %5087 = vmatpush3.msra.mxu1 %v3756_v26  ;;  %v4048_v26 = vld [vmem:[%s6611_s27 + $0x68] sm:$0xff] }
 0x98a   : > { %5088 = vmatprep.subr.mxu1 %v3771_v27  ;;  %v4047_v27 = vld [vmem:[%s6611_s27 + $0x60] sm:$0xff] }
 0x98b   : > { %5089 = vmatpush3.msra.mxu1 %v3755_v16  ;;  %v4046_v16 = vld [vmem:[%s6611_s27 + $0x58] sm:$0xff] }
 0x98c   : > { %5090 = vmatprep.subr.mxu1 %v3770_v28  ;;  %v4045_v28 = vld [vmem:[%s6611_s27 + $0x50] sm:$0xff] }
 0x98d   : > { %5091 = vmatpush3.msra.mxu1 %v3754_v29  ;;  %v4044_v29 = vld [vmem:[%s6611_s27 + $0x48] sm:$0xff] }
 0x98e   : > { %5092 = vmatprep.subr.mxu1 %v3769_v30  ;;  %v4043_v30 = vld [vmem:[%s6611_s27 + $0x40] sm:$0xff] }
 0x98f   : > { %5093 = vmatpush3.msra.mxu1 %v3753_v32  ;;  %v4042_v32 = vld [vmem:[%s6611_s27 + $0x38] sm:$0xff] }
 0x990   : > { %5094 = vmatprep.subr.mxu1 %v3768_v34  ;;  %v4040_v34 = vld [vmem:[%s6611_s27 + $0x28] sm:$0xff] }
 0x991   : > { %5095 = vmatpush3.msra.mxu1 %v3752_v37  ;;  %v4038_v37 = vld [vmem:[%s6611_s27 + $0x18] sm:$0xff] }
 0x992   : > { %5096 = vmatprep.subr.mxu1 %v3767_v39 }
 0x993   : > { %5097 = vmatpush3.msra.mxu1 %v3751_v41 }
 0x994   : > { %5098 = vmatprep.subr.mxu1 %v3766_v43 }
 0x995   : > { %5099 = vmatpush3.msra.mxu1 %v3750_v45  ;;  %v3933_v45 = vsub.s32 2, %v7026_v36 }
 0x996   : > { %5100 = vmatprep.subr.mxu1 %v3765_v48  ;;  %v3938_v48 = vsub.s32 3, %v7026_v36 }
 0x997   : > { %5101 = vmatpush3.msra.mxu1 %v3749_v49 }
 0x998   : > { %5102 = vmatprep.subr.mxu1 %v3764_v50  ;;  %v5543_v50 = vld [vmem:[%s6600_s12] sm:$0xff] }
 0x999   : > { %5103 = vmatpush3.msra.mxu1 %v3748_v31  ;;  %v3934_v31 = vrot.slane %v5543_v50, %v3933_v45 }
 0x99a   : > { %5104 = vmatprep.subr.mxu1 %v3763_v51 }
 0x99b   : > { %5105 = vmatpush3.msra.mxu1 %v3747_v52 }
 0x99c   : > { %5106 = vmatprep.subr.mxu1 %v3762_v53  ;;  %v3939_v53 = vrot.slane %v5543_v50, %v3938_v48 }
 0x99d   : > { %5107 = vmatpush3.msra.mxu1 %v3746_v54 }
 0x99e   : > { %5277 = vmatprep.subr.mxu1 %v6109_v5 }
 0xa32   : > { %v3240_v55 = vpop.f32.mrf.mxu1 }
 0xa34   : > { %v5211_v56 = vpop.f32.mrf.mxu1 }
 0xa35   : > { %v4037_v56 = vld [vmem:[%s6611_s27 + $0x10] sm:$0xff] }
 0xa36   : > { %v3395_v57 = vpop.f32.mrf.mxu1 }
 0xa37   : > { %3842 = vmatprep.mubr.f32.mxu0 %v3395_v57  ;;  %v4036_v57 = vld [vmem:[%s6611_s27 + $0x8] sm:$0xff] }
 0xa38   : > { %v5221_v47 = vpop.f32.mrf.mxu1  ;;  %3843 = vmatmul.mubr.f32.vlgmr.msra.gmra.mxu0 %v3240_v55 }
 0xa39   : > { %5274 = vmatprep.mubr.msk.f32.mxu0 %vm6110_vm0, %v6109_v5  ;;  %5243 = vmatpush3.msra.mxu0 %v3956_v63  ;;  %v4035_v47 = vld [vmem:[%s6611_s27] sm:$0xff] }
 0xa3a   : > { %v3550_v58 = vpop.f32.mrf.mxu1  ;;  %5244 = vmatprep.subr.mxu0 %v6109_v5 }
 0xa3b   : > { %5245 = vmatpush3.msra.mxu0 %v3955_v1  ;;  %v4928_v1 = vld [vmem:[%s874_s21] ss:$0 sm:$0xff] }
 0xa3c   : > { %v5231_v59 = vpop.f32.mrf.mxu1  ;;  %5246 = vmatprep.subr.mxu0 %v6109_v5 }
 0xa3d   : > { %5247 = vmatpush3.msra.mxu0 %v3954_v60 }
 0xa3e   : > { %v3705_v61 = vpop.f32.mrf.mxu1  ;;  %5248 = vmatprep.subr.mxu0 %v6109_v5 }
 0xa3f   : > { %3912 = vmatprep.mubr.f32.mxu1 %v3705_v61  ;;  %5249 = vmatpush3.msra.mxu0 %v3953_v12 }
 0xa40   : > { %v5241_v62 = vpop.f32.mrf.mxu1  ;;  %3913 = vmatmul.mubr.f32.vlgmr.msra.gmra.mxu1 %v3550_v58  ;;  %5250 = vmatprep.subr.mxu0 %v6109_v5  ;;  %v4927_v58 = vld [vmem:[%s857_s10] ss:$0 sm:$0xff] }
 0xa41   : > { %5309 = vmatprep.mubr.msk.f32.mxu1 %vm6110_vm0, %v6109_v5  ;;  %5278 = vmatpush3.msra.mxu1 %v4050_v24 }
 0xa42   : > { %5279 = vmatprep.subr.mxu1 %v6109_v5 }
 0xa43   : > { %5280 = vmatpush3.msra.mxu1 %v4049_v25 }
 0xa44   : > { %5281 = vmatprep.subr.mxu1 %v6109_v5 }
 0xa45   : > { %5282 = vmatpush3.msra.mxu1 %v4048_v26 }
 0xa46   : > { %5283 = vmatprep.subr.mxu1 %v6109_v5 }
 0xa47   : > { %5284 = vmatpush3.msra.mxu1 %v4047_v27 }
 0xa48   : > { %5285 = vmatprep.subr.mxu1 %v6109_v5 }
 0xa49   : > { %5286 = vmatpush3.msra.mxu1 %v4046_v16 }
 0xa4a   : > { %5287 = vmatprep.subr.mxu1 %v6109_v5 }
 0xa4b   : > { %5288 = vmatpush3.msra.mxu1 %v4045_v28 }
 0xa4c   : > { %5289 = vmatprep.subr.mxu1 %v6109_v5 }
 0xa4d   : > { %5290 = vmatpush3.msra.mxu1 %v4044_v29 }
 0xa4e   : > { %5291 = vmatprep.subr.mxu1 %v6109_v5 }
 0xa4f   : > { %5292 = vmatpush3.msra.mxu1 %v4043_v30 }
 0xa50   : > { %5293 = vmatprep.subr.mxu1 %v6109_v5 }
 0xa51   : > { %5294 = vmatpush3.msra.mxu1 %v4042_v32 }
 0xa52   : > { %5295 = vmatprep.subr.mxu1 %v6109_v5 }
 0xa53   : > { %5296 = vmatpush3.msra.mxu1 %v4041_v33 }
 0xa54   : > { %5297 = vmatprep.subr.mxu1 %v6109_v5 }
 0xa55   : > { %5298 = vmatpush3.msra.mxu1 %v4040_v34 }
 0xa56   : > { %5299 = vmatprep.subr.mxu1 %v6109_v5 }
 0xa57   : > { %5300 = vmatpush3.msra.mxu1 %v4039_v35 }
 0xa58   : > { %5301 = vmatprep.subr.mxu1 %v6109_v5 }
 0xa59   : > { %5302 = vmatpush3.msra.mxu1 %v4038_v37 }
 0xa5a   : > { %5303 = vmatprep.subr.mxu1 %v6109_v5 }
 0xa5b   : > { %5304 = vmatpush3.msra.mxu1 %v4037_v56 }
 0xa5c   : > { %5305 = vmatprep.subr.mxu1 %v6109_v5 }
 0xa5d   : > { %5306 = vmatpush3.msra.mxu1 %v4036_v57 }
 0xa5e   : > { %5307 = vmatprep.subr.mxu1 %v6109_v5 }
 0xa5f   : > { %5308 = vmatpush3.msra.mxu1 %v4035_v47 }
 0xaf8   : > { %v5073_v2 = vpop.f32.mrf.mxu0 }
 0xafa   : > { %v5074_v3 = vpop.f32.mrf.mxu0 }
 0xafb   : > { %v5075_v4 = vadd.f32 %v5074_v3, %v5073_v2 }
 0xafd   : > { %v3845_v8 = vadd.f32 %v5075_v4, %v7032_v46  ;;  %v3952_v46 = vld [vmem:[%s6603_s13 + $0x58] sm:$0xff] }
 0xafe   : > { %5251 = vmatpush3.msra.mxu0 %v3952_v46  ;;  %v4144_v46 = vsub.s32 4, %v7026_v36 }
 0xaff   : > { %5252 = vmatprep.subr.mxu0 %v6109_v5 }
 0xb00   : > { %v5108_v6 = vpop.f32.mrf.mxu1  ;;  %5253 = vmatpush3.msra.mxu0 %v3951_v13  ;;  %v4149_v13 = vsub.s32 5, %v7026_v36 }
 0xb01   : > { %5254 = vmatprep.subr.mxu0 %v6109_v5 }
 0xb02   : > { %v5109_v7 = vpop.f32.mrf.mxu1  ;;  %5255 = vmatpush3.msra.mxu0 %v3950_v0 }
 0xb03   : > { %v5110_v9 = vadd.f32 %v5109_v7, %v5108_v6  ;;  %5256 = vmatprep.subr.mxu0 %v6109_v5 }
 0xb04   : > { %5257 = vmatpush3.msra.mxu0 %v3949_v14  ;;  %v4145_v14 = vrot.slane %v5543_v50, %v4144_v46 }
 0xb05   : > { %v7306_v10 = vadd.f32 %v5110_v9, %v3845_v8  ;;  %5258 = vmatprep.subr.mxu0 %v6109_v5 }
 0xb06   : > { %5259 = vmatpush3.msra.mxu0 %v3948_v15 }
 0xb07   : > { %3918 = vadd.xlane.f32.xlu0 %v7306_v10  ;;  %v3921_v11 = vmul.f32 %v7306_v10, %v7306_v10  ;;  %5260 = vmatprep.subr.mxu0 %v6109_v5 }
 0xb08   : > { %5261 = vmatpush3.msra.mxu0 %v3947_v17  ;;  %v4150_v17 = vrot.slane %v5543_v50, %v4149_v13 }
 0xb09   : > { %3922 = vadd.xlane.f32.xlu1 %v3921_v11  ;;  %5262 = vmatprep.subr.mxu0 %v6109_v5 }
 0xb0a   : > { %5263 = vmatpush3.msra.mxu0 %v3946_v18 }
 0xb0b   : > { %5264 = vmatprep.subr.mxu0 %v6109_v5 }
 0xb0c   : > { %5265 = vmatpush3.msra.mxu0 %v3945_v19 }
 0xb0d   : > { %5266 = vmatprep.subr.mxu0 %v6109_v5 }
 0xb0e   : > { %5267 = vmatpush3.msra.mxu0 %v3944_v20 }
 0xb0f   : > { %5268 = vmatprep.subr.mxu0 %v6109_v5 }
 0xb10   : > { %5269 = vmatpush3.msra.mxu0 %v3943_v21 }
 0xb11   : > { %5270 = vmatprep.subr.mxu0 %v6109_v5 }
 0xb12   : > { %5271 = vmatpush3.msra.mxu0 %v3942_v22 }
 0xb13   : > { %5272 = vmatprep.subr.mxu0 %v6109_v5 }
 0xb14   : > { %5273 = vmatpush3.msra.mxu0 %v3941_v23 }
 0xb90   : > { %v3919_v38 = vpop.xlane.xlu0 %3918 }
 0xb91   : > { %v3920_v39 = vmul.f32 0.03125, %v3919_v38 }
 0xb92   : > { %v3923_v40 = vpop.xlane.xlu1 %3922 }
 0xb93   : > { %v3925_v41 = vmul.f32 %v3920_v39, %v3920_v39  ;;  %v3924_v42 = vmul.f32 0.03125, %v3923_v40  ;;  %v3927_v49 = vsub.f32 %v7306_v10, %v3920_v39 }
 0xb95   : > { %v3926_v43 = vsub.f32 %v3924_v42, %v3925_v41 }
 0xb97   : > { %v3928_v44 = vadd.f32 1e-05, %v3926_v43 }
 0xb99   : > { %5538 = vrsqrt.f32 %v3928_v44 }
 0xba6   : > { %v5539_v51 = vpop.eup %5538 }
 0xba7   : > { %v3930_v52 = vmul.f32 %v5539_v51, %v3927_v49 }
 0xba9   : > { %v3935_v54 = vmul.f32 %v3934_v31, %v3930_v52 }
 0xbab   : > { %v3940_v55 = vadd.f32 %v3939_v53, %v3935_v54 }
 0xbad   : > { %5275 = vmatmul.mubr.f32.vlgmr.msra.gmra.mxu0 %v3940_v55 }
 0xc6d   : > { %v4030_v59 = vpop.f32.mrf.mxu0 }
 0xc6e   : > { %v4031_v61 = vadd.f32 %v4927_v58, %v4030_v59 }
 0xc6f   : > { %v5276_v62 = vpop.f32.mrf.mxu0 }
 0xc70   : > { %v4034_v63 = vmax.f32 %v4031_v61, 0.0 }
 0xc72   : > { %5310 = vmatmul.mubr.f32.vlgmr.msra.gmra.mxu1 %v4034_v63 }
 0xd32   : > { %v4124_v2 = vpop.f32.mrf.mxu1 }
 0xd33   : > { %v4125_v3 = vadd.f32 %v4928_v1, %v4124_v2 }
 0xd34   : > { %v5311_v4 = vpop.f32.mrf.mxu1 }
 0xd35   : > { %v4128_v6 = vadd.f32 %v4125_v3, %v3940_v55 }
 0xd37   : > { %4129 = vadd.xlane.f32.xlu0 %v4128_v6  ;;  %v4132_v7 = vmul.f32 %v4128_v6, %v4128_v6 }
 0xd39   : > { %4133 = vadd.xlane.f32.xlu1 %v4132_v7 }
 0xdc0   : > { %v4130_v8 = vpop.xlane.xlu0 %4129 }
 0xdc1   : > { %v4131_v9 = vmul.f32 0.03125, %v4130_v8 }
 0xdc2   : > { %v4134_v5 = vpop.xlane.xlu1 %4133 }
 0xdc3   : > { %v4136_v10 = vmul.f32 %v4131_v9, %v4131_v9  ;;  %v4135_v11 = vmul.f32 0.03125, %v4134_v5  ;;  %v4138_v0 = vsub.f32 %v4128_v6, %v4131_v9 }
 0xdc5   : > { %v4137_v60 = vsub.f32 %v4135_v11, %v4136_v10 }
 0xdc7   : > { %v4139_v12 = vadd.f32 1e-05, %v4137_v60 }
 0xdc9   : > { %5540 = vrsqrt.f32 %v4139_v12 }
 0xdd6   : > { %v5541_v15 = vpop.eup %5540 }
 0xdd7   : > { %v4141_v18 = vmul.f32 %v5541_v15, %v4138_v0 }
 0xdd9   : > { %v4146_v19 = vmul.f32 %v4145_v14, %v4141_v18  ;;  %4156 = sbr.rel (%p4929_p13) target bundleno = 3779 (0xec3), region = 148 }
 0xddb   : > { %v4151_v20 = vadd.f32 %v4150_v17, %v4146_v19 }
 0xddd   : > { %4152 = vst [vmem:[#allocation2] sm:$0xff] %v4151_v20 }
 0xdde   : > { %v4172_v21 = vld [vmem:[#allocation25 + $0x78] sm:$0xff]  ;;  %v6111_v22 = vmov 0.0   ;;  %v4171_v23 = vld [vmem:[#allocation25 + $0x70] sm:$0xff]  ;;  %vm6112_vm2 = vmmov 0   ;;  %v4170_v36 = vld [vmem:[#allocation25 + $0x68] sm:$0xff] }
 0xddf   : > { %5312 = vmatprep.subr.mxu0 %v6111_v22  ;;  %5344 = vmatprep.mubr.msk.f32.mxu0 %vm6112_vm2, %v6111_v22  ;;  %v4169_v24 = vld [vmem:[#allocation25 + $0x60] sm:$0xff]  ;;  %v4168_v25 = vld [vmem:[#allocation25 + $0x58] sm:$0xff]  ;;  %v4167_v26 = vld [vmem:[#allocation25 + $0x50] sm:$0xff] }
 0xde0   : > { %5313 = vmatpush3.msra.mxu0 %v4172_v21  ;;  %v4166_v27 = vld [vmem:[#allocation25 + $0x48] sm:$0xff]  ;;  %v4165_v16 = vld [vmem:[#allocation25 + $0x40] sm:$0xff]  ;;  %v4164_v28 = vld [vmem:[#allocation25 + $0x38] sm:$0xff] }
 0xde1   : > { %5314 = vmatprep.subr.mxu0 %v6111_v22  ;;  %v4163_v29 = vld [vmem:[#allocation25 + $0x30] sm:$0xff]  ;;  %v4162_v30 = vld [vmem:[#allocation25 + $0x28] sm:$0xff]  ;;  %v4161_v32 = vld [vmem:[#allocation25 + $0x20] sm:$0xff] }
 0xde2   : > { %5315 = vmatpush3.msra.mxu0 %v4171_v23  ;;  %v4160_v33 = vld [vmem:[#allocation25 + $0x18] sm:$0xff]  ;;  %v4159_v34 = vld [vmem:[#allocation25 + $0x10] sm:$0xff]  ;;  %v4158_v35 = vld [vmem:[#allocation25 + $0x8] sm:$0xff] }
 0xde3   : > { %5316 = vmatprep.subr.mxu0 %v6111_v22  ;;  %v4157_v37 = vld [vmem:[#allocation25] sm:$0xff] }
 0xde4   : > { %5317 = vmatpush3.msra.mxu0 %v4170_v36  ;;  %v4930_v38 = vld [vmem:[#allocation27] ss:$0 sm:$0xff] }
 0xde5   : > { %5318 = vmatprep.subr.mxu0 %v6111_v22 }
 0xde6   : > { %5319 = vmatpush3.msra.mxu0 %v4169_v24 }
 0xde7   : > { %5320 = vmatprep.subr.mxu0 %v6111_v22 }
 0xde8   : > { %5321 = vmatpush3.msra.mxu0 %v4168_v25 }
 0xde9   : > { %5322 = vmatprep.subr.mxu0 %v6111_v22 }
 0xdea   : > { %5323 = vmatpush3.msra.mxu0 %v4167_v26 }
 0xdeb   : > { %5324 = vmatprep.subr.mxu0 %v6111_v22 }
 0xdec   : > { %5325 = vmatpush3.msra.mxu0 %v4166_v27 }
 0xded   : > { %5326 = vmatprep.subr.mxu0 %v6111_v22 }
 0xdee   : > { %5327 = vmatpush3.msra.mxu0 %v4165_v16 }
 0xdef   : > { %5328 = vmatprep.subr.mxu0 %v6111_v22 }
 0xdf0   : > { %5329 = vmatpush3.msra.mxu0 %v4164_v28 }
 0xdf1   : > { %5330 = vmatprep.subr.mxu0 %v6111_v22 }
 0xdf2   : > { %5331 = vmatpush3.msra.mxu0 %v4163_v29 }
 0xdf3   : > { %5332 = vmatprep.subr.mxu0 %v6111_v22 }
 0xdf4   : > { %5333 = vmatpush3.msra.mxu0 %v4162_v30 }
 0xdf5   : > { %5334 = vmatprep.subr.mxu0 %v6111_v22 }
 0xdf6   : > { %5335 = vmatpush3.msra.mxu0 %v4161_v32 }
 0xdf7   : > { %5336 = vmatprep.subr.mxu0 %v6111_v22 }
 0xdf8   : > { %5337 = vmatpush3.msra.mxu0 %v4160_v33 }
 0xdf9   : > { %5338 = vmatprep.subr.mxu0 %v6111_v22 }
 0xdfa   : > { %5339 = vmatpush3.msra.mxu0 %v4159_v34 }
 0xdfb   : > { %5340 = vmatprep.subr.mxu0 %v6111_v22 }
 0xdfc   : > { %5341 = vmatpush3.msra.mxu0 %v4158_v35 }
 0xdfd   : > { %5342 = vmatprep.subr.mxu0 %v6111_v22 }
 0xdfe   : > { %5343 = vmatpush3.msra.mxu0 %v4157_v37 }
 0xdff   : > { %5345 = vmatmul.mubr.f32.vlgmr.msra.gmra.mxu0 %v4151_v20 }
 0xebf   : > { %v4246_v39 = vpop.f32.mrf.mxu0 }
 0xec0   : > { %v4247_v40 = vadd.f32 %v4930_v38, %v4246_v39 }
 0xec1   : > { %v5346_v41 = vpop.f32.mrf.mxu0 }
 0xec2   : > { %4250 = vst [vmem:[%s986_s1] sm:$0xff] %v4247_v40 }
 0xec3 PF: > { %s7552_s4 = sld [smem:[#allocation43_spill]]  ;;  %s4265_s25 = sshll.u32 %s986_s1, 4  ;;  %s4266_s25 = int_to_ptr.vmem [resolvable:$true] %s4265_s25 }
 0xec4   : > { %s7553_s15 = sld [smem:[#allocation53_spill]]  ;;  %s4252_s19 = scalar_lea.sflag [#allocation6], %s6544_s6 }
 0xec5   : > { %s7554_s18 = sld [smem:[#allocation67_spill]]  ;;  %s5934_s20 = scalar_lea.vmem %s4266_s25, 128 }
 0xec6   : > { %p5935_p6 = scmp.ne.s32.totalorder %s4266_s25, %s5934_s20  ;;  %s6113_s14 = smov [#allocation28]  }
 0xec7   : > { %s5938_s12 = sshll.u32 %s6113_s14, 4  ;;  %s5939_s12 = int_to_ptr.vmem [resolvable:$false] %s5938_s12 }
 0xec8   : > { %s5940_s8 = scalar_lea.vmem %s5939_s12, 256  ;;  %p5941_p9 = scmp.lt.s32.totalorder %s4266_s25, %s5939_s12 }
 0xec9   : > { %s4932_s29 = sshll.u32 %s7552_s4, 7  ;;  %p5942_p4 = scmp.lt.s32.totalorder %s5940_s8, %s5934_s20 }
 0xeca   : > { %p7556_p3 = scmp.ne.s32.totalorder %s7553_s15, 0 }
 0xecb   : > { %s7555_s3 = smov %s7554_s18  ;;  %s4263_s28 = scalar_lea.hbm %s7554_s18, %s4932_s29 }
 0xecc   : > { %p5936_p7 = pnand %p5935_p6, %p7556_p3  ;;  %p5943_p11 = por %p5942_p4, %p5941_p9 }
 0xece   : > { %p5937_p1 = pneg %p5936_p7 }
 0xed0   : > { %p5944_p5 = pnand %p5943_p11, %p5937_p1 }
 0xed2   : > { %5947 = shalt.err (!%p5944_p5)
}
 0xed3   : > { %s5948_s13 = scalar_lea.hbm %s4263_s28, 128  ;;  %s5952_s10 = scalar_lea.hbm %s7555_s3, 256 }
 0xed4   : > { %p5949_p10 = scmp.ne.s32.totalorder %s4263_s28, %s5948_s13  ;;  %p5953_p2 = scmp.lt.s32.totalorder %s4263_s28, %s7555_s3 }
 0xed5   : > { %p5954_p8 = scmp.lt.s32.totalorder %s5952_s10, %s5948_s13 }
 0xed6   : > { %p5950_p0 = pnand %p5949_p10, %p7556_p3 }
 0xed7   : > { %p5955_p13 = por %p5954_p8, %p5953_p2 }
 0xed8   : > { %p5951_p12 = pneg %p5950_p0 }
 0xeda   : > { %p5956_p6 = pnand %p5955_p13, %p5951_p12 }
 0xedc   : > { %5959 = shalt.err (!%p5956_p6)
}
 0xedd   : > { %5386 = dma.vmem_to_hbm [thread:$0]  (%p7556_p3), %s4266_s25, 128, %s4263_s28, %s4252_s19  }
 0xede PF: > { %s7557_s21 = sld [smem:[#allocation45_spill]] }
 0xedf   : > { %s7558_s1 = sld [smem:[#allocation41_spill]] }
 0xee0   : > { %s7559_s30 = sld [smem:[#allocation54_spill]] }
 0xee4   : > { %p5403_p7 = scmp.ge.s32.totalorder %s7557_s21, 2 }
 0xee5   : > { %s4277_s16 = sand.u32 1, %s7558_s1  }
 0xee6   : > { %p7560_p1 = scmp.ne.s32.totalorder %s7559_s30, 0  ;;  %s4278_s4 = scalar_lea.sflag [#allocation6], %s4277_s16 }
 0xee8   : > { %p5396_p9 = pnand %p5403_p7, %p7560_p1 }
 0xeea   : > { %p5397_p4 = pneg %p5396_p9 }
 0xeec   : > { %6041 = dma.done.wait (%p5397_p4), %s4278_s4, 128  }
 0xeed   : > { %6043 = vsyncadd (%p5397_p4), %s4278_s4, 4294967168  ;;  %s50_s28 = sadd.s32 1, %s7557_s21   ;;  %s7561_s18 = sld [smem:[#allocation39_spill]] }
 0xeee   : > { %p47_p11 = scmp.ge.s32.totalorder %s50_s28, 6   ;;  %s7562_s19 = sld [smem:[#allocation40_spill]] }
 0xeef   : > { %s7563_s20 = sld [smem:[#allocation50_spill]]  ;;  %s7568_s21 = smov %s6062_s22 }
 0xef0   : > { %s7564_s15 = sld [smem:[#allocation51_spill]]  ;;  %s7569_s22 = smov %s6066_s23 }
 0xef1   : > { %s7565_s25 = sld [smem:[#allocation44_spill]]  ;;  %s7571_s24 = smov %s6078_s26 }
 0xef2   : > { %s7566_s29 = sld [smem:[#allocation47_spill]] }
 0xef3   : > { %s7567_s27 = sld [smem:[#allocation48_spill]] }
 0xef4   :  { %49 = sbr.rel (!%p47_p11) target bundleno = 36 (0x24), region = 289 }
 0xef6   : > { %s7570_s23 = smov %s7564_s15 }
 0xef8   : > { %s7572_s26 = smov %s7566_s29 }
 0xef9   :  { %4283 = vsyncpa [#allocation5], 1 }
 0xefa   :  { %4285 = vsyncpa [#allocation5 + $0x1], 1 }
 0xefb   :  { %4286 = vsyncpa [#allocation8], 1 }
 0xefc   :  { %4288 = vsyncpa [#allocation8 + $0x1], 1 }
 0xefd   :  { %4289 = vsyncpa [#allocation11], 1 }
 0xefe   :  { %4291 = vsyncpa [#allocation11 + $0x1], 1 }
 0xeff   :  { %4292 = vsyncpa [#allocation14], 1 }
 0xf00   :  { %4294 = vsyncpa [#allocation14 + $0x1], 1 }
 0xf01   :  { %4295 = vsyncpa [#allocation17], 1 }
 0xf02   :  { %4297 = vsyncpa [#allocation17 + $0x1], 1 }
 0xf03   :  { %4298 = vsyncpa [#allocation20], 1 }
 0xf04   :  { %4300 = vsyncpa [#allocation20 + $0x1], 1 }
 0xf05   :  { %4301 = vsyncpa [#allocation23], 1 }
 0xf06   :  { %4303 = vsyncpa [#allocation23 + $0x1], 1 }
 0xf07   :  { %4304 = vsyncpa [#allocation26], 1 }
 0xf08   :  { %4305 = vsyncpa [#allocation6], 1 }
 0xf09   :  { %4307 = vsyncpa [#allocation6 + $0x1], 1 }

</bundles_post_ra>
